<compile_context>
chip_gen: v7x
topology: tpu7x:2x2x1
jax: 0.10.0
libtpu: 0.0.40
codegen_flags: <defaults>
</compile_context>

<pallas_src>
import math

import jax
import jax.numpy as jnp
import numpy as np
from jax.experimental import pallas as pl
from jax.experimental.pallas import tpu as pltpu

LEAKY_SLOPE = 0.2
LN_EPS = 1e-5
MXU_DTYPE = jnp.bfloat16                 # MXU operand dtype (f32 accumulation)
VMEM_LIMIT_BYTES = 48 * 1024 * 1024


# ------------------------------ shared math ----------------------------------

def _leaky_relu(v):
    return jnp.where(v >= 0, v, LEAKY_SLOPE * v)


def _ln_lrelu_rows(y, g, be):
    """LayerNorm over the last dim of (B, F) + LeakyReLU.  Single-pass stats (f32)."""
    n = y.shape[-1]
    s1 = jnp.sum(y, axis=-1, keepdims=True)
    s2 = jnp.sum(y * y, axis=-1, keepdims=True)
    mu = s1 * (1.0 / n)
    var = s2 * (1.0 / n) - mu * mu       # f32 accumulators, values are O(1)
    yn = (y - mu) * jax.lax.rsqrt(var + LN_EPS) * g + be
    return _leaky_relu(yn)


def _ln_lrelu_slab(y, g, be):
    """Per-sample LayerNorm over the whole (L, C) slab (PyTorch LayerNorm([C, L]))."""
    n = y.shape[1] * y.shape[2]
    s1 = jnp.sum(jnp.sum(y, axis=2, keepdims=True), axis=1, keepdims=True)
    s2 = jnp.sum(jnp.sum(y * y, axis=2, keepdims=True), axis=1, keepdims=True)
    mu = s1 * (1.0 / n)
    var = s2 * (1.0 / n) - mu * mu
    yn = (y - mu) * jax.lax.rsqrt(var + LN_EPS)
    yn = yn * g[None] + be[None]
    return _leaky_relu(yn)


# ----------------------------- Pallas kernels --------------------------------

def _make_conv_stack_kernel(layer_dims, kernel_size, stride, padding):
    """Fused conv stack.  layer_dims: list of (L_in, C_in, L_out, C_out)."""
    n_layers = len(layer_dims)
    n_in = 1 + 4 * n_layers                       # x + (w, b, g, be) per layer

    def kernel(*refs):
        x_ref = refs[0]
        out_ref = refs[n_in]
        pad_refs = refs[n_in + 1:]
        h = x_ref[...].astype(jnp.float32)        # (B_blk, L0, C0)
        pos = 1
        for li, (l_in, c_in, l_out, c_out) in enumerate(layer_dims):
            w_ref, b_ref, g_ref, be_ref = refs[pos:pos + 4]
            pos += 4
            pad_ref = pad_refs[li]                # VMEM (B_blk, l_in + 2p, c_in) f32
            bb = h.shape[0]

            # in-kernel "same" padding: zero the halo rows, write the interior.
            zeros = jnp.zeros((bb, padding, c_in), jnp.float32)
            pad_ref[:, 0:padding, :] = zeros
            pad_ref[:, padding + l_in:padding + l_in + padding, :] = zeros
            pad_ref[:, padding:padding + l_in, :] = h

            # strided conv = K accumulated MXU matmuls over stride-s taps,
            # batch stacked along M (M = B_blk * L_out).
            acc = jnp.zeros((bb * l_out, c_out), jnp.float32)
            for k in range(kernel_size):
                tap = pad_ref[:, pl.ds(k, l_out, stride=stride), :]   # (bb, l_out, c_in)
                tap = tap.reshape(bb * l_out, c_in).astype(MXU_DTYPE)
                acc = acc + jnp.dot(tap, w_ref[k],
                                    preferred_element_type=jnp.float32)
            y = acc.reshape(bb, l_out, c_out) + b_ref[...][None]
            h = _ln_lrelu_slab(y, g_ref[...], be_ref[...])
        out_ref[...] = h                          # (B_blk, L_last, C_last), lane-dense

    return kernel


def _make_linear_stack_kernel(n_enc_lin, n_dec_lin):
    """Fused linear stack: encoder hidden linears, latent head, decoder linears,
    softmax.  n_enc_lin / n_dec_lin count Linear layers incl. the final ones."""
    n_in = 2 + 4 * (n_enc_lin - 1) + 2 + 5 + 4 * (n_dec_lin - 2) + 2

    def kernel(*refs):
        h_ref, nv_ref = refs[0], refs[1]
        latent_ref, probs_ref = refs[n_in], refs[n_in + 1]
        pos = 2

        x = h_ref[...]
        for _ in range(n_enc_lin - 1):            # encoder hidden linears (+LN+LReLU)
            w, b, g, be = refs[pos:pos + 4]
            pos += 4
            y = jnp.dot(x.astype(MXU_DTYPE), w[...],
                        preferred_element_type=jnp.float32) + b[...]
            x = _ln_lrelu_rows(y, g[...], be[...])

        w, b = refs[pos:pos + 2]                  # latent projection (no LN / act)
        pos += 2
        latent = jnp.dot(x.astype(MXU_DTYPE), w[...],
                         preferred_element_type=jnp.float32) + b[...]
        latent_ref[...] = latent

        # first decoder linear: torch.concat((latent, notev), dim=1) @ W is
        # folded into latent @ W_lat + notev @ W_nv with a split weight.
        w_lat, w_nv, b0, g0, be0 = refs[pos:pos + 5]
        pos += 5
        y = (jnp.dot(latent.astype(MXU_DTYPE), w_lat[...],
                     preferred_element_type=jnp.float32)
             + jnp.dot(nv_ref[...].astype(MXU_DTYPE), w_nv[...],
                       preferred_element_type=jnp.float32)
             + b0[...])
        x = _ln_lrelu_rows(y, g0[...], be0[...])

        for _ in range(1, n_dec_lin - 1):         # remaining hidden decoder linears
            w, b, g, be = refs[pos:pos + 4]
            pos += 4
            y = jnp.dot(x.astype(MXU_DTYPE), w[...],
                        preferred_element_type=jnp.float32) + b[...]
            x = _ln_lrelu_rows(y, g[...], be[...])

        w, b = refs[pos:pos + 2]                  # classification head + softmax(dim=1)
        logits = jnp.dot(x.astype(MXU_DTYPE), w[...],
                         preferred_element_type=jnp.float32) + b[...]
        m = jnp.max(logits, axis=-1, keepdims=True)
        e = jnp.exp(logits - m)
        probs_ref[...] = e / jnp.sum(e, axis=-1, keepdims=True)

    return kernel


# --------------------------- pallas_call wrappers -----------------------------

def _const_index_map(ndim):
    return lambda i: (0,) * ndim


def _batch_block(b):
    # Keep B_blk == B for small batches so 2-D blocks keep their second-to-last
    # dim equal to the full array dim (the (8,128) BlockSpec rule); use 8 when
    # the batch is large and divisible.
    if b <= 8:
        return b
    return 8 if b % 8 == 0 else b


def conv_stack_forward(x, conv_params, layer_dims, kernel_size, stride, padding):
    B, L0, C0 = x.shape
    b_blk = _batch_block(B)
    assert B % b_blk == 0
    grid = (B // b_blk,)
    l_last, c_last = layer_dims[-1][2], layer_dims[-1][3]

    in_specs = [pl.BlockSpec((b_blk, L0, C0), lambda i: (i, 0, 0))]
    flat_params = []
    for layer in conv_params:
        for p in layer:
            flat_params.append(p)
            in_specs.append(pl.BlockSpec(p.shape, _const_index_map(p.ndim)))

    scratch_shapes = [
        pltpu.VMEM((b_blk, l_in + 2 * padding, c_in), jnp.float32)
        for (l_in, c_in, _, _) in layer_dims
    ]

    kernel = _make_conv_stack_kernel(layer_dims, kernel_size, stride, padding)
    return pl.pallas_call(
        kernel,
        out_shape=jax.ShapeDtypeStruct((B, l_last, c_last), jnp.float32),
        grid=grid,
        in_specs=in_specs,
        out_specs=pl.BlockSpec((b_blk, l_last, c_last), lambda i: (i, 0, 0)),
        scratch_shapes=scratch_shapes,
        compiler_params=pltpu.CompilerParams(
            dimension_semantics=("parallel",),
            vmem_limit_bytes=VMEM_LIMIT_BYTES),
    )(x, *flat_params)


def linear_stack_forward(h, notev, enc_lin_params, dec_lin_params,
                         latent_dim, n_classes):
    B, F0 = h.shape
    b_blk = _batch_block(B)
    assert B % b_blk == 0
    grid = (B // b_blk,)

    flat_params = []
    for layer in enc_lin_params:
        flat_params.extend(layer)
    for layer in dec_lin_params:
        flat_params.extend(layer)

    in_specs = [pl.BlockSpec((b_blk, F0), lambda i: (i, 0)),
                pl.BlockSpec((b_blk, notev.shape[1]), lambda i: (i, 0))]
    in_specs += [pl.BlockSpec(p.shape, _const_index_map(p.ndim)) for p in flat_params]

    kernel = _make_linear_stack_kernel(len(enc_lin_params), len(dec_lin_params))
    out_shape = (jax.ShapeDtypeStruct((B, latent_dim), jnp.float32),
                 jax.ShapeDtypeStruct((B, n_classes), jnp.float32))
    out_specs = (pl.BlockSpec((b_blk, latent_dim), lambda i: (i, 0)),
                 pl.BlockSpec((b_blk, n_classes), lambda i: (i, 0)))

    return pl.pallas_call(
        kernel,
        out_shape=out_shape,
        grid=grid,
        in_specs=in_specs,
        out_specs=out_specs,
        compiler_params=pltpu.CompilerParams(
            dimension_semantics=("parallel",),
            vmem_limit_bytes=VMEM_LIMIT_BYTES),
    )(h, notev, *flat_params)


# -------------------------------- the model ----------------------------------

def _xavier_normal(key, shape, fan_in, fan_out):
    std = math.sqrt(2.0 / (fan_in + fan_out))
    return std * jax.random.normal(key, shape, dtype=jnp.float32)


class ConditionConvVAEPallas:
    """Pallas/JAX re-implementation of the PyTorch ConditionConvVAE forward pass."""

    def __init__(self, key, enc_linears, enc_channels, dec_linears, input_crop,
                 kernel_size=5, dilation=1, padding=None, stride=2, output_padding=1):
        if padding is None:
            padding = kernel_size // 2
        assert dilation == 1, "only dilation=1 (the module default) is implemented"
        conv_sizes = [input_crop]
        for _ in range(len(enc_channels) - 1):
            cs = (conv_sizes[-1] + 2 * padding - dilation * (kernel_size - 1) - 1) / stride + 1
            conv_sizes.append(math.floor(cs))
        intermediate = conv_sizes[-1] * enc_channels[-1]
        enc_linears = [intermediate] + list(enc_linears)
        dec_linears = list(dec_linears)
        assert len(dec_linears) >= 3, "decoder needs >= 2 Linear layers"

        self.input_crop = input_crop
        self.kernel_size = kernel_size
        self.stride = stride
        self.padding = padding
        self.enc_channels = list(enc_channels)
        self.enc_linears = enc_linears
        self.dec_linears = dec_linears
        self.conv_sizes = conv_sizes
        self.latent_dim = enc_linears[-1]
        self.notev_dim = dec_linears[0] - self.latent_dim
        assert self.notev_dim > 0
        self.num_classes = dec_linears[-1]

        self.layer_dims = [
            (conv_sizes[i], enc_channels[i], conv_sizes[i + 1], enc_channels[i + 1])
            for i in range(len(enc_channels) - 1)
        ]

        n_keys = (len(enc_channels) - 1) + (len(enc_linears) - 1) + (len(dec_linears) - 1)
        keys = iter(jax.random.split(key, max(n_keys, 2)))

        # ---- conv blocks (weights bf16 for the MXU, affine params f32) ----
        self.conv_params = []
        for i in range(len(enc_channels) - 1):
            cin, cout = enc_channels[i], enc_channels[i + 1]
            lout = conv_sizes[i + 1]
            # PyTorch Conv1d layout (Cout, Cin, K), xavier_normal_, zero bias.
            w_pt = _xavier_normal(next(keys), (cout, cin, kernel_size),
                                  fan_in=cin * kernel_size, fan_out=cout * kernel_size)
            w = jnp.transpose(w_pt, (2, 1, 0)).astype(MXU_DTYPE)     # (K, Cin, Cout)
            b = jnp.zeros((1, cout), jnp.float32)
            # LayerNorm([C, L]) affine params in the kernel's (L, C) layout.
            g = jnp.ones((lout, cout), jnp.float32)
            be = jnp.zeros((lout, cout), jnp.float32)
            self.conv_params.append((w, b, g, be))

        # ---- encoder linears ----
        c_last, l_last = enc_channels[-1], conv_sizes[-1]
        self.enc_lin_params = []
        self._enc_lin0_w_pt = None
        for i in range(len(enc_linears) - 1):
            fin, fout = enc_linears[i], enc_linears[i + 1]
            w_pt = _xavier_normal(next(keys), (fout, fin),
                                  fan_in=fin, fan_out=fout).astype(MXU_DTYPE)
            if i == 0:
                # PyTorch flattens (B, C, L) channel-major; the conv kernel emits
                # (B, L, C) flattened row-major, so permute the weight columns
                # (c*L + l -> l*C + c) once at init (no runtime transpose).
                self._enc_lin0_w_pt = w_pt                            # for reference
                w_k = jnp.transpose(
                    jnp.transpose(w_pt.reshape(fout, c_last, l_last), (0, 2, 1))
                    .reshape(fout, l_last * c_last))                  # (L*C, fout)
            else:
                w_k = w_pt.T
            b = jnp.zeros((1, fout), jnp.float32)
            if i < len(enc_linears) - 2:
                g = jnp.ones((1, fout), jnp.float32)
                be = jnp.zeros((1, fout), jnp.float32)
                self.enc_lin_params.append((w_k, b, g, be))
            else:
                self.enc_lin_params.append((w_k, b))                  # latent head

        # ---- decoder linears ----
        self.dec_lin_params = []
        for i in range(len(dec_linears) - 1):
            fin, fout = dec_linears[i], dec_linears[i + 1]
            w_pt = _xavier_normal(next(keys), (fout, fin), fan_in=fin, fan_out=fout)
            w_k = w_pt.T.astype(MXU_DTYPE)                             # (fin, fout)
            b = jnp.zeros((1, fout), jnp.float32)
            if i == 0:
                # split so concat((latent, notev)) becomes two matmuls in-kernel
                w_lat = w_k[:self.latent_dim]
                w_nv = w_k[self.latent_dim:]
                g = jnp.ones((1, fout), jnp.float32)
                be = jnp.zeros((1, fout), jnp.float32)
                self.dec_lin_params.append((w_lat, w_nv, b, g, be))
            elif i < len(dec_linears) - 2:
                g = jnp.ones((1, fout), jnp.float32)
                be = jnp.zeros((1, fout), jnp.float32)
                self.dec_lin_params.append((w_k, b, g, be))
            else:
                self.dec_lin_params.append((w_k, b))                   # softmax head

    # ----- forward with the two fused Pallas kernels -----
    def __call__(self, inp, notev):
        # inp: (B, seq, C_in); notev: (B, notev_dim).  Dropout(p=0.0) == identity.
        assert notev.shape[1] == self.notev_dim
        x = inp[:, :self.input_crop, :].astype(jnp.float32)     # crop along sequence
        conv_out = conv_stack_forward(x, self.conv_params, self.layer_dims,
                                      self.kernel_size, self.stride, self.padding)
        h = conv_out.reshape(conv_out.shape[0], -1)  # free row-major (l, c) flatten
        return linear_stack_forward(h, notev, self.enc_lin_params,
                                    self.dec_lin_params, self.latent_dim,
                                    self.num_classes)

    # ----- pure-JAX mirror (same params / same math), for verification -----
    def reference(self, inp, notev):
        h = inp[:, :self.input_crop, :].astype(jnp.float32)
        for (w, b, g, be), (l_in, c_in, l_out, c_out) in zip(self.conv_params,
                                                             self.layer_dims):
            hp = jnp.pad(h, ((0, 0), (self.padding, self.padding), (0, 0)))
            B = h.shape[0]
            acc = jnp.zeros((B, l_out, c_out), jnp.float32)
            for k in range(self.kernel_size):
                tap = hp[:, k:k + self.stride * (l_out - 1) + 1:self.stride, :]
                tap = tap.astype(MXU_DTYPE).reshape(B * l_out, c_in)
                acc = acc + jnp.dot(tap, w[k], preferred_element_type=jnp.float32
                                    ).reshape(B, l_out, c_out)
            y = acc + b[None]
            h = _ln_lrelu_slab(y, g, be)
        # flatten the PyTorch way ((B, C, L) channel-major) with the un-permuted
        # first-linear weight: independently verifies the init-time permutation.
        B = h.shape[0]
        x = jnp.transpose(h, (0, 2, 1)).reshape(B, -1)
        first = True
        for layer in self.enc_lin_params[:-1]:
            w, b, g, be = layer
            if first:
                w = self._enc_lin0_w_pt.T
                first = False
            y = jnp.dot(x.astype(MXU_DTYPE), w, preferred_element_type=jnp.float32) + b
            x = _ln_lrelu_rows(y, g, be)
        w, b = self.enc_lin_params[-1]
        if first:
            w = self._enc_lin0_w_pt.T
        latent = jnp.dot(x.astype(MXU_DTYPE), w, preferred_element_type=jnp.float32) + b

        xx = jnp.concatenate([latent, notev.astype(jnp.float32)], axis=1)
        w_lat, w_nv, b0, g0, be0 = self.dec_lin_params[0]
        w_full = jnp.concatenate([w_lat, w_nv], axis=0)
        y = jnp.dot(xx.astype(MXU_DTYPE), w_full, preferred_element_type=jnp.float32) + b0
        xx = _ln_lrelu_rows(y, g0, be0)
        for layer in self.dec_lin_params[1:-1]:
            w, b, g, be = layer
            y = jnp.dot(xx.astype(MXU_DTYPE), w, preferred_element_type=jnp.float32) + b
            xx = _ln_lrelu_rows(y, g, be)
        w, b = self.dec_lin_params[-1]
        logits = jnp.dot(xx.astype(MXU_DTYPE), w, preferred_element_type=jnp.float32) + b
        return latent, jax.nn.softmax(logits, axis=1)


# ----------------------------------- main -------------------------------------

if __name__ == "__main__":
    # Small configuration exercising the exact same code path as the real one
    # (enc_channels=[128,512,256,128,64], enc_linears=[512,...,2], input_crop=225,
    #  dec_linears=[90,...,n_classes]).
    enc_channels = [4, 8, 8, 8, 8]          # 4 conv blocks
    input_crop = 32                         # conv sizes: 32 -> 16 -> 8 -> 4 -> 2
    enc_linears = [8, 4, 2]                 # prepended with intermediate 2*8=16
    num_classes = 10
    notev_dim = 6
    dec_linears = [2 + notev_dim, 16, 16, num_classes]

    key = jax.random.PRNGKey(0)
    k_model, k_x, k_n = jax.random.split(key, 3)

    model = ConditionConvVAEPallas(k_model, enc_linears, enc_channels, dec_linears,
                                   input_crop, kernel_size=5, stride=2)

    batch = 2
    seq = 36                                # > input_crop, exercises the crop
    x = jax.random.normal(k_x, (batch, seq, enc_channels[0]), dtype=jnp.float32)
    notev = jax.random.normal(k_n, (batch, notev_dim), dtype=jnp.float32)

    fwd = jax.jit(model.__call__)
    latent, probs = fwd(x, notev)
    latent = jax.block_until_ready(latent)
    probs = jax.block_until_ready(probs)

    # verify against the pure-JAX reference (same bf16-MXU / f32-elementwise math)
    latent_ref, probs_ref = model.reference(x, notev)
    np.testing.assert_allclose(np.asarray(latent), np.asarray(latent_ref),
                               rtol=2e-2, atol=2e-2)
    np.testing.assert_allclose(np.asarray(probs), np.asarray(probs_ref),
                               rtol=2e-2, atol=2e-2)
    assert latent.shape == (batch, enc_linears[-1])
    assert probs.shape == (batch, num_classes)
    np.testing.assert_allclose(np.asarray(probs).sum(axis=1), np.ones(batch), atol=1e-4)

    print("KERNEL_OK")
</pallas_src>

<mosaic_0001>
module attributes {stable_mosaic.version = 11 : i64} {
  func.func @kernel(%arg0: i32, %arg1: memref<2x32x4xf32, #tpu.memory_space<vmem>>, %arg2: memref<5x4x8xbf16, #tpu.memory_space<vmem>>, %arg3: memref<1x8xf32, #tpu.memory_space<vmem>>, %arg4: memref<16x8xf32, #tpu.memory_space<vmem>>, %arg5: memref<16x8xf32, #tpu.memory_space<vmem>>, %arg6: memref<5x8x8xbf16, #tpu.memory_space<vmem>>, %arg7: memref<1x8xf32, #tpu.memory_space<vmem>>, %arg8: memref<8x8xf32, #tpu.memory_space<vmem>>, %arg9: memref<8x8xf32, #tpu.memory_space<vmem>>, %arg10: memref<5x8x8xbf16, #tpu.memory_space<vmem>>, %arg11: memref<1x8xf32, #tpu.memory_space<vmem>>, %arg12: memref<4x8xf32, #tpu.memory_space<vmem>>, %arg13: memref<4x8xf32, #tpu.memory_space<vmem>>, %arg14: memref<5x8x8xbf16, #tpu.memory_space<vmem>>, %arg15: memref<1x8xf32, #tpu.memory_space<vmem>>, %arg16: memref<2x8xf32, #tpu.memory_space<vmem>>, %arg17: memref<2x8xf32, #tpu.memory_space<vmem>>, %arg18: memref<2x2x8xf32, #tpu.memory_space<vmem>>, %arg19: memref<2x36x4xf32, #tpu.memory_space<vmem>>, %arg20: memref<2x20x8xf32, #tpu.memory_space<vmem>>, %arg21: memref<2x12x8xf32, #tpu.memory_space<vmem>>, %arg22: memref<2x8x8xf32, #tpu.memory_space<vmem>>) attributes {dimension_semantics = [#tpu.dimension_semantics<parallel>], iteration_bounds = array<i64: 1>, scalar_prefetch = 0 : i64, scratch_operands = 4 : i64, tpu.core_type = #tpu.core_type<tc>, window_params = [{transform_indices = @transform_0, window_bounds = array<i64: 2, 32, 4>}, {pipeline_mode = #tpu.pipeline_mode<synchronous>, transform_indices = @transform_1, window_bounds = array<i64: 5, 4, 8>}, {pipeline_mode = #tpu.pipeline_mode<synchronous>, transform_indices = @transform_2, window_bounds = array<i64: 1, 8>}, {pipeline_mode = #tpu.pipeline_mode<synchronous>, transform_indices = @transform_3, window_bounds = array<i64: 16, 8>}, {pipeline_mode = #tpu.pipeline_mode<synchronous>, transform_indices = @transform_4, window_bounds = array<i64: 16, 8>}, {pipeline_mode = #tpu.pipeline_mode<synchronous>, transform_indices = @transform_5, window_bounds = array<i64: 5, 8, 8>}, {pipeline_mode = #tpu.pipeline_mode<synchronous>, transform_indices = @transform_6, window_bounds = array<i64: 1, 8>}, {pipeline_mode = #tpu.pipeline_mode<synchronous>, transform_indices = @transform_7, window_bounds = array<i64: 8, 8>}, {pipeline_mode = #tpu.pipeline_mode<synchronous>, transform_indices = @transform_8, window_bounds = array<i64: 8, 8>}, {pipeline_mode = #tpu.pipeline_mode<synchronous>, transform_indices = @transform_9, window_bounds = array<i64: 5, 8, 8>}, {pipeline_mode = #tpu.pipeline_mode<synchronous>, transform_indices = @transform_10, window_bounds = array<i64: 1, 8>}, {pipeline_mode = #tpu.pipeline_mode<synchronous>, transform_indices = @transform_11, window_bounds = array<i64: 4, 8>}, {pipeline_mode = #tpu.pipeline_mode<synchronous>, transform_indices = @transform_12, window_bounds = array<i64: 4, 8>}, {pipeline_mode = #tpu.pipeline_mode<synchronous>, transform_indices = @transform_13, window_bounds = array<i64: 5, 8, 8>}, {pipeline_mode = #tpu.pipeline_mode<synchronous>, transform_indices = @transform_14, window_bounds = array<i64: 1, 8>}, {pipeline_mode = #tpu.pipeline_mode<synchronous>, transform_indices = @transform_15, window_bounds = array<i64: 2, 8>}, {pipeline_mode = #tpu.pipeline_mode<synchronous>, transform_indices = @transform_16, window_bounds = array<i64: 2, 8>}, {transform_indices = @transform_17, window_bounds = array<i64: 2, 2, 8>}]} {
    %c0 = arith.constant 0 : index
    %c0_0 = arith.constant 0 : index
    %c0_1 = arith.constant 0 : index
    %0 = vector.load %arg1[%c0, %c0_0, %c0_1] : memref<2x32x4xf32, #tpu.memory_space<vmem>>, vector<2x32x4xf32>
    %cst = arith.constant 0.000000e+00 : f32
    %1 = vector.broadcast %cst : f32 to vector<2x2x4xf32>
    %c0_2 = arith.constant 0 : index
    %c0_3 = arith.constant 0 : index
    %c0_4 = arith.constant 0 : index
    %2 = vector.load %arg19[%c0_2, %c0_3, %c0_4] : memref<2x36x4xf32, #tpu.memory_space<vmem>>, vector<2x2x4xf32>
    tpu.vector_store %arg19[%c0_2, %c0_3, %c0_4], %1 {strides = array<i32>} : memref<2x36x4xf32, #tpu.memory_space<vmem>>, vector<2x2x4xf32>,
    %c0_5 = arith.constant 0 : index
    %c34 = arith.constant 34 : index
    %c0_6 = arith.constant 0 : index
    %3 = vector.load %arg19[%c0_5, %c34, %c0_6] : memref<2x36x4xf32, #tpu.memory_space<vmem>>, vector<2x2x4xf32>
    tpu.vector_store %arg19[%c0_5, %c34, %c0_6], %1 {strides = array<i32>} : memref<2x36x4xf32, #tpu.memory_space<vmem>>, vector<2x2x4xf32>,
    %c0_7 = arith.constant 0 : index
    %c2 = arith.constant 2 : index
    %c0_8 = arith.constant 0 : index
    %4 = vector.load %arg19[%c0_7, %c2, %c0_8] : memref<2x36x4xf32, #tpu.memory_space<vmem>>, vector<2x32x4xf32>
    tpu.vector_store %arg19[%c0_7, %c2, %c0_8], %0 {strides = array<i32>} : memref<2x36x4xf32, #tpu.memory_space<vmem>>, vector<2x32x4xf32>,
    %cst_9 = arith.constant 0.000000e+00 : f32
    %5 = vector.broadcast %cst_9 : f32 to vector<32x8xf32>
    %c0_10 = arith.constant 0 : index
    %c0_11 = arith.constant 0 : index
    %c0_12 = arith.constant 0 : index
    %6 = tpu.strided_load %arg19[%c0_10, %c0_11, %c0_12] {strides = array<i32: 1, 2, 1>} : memref<2x36x4xf32, #tpu.memory_space<vmem>>, vector<2x16x4xf32>
    %7 = vector.shape_cast %6 : vector<2x16x4xf32> to vector<32x4xf32>
    %8 = arith.truncf %7 : vector<32x4xf32> to vector<32x4xbf16>
    %c0_13 = arith.constant 0 : index
    %c0_14 = arith.constant 0 : index
    %c0_15 = arith.constant 0 : index
    %9 = vector.load %arg2[%c0_13, %c0_14, %c0_15] : memref<5x4x8xbf16, #tpu.memory_space<vmem>>, vector<1x4x8xbf16>
    %10 = vector.shape_cast %9 : vector<1x4x8xbf16> to vector<4x8xbf16>
    %cst_16 = arith.constant dense<0.000000e+00> : vector<32x8xf32>
    %11 = tpu.matmul %8, %10, %cst_16 {dimension_numbers = #tpu.dot_dimension_numbers<[1], [0], [0], [1], [0, 0, 1, 1], [], []>} : vector<32x4xbf16>, vector<4x8xbf16>, vector<32x8xf32> -> vector<32x8xf32>
    %12 = arith.addf %5, %11 : vector<32x8xf32>
    %c0_17 = arith.constant 0 : index
    %c1 = arith.constant 1 : index
    %c0_18 = arith.constant 0 : index
    %13 = tpu.strided_load %arg19[%c0_17, %c1, %c0_18] {strides = array<i32: 1, 2, 1>} : memref<2x36x4xf32, #tpu.memory_space<vmem>>, vector<2x16x4xf32>
    %14 = vector.shape_cast %13 : vector<2x16x4xf32> to vector<32x4xf32>
    %15 = arith.truncf %14 : vector<32x4xf32> to vector<32x4xbf16>
    %c1_19 = arith.constant 1 : index
    %c0_20 = arith.constant 0 : index
    %c0_21 = arith.constant 0 : index
    %16 = vector.load %arg2[%c1_19, %c0_20, %c0_21] : memref<5x4x8xbf16, #tpu.memory_space<vmem>>, vector<1x4x8xbf16>
    %17 = vector.shape_cast %16 : vector<1x4x8xbf16> to vector<4x8xbf16>
    %cst_22 = arith.constant dense<0.000000e+00> : vector<32x8xf32>
    %18 = tpu.matmul %15, %17, %cst_22 {dimension_numbers = #tpu.dot_dimension_numbers<[1], [0], [0], [1], [0, 0, 1, 1], [], []>} : vector<32x4xbf16>, vector<4x8xbf16>, vector<32x8xf32> -> vector<32x8xf32>
    %19 = arith.addf %12, %18 : vector<32x8xf32>
    %c0_23 = arith.constant 0 : index
    %c2_24 = arith.constant 2 : index
    %c0_25 = arith.constant 0 : index
    %20 = tpu.strided_load %arg19[%c0_23, %c2_24, %c0_25] {strides = array<i32: 1, 2, 1>} : memref<2x36x4xf32, #tpu.memory_space<vmem>>, vector<2x16x4xf32>
    %21 = vector.shape_cast %20 : vector<2x16x4xf32> to vector<32x4xf32>
    %22 = arith.truncf %21 : vector<32x4xf32> to vector<32x4xbf16>
    %c2_26 = arith.constant 2 : index
    %c0_27 = arith.constant 0 : index
    %c0_28 = arith.constant 0 : index
    %23 = vector.load %arg2[%c2_26, %c0_27, %c0_28] : memref<5x4x8xbf16, #tpu.memory_space<vmem>>, vector<1x4x8xbf16>
    %24 = vector.shape_cast %23 : vector<1x4x8xbf16> to vector<4x8xbf16>
    %cst_29 = arith.constant dense<0.000000e+00> : vector<32x8xf32>
    %25 = tpu.matmul %22, %24, %cst_29 {dimension_numbers = #tpu.dot_dimension_numbers<[1], [0], [0], [1], [0, 0, 1, 1], [], []>} : vector<32x4xbf16>, vector<4x8xbf16>, vector<32x8xf32> -> vector<32x8xf32>
    %26 = arith.addf %19, %25 : vector<32x8xf32>
    %c0_30 = arith.constant 0 : index
    %c3 = arith.constant 3 : index
    %c0_31 = arith.constant 0 : index
    %27 = tpu.strided_load %arg19[%c0_30, %c3, %c0_31] {strides = array<i32: 1, 2, 1>} : memref<2x36x4xf32, #tpu.memory_space<vmem>>, vector<2x16x4xf32>
    %28 = vector.shape_cast %27 : vector<2x16x4xf32> to vector<32x4xf32>
    %29 = arith.truncf %28 : vector<32x4xf32> to vector<32x4xbf16>
    %c3_32 = arith.constant 3 : index
    %c0_33 = arith.constant 0 : index
    %c0_34 = arith.constant 0 : index
    %30 = vector.load %arg2[%c3_32, %c0_33, %c0_34] : memref<5x4x8xbf16, #tpu.memory_space<vmem>>, vector<1x4x8xbf16>
    %31 = vector.shape_cast %30 : vector<1x4x8xbf16> to vector<4x8xbf16>
    %cst_35 = arith.constant dense<0.000000e+00> : vector<32x8xf32>
    %32 = tpu.matmul %29, %31, %cst_35 {dimension_numbers = #tpu.dot_dimension_numbers<[1], [0], [0], [1], [0, 0, 1, 1], [], []>} : vector<32x4xbf16>, vector<4x8xbf16>, vector<32x8xf32> -> vector<32x8xf32>
    %33 = arith.addf %26, %32 : vector<32x8xf32>
    %c0_36 = arith.constant 0 : index
    %c4 = arith.constant 4 : index
    %c0_37 = arith.constant 0 : index
    %34 = tpu.strided_load %arg19[%c0_36, %c4, %c0_37] {strides = array<i32: 1, 2, 1>} : memref<2x36x4xf32, #tpu.memory_space<vmem>>, vector<2x16x4xf32>
    %35 = vector.shape_cast %34 : vector<2x16x4xf32> to vector<32x4xf32>
    %36 = arith.truncf %35 : vector<32x4xf32> to vector<32x4xbf16>
    %c4_38 = arith.constant 4 : index
    %c0_39 = arith.constant 0 : index
    %c0_40 = arith.constant 0 : index
    %37 = vector.load %arg2[%c4_38, %c0_39, %c0_40] : memref<5x4x8xbf16, #tpu.memory_space<vmem>>, vector<1x4x8xbf16>
    %38 = vector.shape_cast %37 : vector<1x4x8xbf16> to vector<4x8xbf16>
    %cst_41 = arith.constant dense<0.000000e+00> : vector<32x8xf32>
    %39 = tpu.matmul %36, %38, %cst_41 {dimension_numbers = #tpu.dot_dimension_numbers<[1], [0], [0], [1], [0, 0, 1, 1], [], []>} : vector<32x4xbf16>, vector<4x8xbf16>, vector<32x8xf32> -> vector<32x8xf32>
    %40 = arith.addf %33, %39 : vector<32x8xf32>
    %41 = vector.shape_cast %40 : vector<32x8xf32> to vector<2x16x8xf32>
    %c0_42 = arith.constant 0 : index
    %c0_43 = arith.constant 0 : index
    %42 = vector.load %arg3[%c0_42, %c0_43] : memref<1x8xf32, #tpu.memory_space<vmem>>, vector<1x8xf32>
    %43 = vector.shape_cast %42 : vector<1x8xf32> to vector<1x1x8xf32>
    %44 = vector.broadcast %43 : vector<1x1x8xf32> to vector<2x16x8xf32>
    %45 = arith.addf %41, %44 : vector<2x16x8xf32>
    %c0_44 = arith.constant 0 : index
    %c0_45 = arith.constant 0 : index
    %46 = vector.load %arg4[%c0_44, %c0_45] : memref<16x8xf32, #tpu.memory_space<vmem>>, vector<16x8xf32>
    %c0_46 = arith.constant 0 : index
    %c0_47 = arith.constant 0 : index
    %47 = vector.load %arg5[%c0_46, %c0_47] : memref<16x8xf32, #tpu.memory_space<vmem>>, vector<16x8xf32>
    %cst_48 = arith.constant dense<0.000000e+00> : vector<2x16xf32>
    %48 = vector.multi_reduction <add>, %45, %cst_48 [2] : vector<2x16x8xf32> to vector<2x16xf32>
    %49 = vector.shape_cast %48 : vector<2x16xf32> to vector<2x16x1xf32>
    %cst_49 = arith.constant dense<0.000000e+00> : vector<2x1xf32>
    %50 = vector.multi_reduction <add>, %49, %cst_49 [1] : vector<2x16x1xf32> to vector<2x1xf32>
    %51 = vector.shape_cast %50 : vector<2x1xf32> to vector<2x1x1xf32>
    %52 = arith.mulf %45, %45 : vector<2x16x8xf32>
    %cst_50 = arith.constant dense<0.000000e+00> : vector<2x16xf32>
    %53 = vector.multi_reduction <add>, %52, %cst_50 [2] : vector<2x16x8xf32> to vector<2x16xf32>
    %54 = vector.shape_cast %53 : vector<2x16xf32> to vector<2x16x1xf32>
    %cst_51 = arith.constant dense<0.000000e+00> : vector<2x1xf32>
    %55 = vector.multi_reduction <add>, %54, %cst_51 [1] : vector<2x16x1xf32> to vector<2x1xf32>
    %56 = vector.shape_cast %55 : vector<2x1xf32> to vector<2x1x1xf32>
    %cst_52 = arith.constant 7.812500e-03 : f32
    %57 = vector.broadcast %cst_52 : f32 to vector<2x1x1xf32>
    %58 = arith.mulf %51, %57 : vector<2x1x1xf32>
    %cst_53 = arith.constant 7.812500e-03 : f32
    %59 = vector.broadcast %cst_53 : f32 to vector<2x1x1xf32>
    %60 = arith.mulf %56, %59 : vector<2x1x1xf32>
    %61 = arith.mulf %58, %58 : vector<2x1x1xf32>
    %62 = arith.subf %60, %61 : vector<2x1x1xf32>
    %63 = vector.broadcast %58 : vector<2x1x1xf32> to vector<2x16x8xf32>
    %64 = arith.subf %45, %63 : vector<2x16x8xf32>
    %cst_54 = arith.constant 9.99999974E-6 : f32
    %65 = vector.broadcast %cst_54 : f32 to vector<2x1x1xf32>
    %66 = arith.addf %62, %65 : vector<2x1x1xf32>
    %67 = math.rsqrt %66 : vector<2x1x1xf32>
    %68 = vector.broadcast %67 : vector<2x1x1xf32> to vector<2x16x8xf32>
    %69 = arith.mulf %64, %68 : vector<2x16x8xf32>
    %70 = vector.shape_cast %46 : vector<16x8xf32> to vector<1x16x8xf32>
    %71 = vector.broadcast %70 : vector<1x16x8xf32> to vector<2x16x8xf32>
    %72 = arith.mulf %69, %71 : vector<2x16x8xf32>
    %73 = vector.shape_cast %47 : vector<16x8xf32> to vector<1x16x8xf32>
    %74 = vector.broadcast %73 : vector<1x16x8xf32> to vector<2x16x8xf32>
    %75 = arith.addf %72, %74 : vector<2x16x8xf32>
    %cst_55 = arith.constant 0.000000e+00 : f32
    %76 = vector.broadcast %cst_55 : f32 to vector<2x16x8xf32>
    %77 = arith.cmpf oge, %75, %76 : vector<2x16x8xf32>
    %cst_56 = arith.constant 2.000000e-01 : f32
    %78 = vector.broadcast %cst_56 : f32 to vector<2x16x8xf32>
    %79 = arith.mulf %78, %75 : vector<2x16x8xf32>
    %80 = arith.select %77, %75, %79 : vector<2x16x8xi1>, vector<2x16x8xf32>
    %cst_57 = arith.constant 0.000000e+00 : f32
    %81 = vector.broadcast %cst_57 : f32 to vector<2x2x8xf32>
    %c0_58 = arith.constant 0 : index
    %c0_59 = arith.constant 0 : index
    %c0_60 = arith.constant 0 : index
    %82 = vector.load %arg20[%c0_58, %c0_59, %c0_60] : memref<2x20x8xf32, #tpu.memory_space<vmem>>, vector<2x2x8xf32>
    tpu.vector_store %arg20[%c0_58, %c0_59, %c0_60], %81 {strides = array<i32>} : memref<2x20x8xf32, #tpu.memory_space<vmem>>, vector<2x2x8xf32>,
    %c0_61 = arith.constant 0 : index
    %c18 = arith.constant 18 : index
    %c0_62 = arith.constant 0 : index
    %83 = vector.load %arg20[%c0_61, %c18, %c0_62] : memref<2x20x8xf32, #tpu.memory_space<vmem>>, vector<2x2x8xf32>
    tpu.vector_store %arg20[%c0_61, %c18, %c0_62], %81 {strides = array<i32>} : memref<2x20x8xf32, #tpu.memory_space<vmem>>, vector<2x2x8xf32>,
    %c0_63 = arith.constant 0 : index
    %c2_64 = arith.constant 2 : index
    %c0_65 = arith.constant 0 : index
    %84 = vector.load %arg20[%c0_63, %c2_64, %c0_65] : memref<2x20x8xf32, #tpu.memory_space<vmem>>, vector<2x16x8xf32>
    tpu.vector_store %arg20[%c0_63, %c2_64, %c0_65], %80 {strides = array<i32>} : memref<2x20x8xf32, #tpu.memory_space<vmem>>, vector<2x16x8xf32>,
    %cst_66 = arith.constant 0.000000e+00 : f32
    %85 = vector.broadcast %cst_66 : f32 to vector<16x8xf32>
    %c0_67 = arith.constant 0 : index
    %c0_68 = arith.constant 0 : index
    %c0_69 = arith.constant 0 : index
    %86 = tpu.strided_load %arg20[%c0_67, %c0_68, %c0_69] {strides = array<i32: 1, 2, 1>} : memref<2x20x8xf32, #tpu.memory_space<vmem>>, vector<2x8x8xf32>
    %87 = vector.shape_cast %86 : vector<2x8x8xf32> to vector<16x8xf32>
    %88 = arith.truncf %87 : vector<16x8xf32> to vector<16x8xbf16>
    %c0_70 = arith.constant 0 : index
    %c0_71 = arith.constant 0 : index
    %c0_72 = arith.constant 0 : index
    %89 = vector.load %arg6[%c0_70, %c0_71, %c0_72] : memref<5x8x8xbf16, #tpu.memory_space<vmem>>, vector<1x8x8xbf16>
    %90 = vector.shape_cast %89 : vector<1x8x8xbf16> to vector<8x8xbf16>
    %cst_73 = arith.constant dense<0.000000e+00> : vector<16x8xf32>
    %91 = tpu.matmul %88, %90, %cst_73 {dimension_numbers = #tpu.dot_dimension_numbers<[1], [0], [0], [1], [0, 0, 1, 1], [], []>} : vector<16x8xbf16>, vector<8x8xbf16>, vector<16x8xf32> -> vector<16x8xf32>
    %92 = arith.addf %85, %91 : vector<16x8xf32>
    %c0_74 = arith.constant 0 : index
    %c1_75 = arith.constant 1 : index
    %c0_76 = arith.constant 0 : index
    %93 = tpu.strided_load %arg20[%c0_74, %c1_75, %c0_76] {strides = array<i32: 1, 2, 1>} : memref<2x20x8xf32, #tpu.memory_space<vmem>>, vector<2x8x8xf32>
    %94 = vector.shape_cast %93 : vector<2x8x8xf32> to vector<16x8xf32>
    %95 = arith.truncf %94 : vector<16x8xf32> to vector<16x8xbf16>
    %c1_77 = arith.constant 1 : index
    %c0_78 = arith.constant 0 : index
    %c0_79 = arith.constant 0 : index
    %96 = vector.load %arg6[%c1_77, %c0_78, %c0_79] : memref<5x8x8xbf16, #tpu.memory_space<vmem>>, vector<1x8x8xbf16>
    %97 = vector.shape_cast %96 : vector<1x8x8xbf16> to vector<8x8xbf16>
    %cst_80 = arith.constant dense<0.000000e+00> : vector<16x8xf32>
    %98 = tpu.matmul %95, %97, %cst_80 {dimension_numbers = #tpu.dot_dimension_numbers<[1], [0], [0], [1], [0, 0, 1, 1], [], []>} : vector<16x8xbf16>, vector<8x8xbf16>, vector<16x8xf32> -> vector<16x8xf32>
    %99 = arith.addf %92, %98 : vector<16x8xf32>
    %c0_81 = arith.constant 0 : index
    %c2_82 = arith.constant 2 : index
    %c0_83 = arith.constant 0 : index
    %100 = tpu.strided_load %arg20[%c0_81, %c2_82, %c0_83] {strides = array<i32: 1, 2, 1>} : memref<2x20x8xf32, #tpu.memory_space<vmem>>, vector<2x8x8xf32>
    %101 = vector.shape_cast %100 : vector<2x8x8xf32> to vector<16x8xf32>
    %102 = arith.truncf %101 : vector<16x8xf32> to vector<16x8xbf16>
    %c2_84 = arith.constant 2 : index
    %c0_85 = arith.constant 0 : index
    %c0_86 = arith.constant 0 : index
    %103 = vector.load %arg6[%c2_84, %c0_85, %c0_86] : memref<5x8x8xbf16, #tpu.memory_space<vmem>>, vector<1x8x8xbf16>
    %104 = vector.shape_cast %103 : vector<1x8x8xbf16> to vector<8x8xbf16>
    %cst_87 = arith.constant dense<0.000000e+00> : vector<16x8xf32>
    %105 = tpu.matmul %102, %104, %cst_87 {dimension_numbers = #tpu.dot_dimension_numbers<[1], [0], [0], [1], [0, 0, 1, 1], [], []>} : vector<16x8xbf16>, vector<8x8xbf16>, vector<16x8xf32> -> vector<16x8xf32>
    %106 = arith.addf %99, %105 : vector<16x8xf32>
    %c0_88 = arith.constant 0 : index
    %c3_89 = arith.constant 3 : index
    %c0_90 = arith.constant 0 : index
    %107 = tpu.strided_load %arg20[%c0_88, %c3_89, %c0_90] {strides = array<i32: 1, 2, 1>} : memref<2x20x8xf32, #tpu.memory_space<vmem>>, vector<2x8x8xf32>
    %108 = vector.shape_cast %107 : vector<2x8x8xf32> to vector<16x8xf32>
    %109 = arith.truncf %108 : vector<16x8xf32> to vector<16x8xbf16>
    %c3_91 = arith.constant 3 : index
    %c0_92 = arith.constant 0 : index
    %c0_93 = arith.constant 0 : index
    %110 = vector.load %arg6[%c3_91, %c0_92, %c0_93] : memref<5x8x8xbf16, #tpu.memory_space<vmem>>, vector<1x8x8xbf16>
    %111 = vector.shape_cast %110 : vector<1x8x8xbf16> to vector<8x8xbf16>
    %cst_94 = arith.constant dense<0.000000e+00> : vector<16x8xf32>
    %112 = tpu.matmul %109, %111, %cst_94 {dimension_numbers = #tpu.dot_dimension_numbers<[1], [0], [0], [1], [0, 0, 1, 1], [], []>} : vector<16x8xbf16>, vector<8x8xbf16>, vector<16x8xf32> -> vector<16x8xf32>
    %113 = arith.addf %106, %112 : vector<16x8xf32>
    %c0_95 = arith.constant 0 : index
    %c4_96 = arith.constant 4 : index
    %c0_97 = arith.constant 0 : index
    %114 = tpu.strided_load %arg20[%c0_95, %c4_96, %c0_97] {strides = array<i32: 1, 2, 1>} : memref<2x20x8xf32, #tpu.memory_space<vmem>>, vector<2x8x8xf32>
    %115 = vector.shape_cast %114 : vector<2x8x8xf32> to vector<16x8xf32>
    %116 = arith.truncf %115 : vector<16x8xf32> to vector<16x8xbf16>
    %c4_98 = arith.constant 4 : index
    %c0_99 = arith.constant 0 : index
    %c0_100 = arith.constant 0 : index
    %117 = vector.load %arg6[%c4_98, %c0_99, %c0_100] : memref<5x8x8xbf16, #tpu.memory_space<vmem>>, vector<1x8x8xbf16>
    %118 = vector.shape_cast %117 : vector<1x8x8xbf16> to vector<8x8xbf16>
    %cst_101 = arith.constant dense<0.000000e+00> : vector<16x8xf32>
    %119 = tpu.matmul %116, %118, %cst_101 {dimension_numbers = #tpu.dot_dimension_numbers<[1], [0], [0], [1], [0, 0, 1, 1], [], []>} : vector<16x8xbf16>, vector<8x8xbf16>, vector<16x8xf32> -> vector<16x8xf32>
    %120 = arith.addf %113, %119 : vector<16x8xf32>
    %121 = vector.shape_cast %120 : vector<16x8xf32> to vector<2x8x8xf32>
    %c0_102 = arith.constant 0 : index
    %c0_103 = arith.constant 0 : index
    %122 = vector.load %arg7[%c0_102, %c0_103] : memref<1x8xf32, #tpu.memory_space<vmem>>, vector<1x8xf32>
    %123 = vector.shape_cast %122 : vector<1x8xf32> to vector<1x1x8xf32>
    %124 = vector.broadcast %123 : vector<1x1x8xf32> to vector<2x8x8xf32>
    %125 = arith.addf %121, %124 : vector<2x8x8xf32>
    %c0_104 = arith.constant 0 : index
    %c0_105 = arith.constant 0 : index
    %126 = vector.load %arg8[%c0_104, %c0_105] : memref<8x8xf32, #tpu.memory_space<vmem>>, vector<8x8xf32>
    %c0_106 = arith.constant 0 : index
    %c0_107 = arith.constant 0 : index
    %127 = vector.load %arg9[%c0_106, %c0_107] : memref<8x8xf32, #tpu.memory_space<vmem>>, vector<8x8xf32>
    %cst_108 = arith.constant dense<0.000000e+00> : vector<2x8xf32>
    %128 = vector.multi_reduction <add>, %125, %cst_108 [2] : vector<2x8x8xf32> to vector<2x8xf32>
    %129 = vector.shape_cast %128 : vector<2x8xf32> to vector<2x8x1xf32>
    %cst_109 = arith.constant dense<0.000000e+00> : vector<2x1xf32>
    %130 = vector.multi_reduction <add>, %129, %cst_109 [1] : vector<2x8x1xf32> to vector<2x1xf32>
    %131 = vector.shape_cast %130 : vector<2x1xf32> to vector<2x1x1xf32>
    %132 = arith.mulf %125, %125 : vector<2x8x8xf32>
    %cst_110 = arith.constant dense<0.000000e+00> : vector<2x8xf32>
    %133 = vector.multi_reduction <add>, %132, %cst_110 [2] : vector<2x8x8xf32> to vector<2x8xf32>
    %134 = vector.shape_cast %133 : vector<2x8xf32> to vector<2x8x1xf32>
    %cst_111 = arith.constant dense<0.000000e+00> : vector<2x1xf32>
    %135 = vector.multi_reduction <add>, %134, %cst_111 [1] : vector<2x8x1xf32> to vector<2x1xf32>
    %136 = vector.shape_cast %135 : vector<2x1xf32> to vector<2x1x1xf32>
    %cst_112 = arith.constant 1.562500e-02 : f32
    %137 = vector.broadcast %cst_112 : f32 to vector<2x1x1xf32>
    %138 = arith.mulf %131, %137 : vector<2x1x1xf32>
    %cst_113 = arith.constant 1.562500e-02 : f32
    %139 = vector.broadcast %cst_113 : f32 to vector<2x1x1xf32>
    %140 = arith.mulf %136, %139 : vector<2x1x1xf32>
    %141 = arith.mulf %138, %138 : vector<2x1x1xf32>
    %142 = arith.subf %140, %141 : vector<2x1x1xf32>
    %143 = vector.broadcast %138 : vector<2x1x1xf32> to vector<2x8x8xf32>
    %144 = arith.subf %125, %143 : vector<2x8x8xf32>
    %cst_114 = arith.constant 9.99999974E-6 : f32
    %145 = vector.broadcast %cst_114 : f32 to vector<2x1x1xf32>
    %146 = arith.addf %142, %145 : vector<2x1x1xf32>
    %147 = math.rsqrt %146 : vector<2x1x1xf32>
    %148 = vector.broadcast %147 : vector<2x1x1xf32> to vector<2x8x8xf32>
    %149 = arith.mulf %144, %148 : vector<2x8x8xf32>
    %150 = vector.shape_cast %126 : vector<8x8xf32> to vector<1x8x8xf32>
    %151 = vector.broadcast %150 : vector<1x8x8xf32> to vector<2x8x8xf32>
    %152 = arith.mulf %149, %151 : vector<2x8x8xf32>
    %153 = vector.shape_cast %127 : vector<8x8xf32> to vector<1x8x8xf32>
    %154 = vector.broadcast %153 : vector<1x8x8xf32> to vector<2x8x8xf32>
    %155 = arith.addf %152, %154 : vector<2x8x8xf32>
    %cst_115 = arith.constant 0.000000e+00 : f32
    %156 = vector.broadcast %cst_115 : f32 to vector<2x8x8xf32>
    %157 = arith.cmpf oge, %155, %156 : vector<2x8x8xf32>
    %cst_116 = arith.constant 2.000000e-01 : f32
    %158 = vector.broadcast %cst_116 : f32 to vector<2x8x8xf32>
    %159 = arith.mulf %158, %155 : vector<2x8x8xf32>
    %160 = arith.select %157, %155, %159 : vector<2x8x8xi1>, vector<2x8x8xf32>
    %cst_117 = arith.constant 0.000000e+00 : f32
    %161 = vector.broadcast %cst_117 : f32 to vector<2x2x8xf32>
    %c0_118 = arith.constant 0 : index
    %c0_119 = arith.constant 0 : index
    %c0_120 = arith.constant 0 : index
    %162 = vector.load %arg21[%c0_118, %c0_119, %c0_120] : memref<2x12x8xf32, #tpu.memory_space<vmem>>, vector<2x2x8xf32>
    tpu.vector_store %arg21[%c0_118, %c0_119, %c0_120], %161 {strides = array<i32>} : memref<2x12x8xf32, #tpu.memory_space<vmem>>, vector<2x2x8xf32>,
    %c0_121 = arith.constant 0 : index
    %c10 = arith.constant 10 : index
    %c0_122 = arith.constant 0 : index
    %163 = vector.load %arg21[%c0_121, %c10, %c0_122] : memref<2x12x8xf32, #tpu.memory_space<vmem>>, vector<2x2x8xf32>
    tpu.vector_store %arg21[%c0_121, %c10, %c0_122], %161 {strides = array<i32>} : memref<2x12x8xf32, #tpu.memory_space<vmem>>, vector<2x2x8xf32>,
    %c0_123 = arith.constant 0 : index
    %c2_124 = arith.constant 2 : index
    %c0_125 = arith.constant 0 : index
    %164 = vector.load %arg21[%c0_123, %c2_124, %c0_125] : memref<2x12x8xf32, #tpu.memory_space<vmem>>, vector<2x8x8xf32>
    tpu.vector_store %arg21[%c0_123, %c2_124, %c0_125], %160 {strides = array<i32>} : memref<2x12x8xf32, #tpu.memory_space<vmem>>, vector<2x8x8xf32>,
    %cst_126 = arith.constant 0.000000e+00 : f32
    %165 = vector.broadcast %cst_126 : f32 to vector<8x8xf32>
    %c0_127 = arith.constant 0 : index
    %c0_128 = arith.constant 0 : index
    %c0_129 = arith.constant 0 : index
    %166 = tpu.strided_load %arg21[%c0_127, %c0_128, %c0_129] {strides = array<i32: 1, 2, 1>} : memref<2x12x8xf32, #tpu.memory_space<vmem>>, vector<2x4x8xf32>
    %167 = vector.shape_cast %166 : vector<2x4x8xf32> to vector<8x8xf32>
    %168 = arith.truncf %167 : vector<8x8xf32> to vector<8x8xbf16>
    %c0_130 = arith.constant 0 : index
    %c0_131 = arith.constant 0 : index
    %c0_132 = arith.constant 0 : index
    %169 = vector.load %arg10[%c0_130, %c0_131, %c0_132] : memref<5x8x8xbf16, #tpu.memory_space<vmem>>, vector<1x8x8xbf16>
    %170 = vector.shape_cast %169 : vector<1x8x8xbf16> to vector<8x8xbf16>
    %cst_133 = arith.constant dense<0.000000e+00> : vector<8x8xf32>
    %171 = tpu.matmul %168, %170, %cst_133 {dimension_numbers = #tpu.dot_dimension_numbers<[1], [0], [0], [1], [0, 0, 1, 1], [], []>} : vector<8x8xbf16>, vector<8x8xbf16>, vector<8x8xf32> -> vector<8x8xf32>
    %172 = arith.addf %165, %171 : vector<8x8xf32>
    %c0_134 = arith.constant 0 : index
    %c1_135 = arith.constant 1 : index
    %c0_136 = arith.constant 0 : index
    %173 = tpu.strided_load %arg21[%c0_134, %c1_135, %c0_136] {strides = array<i32: 1, 2, 1>} : memref<2x12x8xf32, #tpu.memory_space<vmem>>, vector<2x4x8xf32>
    %174 = vector.shape_cast %173 : vector<2x4x8xf32> to vector<8x8xf32>
    %175 = arith.truncf %174 : vector<8x8xf32> to vector<8x8xbf16>
    %c1_137 = arith.constant 1 : index
    %c0_138 = arith.constant 0 : index
    %c0_139 = arith.constant 0 : index
    %176 = vector.load %arg10[%c1_137, %c0_138, %c0_139] : memref<5x8x8xbf16, #tpu.memory_space<vmem>>, vector<1x8x8xbf16>
    %177 = vector.shape_cast %176 : vector<1x8x8xbf16> to vector<8x8xbf16>
    %cst_140 = arith.constant dense<0.000000e+00> : vector<8x8xf32>
    %178 = tpu.matmul %175, %177, %cst_140 {dimension_numbers = #tpu.dot_dimension_numbers<[1], [0], [0], [1], [0, 0, 1, 1], [], []>} : vector<8x8xbf16>, vector<8x8xbf16>, vector<8x8xf32> -> vector<8x8xf32>
    %179 = arith.addf %172, %178 : vector<8x8xf32>
    %c0_141 = arith.constant 0 : index
    %c2_142 = arith.constant 2 : index
    %c0_143 = arith.constant 0 : index
    %180 = tpu.strided_load %arg21[%c0_141, %c2_142, %c0_143] {strides = array<i32: 1, 2, 1>} : memref<2x12x8xf32, #tpu.memory_space<vmem>>, vector<2x4x8xf32>
    %181 = vector.shape_cast %180 : vector<2x4x8xf32> to vector<8x8xf32>
    %182 = arith.truncf %181 : vector<8x8xf32> to vector<8x8xbf16>
    %c2_144 = arith.constant 2 : index
    %c0_145 = arith.constant 0 : index
    %c0_146 = arith.constant 0 : index
    %183 = vector.load %arg10[%c2_144, %c0_145, %c0_146] : memref<5x8x8xbf16, #tpu.memory_space<vmem>>, vector<1x8x8xbf16>
    %184 = vector.shape_cast %183 : vector<1x8x8xbf16> to vector<8x8xbf16>
    %cst_147 = arith.constant dense<0.000000e+00> : vector<8x8xf32>
    %185 = tpu.matmul %182, %184, %cst_147 {dimension_numbers = #tpu.dot_dimension_numbers<[1], [0], [0], [1], [0, 0, 1, 1], [], []>} : vector<8x8xbf16>, vector<8x8xbf16>, vector<8x8xf32> -> vector<8x8xf32>
    %186 = arith.addf %179, %185 : vector<8x8xf32>
    %c0_148 = arith.constant 0 : index
    %c3_149 = arith.constant 3 : index
    %c0_150 = arith.constant 0 : index
    %187 = tpu.strided_load %arg21[%c0_148, %c3_149, %c0_150] {strides = array<i32: 1, 2, 1>} : memref<2x12x8xf32, #tpu.memory_space<vmem>>, vector<2x4x8xf32>
    %188 = vector.shape_cast %187 : vector<2x4x8xf32> to vector<8x8xf32>
    %189 = arith.truncf %188 : vector<8x8xf32> to vector<8x8xbf16>
    %c3_151 = arith.constant 3 : index
    %c0_152 = arith.constant 0 : index
    %c0_153 = arith.constant 0 : index
    %190 = vector.load %arg10[%c3_151, %c0_152, %c0_153] : memref<5x8x8xbf16, #tpu.memory_space<vmem>>, vector<1x8x8xbf16>
    %191 = vector.shape_cast %190 : vector<1x8x8xbf16> to vector<8x8xbf16>
    %cst_154 = arith.constant dense<0.000000e+00> : vector<8x8xf32>
    %192 = tpu.matmul %189, %191, %cst_154 {dimension_numbers = #tpu.dot_dimension_numbers<[1], [0], [0], [1], [0, 0, 1, 1], [], []>} : vector<8x8xbf16>, vector<8x8xbf16>, vector<8x8xf32> -> vector<8x8xf32>
    %193 = arith.addf %186, %192 : vector<8x8xf32>
    %c0_155 = arith.constant 0 : index
    %c4_156 = arith.constant 4 : index
    %c0_157 = arith.constant 0 : index
    %194 = tpu.strided_load %arg21[%c0_155, %c4_156, %c0_157] {strides = array<i32: 1, 2, 1>} : memref<2x12x8xf32, #tpu.memory_space<vmem>>, vector<2x4x8xf32>
    %195 = vector.shape_cast %194 : vector<2x4x8xf32> to vector<8x8xf32>
    %196 = arith.truncf %195 : vector<8x8xf32> to vector<8x8xbf16>
    %c4_158 = arith.constant 4 : index
    %c0_159 = arith.constant 0 : index
    %c0_160 = arith.constant 0 : index
    %197 = vector.load %arg10[%c4_158, %c0_159, %c0_160] : memref<5x8x8xbf16, #tpu.memory_space<vmem>>, vector<1x8x8xbf16>
    %198 = vector.shape_cast %197 : vector<1x8x8xbf16> to vector<8x8xbf16>
    %cst_161 = arith.constant dense<0.000000e+00> : vector<8x8xf32>
    %199 = tpu.matmul %196, %198, %cst_161 {dimension_numbers = #tpu.dot_dimension_numbers<[1], [0], [0], [1], [0, 0, 1, 1], [], []>} : vector<8x8xbf16>, vector<8x8xbf16>, vector<8x8xf32> -> vector<8x8xf32>
    %200 = arith.addf %193, %199 : vector<8x8xf32>
    %201 = vector.shape_cast %200 : vector<8x8xf32> to vector<2x4x8xf32>
    %c0_162 = arith.constant 0 : index
    %c0_163 = arith.constant 0 : index
    %202 = vector.load %arg11[%c0_162, %c0_163] : memref<1x8xf32, #tpu.memory_space<vmem>>, vector<1x8xf32>
    %203 = vector.shape_cast %202 : vector<1x8xf32> to vector<1x1x8xf32>
    %204 = vector.broadcast %203 : vector<1x1x8xf32> to vector<2x4x8xf32>
    %205 = arith.addf %201, %204 : vector<2x4x8xf32>
    %c0_164 = arith.constant 0 : index
    %c0_165 = arith.constant 0 : index
    %206 = vector.load %arg12[%c0_164, %c0_165] : memref<4x8xf32, #tpu.memory_space<vmem>>, vector<4x8xf32>
    %c0_166 = arith.constant 0 : index
    %c0_167 = arith.constant 0 : index
    %207 = vector.load %arg13[%c0_166, %c0_167] : memref<4x8xf32, #tpu.memory_space<vmem>>, vector<4x8xf32>
    %cst_168 = arith.constant dense<0.000000e+00> : vector<2x4xf32>
    %208 = vector.multi_reduction <add>, %205, %cst_168 [2] : vector<2x4x8xf32> to vector<2x4xf32>
    %209 = vector.shape_cast %208 : vector<2x4xf32> to vector<2x4x1xf32>
    %cst_169 = arith.constant dense<0.000000e+00> : vector<2x1xf32>
    %210 = vector.multi_reduction <add>, %209, %cst_169 [1] : vector<2x4x1xf32> to vector<2x1xf32>
    %211 = vector.shape_cast %210 : vector<2x1xf32> to vector<2x1x1xf32>
    %212 = arith.mulf %205, %205 : vector<2x4x8xf32>
    %cst_170 = arith.constant dense<0.000000e+00> : vector<2x4xf32>
    %213 = vector.multi_reduction <add>, %212, %cst_170 [2] : vector<2x4x8xf32> to vector<2x4xf32>
    %214 = vector.shape_cast %213 : vector<2x4xf32> to vector<2x4x1xf32>
    %cst_171 = arith.constant dense<0.000000e+00> : vector<2x1xf32>
    %215 = vector.multi_reduction <add>, %214, %cst_171 [1] : vector<2x4x1xf32> to vector<2x1xf32>
    %216 = vector.shape_cast %215 : vector<2x1xf32> to vector<2x1x1xf32>
    %cst_172 = arith.constant 3.125000e-02 : f32
    %217 = vector.broadcast %cst_172 : f32 to vector<2x1x1xf32>
    %218 = arith.mulf %211, %217 : vector<2x1x1xf32>
    %cst_173 = arith.constant 3.125000e-02 : f32
    %219 = vector.broadcast %cst_173 : f32 to vector<2x1x1xf32>
    %220 = arith.mulf %216, %219 : vector<2x1x1xf32>
    %221 = arith.mulf %218, %218 : vector<2x1x1xf32>
    %222 = arith.subf %220, %221 : vector<2x1x1xf32>
    %223 = vector.broadcast %218 : vector<2x1x1xf32> to vector<2x4x8xf32>
    %224 = arith.subf %205, %223 : vector<2x4x8xf32>
    %cst_174 = arith.constant 9.99999974E-6 : f32
    %225 = vector.broadcast %cst_174 : f32 to vector<2x1x1xf32>
    %226 = arith.addf %222, %225 : vector<2x1x1xf32>
    %227 = math.rsqrt %226 : vector<2x1x1xf32>
    %228 = vector.broadcast %227 : vector<2x1x1xf32> to vector<2x4x8xf32>
    %229 = arith.mulf %224, %228 : vector<2x4x8xf32>
    %230 = vector.shape_cast %206 : vector<4x8xf32> to vector<1x4x8xf32>
    %231 = vector.broadcast %230 : vector<1x4x8xf32> to vector<2x4x8xf32>
    %232 = arith.mulf %229, %231 : vector<2x4x8xf32>
    %233 = vector.shape_cast %207 : vector<4x8xf32> to vector<1x4x8xf32>
    %234 = vector.broadcast %233 : vector<1x4x8xf32> to vector<2x4x8xf32>
    %235 = arith.addf %232, %234 : vector<2x4x8xf32>
    %cst_175 = arith.constant 0.000000e+00 : f32
    %236 = vector.broadcast %cst_175 : f32 to vector<2x4x8xf32>
    %237 = arith.cmpf oge, %235, %236 : vector<2x4x8xf32>
    %cst_176 = arith.constant 2.000000e-01 : f32
    %238 = vector.broadcast %cst_176 : f32 to vector<2x4x8xf32>
    %239 = arith.mulf %238, %235 : vector<2x4x8xf32>
    %240 = arith.select %237, %235, %239 : vector<2x4x8xi1>, vector<2x4x8xf32>
    %cst_177 = arith.constant 0.000000e+00 : f32
    %241 = vector.broadcast %cst_177 : f32 to vector<2x2x8xf32>
    %c0_178 = arith.constant 0 : index
    %c0_179 = arith.constant 0 : index
    %c0_180 = arith.constant 0 : index
    %242 = vector.load %arg22[%c0_178, %c0_179, %c0_180] : memref<2x8x8xf32, #tpu.memory_space<vmem>>, vector<2x2x8xf32>
    tpu.vector_store %arg22[%c0_178, %c0_179, %c0_180], %241 {strides = array<i32>} : memref<2x8x8xf32, #tpu.memory_space<vmem>>, vector<2x2x8xf32>,
    %c0_181 = arith.constant 0 : index
    %c6 = arith.constant 6 : index
    %c0_182 = arith.constant 0 : index
    %243 = vector.load %arg22[%c0_181, %c6, %c0_182] : memref<2x8x8xf32, #tpu.memory_space<vmem>>, vector<2x2x8xf32>
    tpu.vector_store %arg22[%c0_181, %c6, %c0_182], %241 {strides = array<i32>} : memref<2x8x8xf32, #tpu.memory_space<vmem>>, vector<2x2x8xf32>,
    %c0_183 = arith.constant 0 : index
    %c2_184 = arith.constant 2 : index
    %c0_185 = arith.constant 0 : index
    %244 = vector.load %arg22[%c0_183, %c2_184, %c0_185] : memref<2x8x8xf32, #tpu.memory_space<vmem>>, vector<2x4x8xf32>
    tpu.vector_store %arg22[%c0_183, %c2_184, %c0_185], %240 {strides = array<i32>} : memref<2x8x8xf32, #tpu.memory_space<vmem>>, vector<2x4x8xf32>,
    %cst_186 = arith.constant 0.000000e+00 : f32
    %245 = vector.broadcast %cst_186 : f32 to vector<4x8xf32>
    %c0_187 = arith.constant 0 : index
    %c0_188 = arith.constant 0 : index
    %c0_189 = arith.constant 0 : index
    %246 = tpu.strided_load %arg22[%c0_187, %c0_188, %c0_189] {strides = array<i32: 1, 2, 1>} : memref<2x8x8xf32, #tpu.memory_space<vmem>>, vector<2x2x8xf32>
    %247 = vector.shape_cast %246 : vector<2x2x8xf32> to vector<4x8xf32>
    %248 = arith.truncf %247 : vector<4x8xf32> to vector<4x8xbf16>
    %c0_190 = arith.constant 0 : index
    %c0_191 = arith.constant 0 : index
    %c0_192 = arith.constant 0 : index
    %249 = vector.load %arg14[%c0_190, %c0_191, %c0_192] : memref<5x8x8xbf16, #tpu.memory_space<vmem>>, vector<1x8x8xbf16>
    %250 = vector.shape_cast %249 : vector<1x8x8xbf16> to vector<8x8xbf16>
    %cst_193 = arith.constant dense<0.000000e+00> : vector<4x8xf32>
    %251 = tpu.matmul %248, %250, %cst_193 {dimension_numbers = #tpu.dot_dimension_numbers<[1], [0], [0], [1], [0, 0, 1, 1], [], []>} : vector<4x8xbf16>, vector<8x8xbf16>, vector<4x8xf32> -> vector<4x8xf32>
    %252 = arith.addf %245, %251 : vector<4x8xf32>
    %c0_194 = arith.constant 0 : index
    %c1_195 = arith.constant 1 : index
    %c0_196 = arith.constant 0 : index
    %253 = tpu.strided_load %arg22[%c0_194, %c1_195, %c0_196] {strides = array<i32: 1, 2, 1>} : memref<2x8x8xf32, #tpu.memory_space<vmem>>, vector<2x2x8xf32>
    %254 = vector.shape_cast %253 : vector<2x2x8xf32> to vector<4x8xf32>
    %255 = arith.truncf %254 : vector<4x8xf32> to vector<4x8xbf16>
    %c1_197 = arith.constant 1 : index
    %c0_198 = arith.constant 0 : index
    %c0_199 = arith.constant 0 : index
    %256 = vector.load %arg14[%c1_197, %c0_198, %c0_199] : memref<5x8x8xbf16, #tpu.memory_space<vmem>>, vector<1x8x8xbf16>
    %257 = vector.shape_cast %256 : vector<1x8x8xbf16> to vector<8x8xbf16>
    %cst_200 = arith.constant dense<0.000000e+00> : vector<4x8xf32>
    %258 = tpu.matmul %255, %257, %cst_200 {dimension_numbers = #tpu.dot_dimension_numbers<[1], [0], [0], [1], [0, 0, 1, 1], [], []>} : vector<4x8xbf16>, vector<8x8xbf16>, vector<4x8xf32> -> vector<4x8xf32>
    %259 = arith.addf %252, %258 : vector<4x8xf32>
    %c0_201 = arith.constant 0 : index
    %c2_202 = arith.constant 2 : index
    %c0_203 = arith.constant 0 : index
    %260 = tpu.strided_load %arg22[%c0_201, %c2_202, %c0_203] {strides = array<i32: 1, 2, 1>} : memref<2x8x8xf32, #tpu.memory_space<vmem>>, vector<2x2x8xf32>
    %261 = vector.shape_cast %260 : vector<2x2x8xf32> to vector<4x8xf32>
    %262 = arith.truncf %261 : vector<4x8xf32> to vector<4x8xbf16>
    %c2_204 = arith.constant 2 : index
    %c0_205 = arith.constant 0 : index
    %c0_206 = arith.constant 0 : index
    %263 = vector.load %arg14[%c2_204, %c0_205, %c0_206] : memref<5x8x8xbf16, #tpu.memory_space<vmem>>, vector<1x8x8xbf16>
    %264 = vector.shape_cast %263 : vector<1x8x8xbf16> to vector<8x8xbf16>
    %cst_207 = arith.constant dense<0.000000e+00> : vector<4x8xf32>
    %265 = tpu.matmul %262, %264, %cst_207 {dimension_numbers = #tpu.dot_dimension_numbers<[1], [0], [0], [1], [0, 0, 1, 1], [], []>} : vector<4x8xbf16>, vector<8x8xbf16>, vector<4x8xf32> -> vector<4x8xf32>
    %266 = arith.addf %259, %265 : vector<4x8xf32>
    %c0_208 = arith.constant 0 : index
    %c3_209 = arith.constant 3 : index
    %c0_210 = arith.constant 0 : index
    %267 = tpu.strided_load %arg22[%c0_208, %c3_209, %c0_210] {strides = array<i32: 1, 2, 1>} : memref<2x8x8xf32, #tpu.memory_space<vmem>>, vector<2x2x8xf32>
    %268 = vector.shape_cast %267 : vector<2x2x8xf32> to vector<4x8xf32>
    %269 = arith.truncf %268 : vector<4x8xf32> to vector<4x8xbf16>
    %c3_211 = arith.constant 3 : index
    %c0_212 = arith.constant 0 : index
    %c0_213 = arith.constant 0 : index
    %270 = vector.load %arg14[%c3_211, %c0_212, %c0_213] : memref<5x8x8xbf16, #tpu.memory_space<vmem>>, vector<1x8x8xbf16>
    %271 = vector.shape_cast %270 : vector<1x8x8xbf16> to vector<8x8xbf16>
    %cst_214 = arith.constant dense<0.000000e+00> : vector<4x8xf32>
    %272 = tpu.matmul %269, %271, %cst_214 {dimension_numbers = #tpu.dot_dimension_numbers<[1], [0], [0], [1], [0, 0, 1, 1], [], []>} : vector<4x8xbf16>, vector<8x8xbf16>, vector<4x8xf32> -> vector<4x8xf32>
    %273 = arith.addf %266, %272 : vector<4x8xf32>
    %c0_215 = arith.constant 0 : index
    %c4_216 = arith.constant 4 : index
    %c0_217 = arith.constant 0 : index
    %274 = tpu.strided_load %arg22[%c0_215, %c4_216, %c0_217] {strides = array<i32: 1, 2, 1>} : memref<2x8x8xf32, #tpu.memory_space<vmem>>, vector<2x2x8xf32>
    %275 = vector.shape_cast %274 : vector<2x2x8xf32> to vector<4x8xf32>
    %276 = arith.truncf %275 : vector<4x8xf32> to vector<4x8xbf16>
    %c4_218 = arith.constant 4 : index
    %c0_219 = arith.constant 0 : index
    %c0_220 = arith.constant 0 : index
    %277 = vector.load %arg14[%c4_218, %c0_219, %c0_220] : memref<5x8x8xbf16, #tpu.memory_space<vmem>>, vector<1x8x8xbf16>
    %278 = vector.shape_cast %277 : vector<1x8x8xbf16> to vector<8x8xbf16>
    %cst_221 = arith.constant dense<0.000000e+00> : vector<4x8xf32>
    %279 = tpu.matmul %276, %278, %cst_221 {dimension_numbers = #tpu.dot_dimension_numbers<[1], [0], [0], [1], [0, 0, 1, 1], [], []>} : vector<4x8xbf16>, vector<8x8xbf16>, vector<4x8xf32> -> vector<4x8xf32>
    %280 = arith.addf %273, %279 : vector<4x8xf32>
    %281 = vector.shape_cast %280 : vector<4x8xf32> to vector<2x2x8xf32>
    %c0_222 = arith.constant 0 : index
    %c0_223 = arith.constant 0 : index
    %282 = vector.load %arg15[%c0_222, %c0_223] : memref<1x8xf32, #tpu.memory_space<vmem>>, vector<1x8xf32>
    %283 = vector.shape_cast %282 : vector<1x8xf32> to vector<1x1x8xf32>
    %284 = vector.broadcast %283 : vector<1x1x8xf32> to vector<2x2x8xf32>
    %285 = arith.addf %281, %284 : vector<2x2x8xf32>
    %c0_224 = arith.constant 0 : index
    %c0_225 = arith.constant 0 : index
    %286 = vector.load %arg16[%c0_224, %c0_225] : memref<2x8xf32, #tpu.memory_space<vmem>>, vector<2x8xf32>
    %c0_226 = arith.constant 0 : index
    %c0_227 = arith.constant 0 : index
    %287 = vector.load %arg17[%c0_226, %c0_227] : memref<2x8xf32, #tpu.memory_space<vmem>>, vector<2x8xf32>
    %cst_228 = arith.constant dense<0.000000e+00> : vector<2x2xf32>
    %288 = vector.multi_reduction <add>, %285, %cst_228 [2] : vector<2x2x8xf32> to vector<2x2xf32>
    %289 = vector.shape_cast %288 : vector<2x2xf32> to vector<2x2x1xf32>
    %cst_229 = arith.constant dense<0.000000e+00> : vector<2x1xf32>
    %290 = vector.multi_reduction <add>, %289, %cst_229 [1] : vector<2x2x1xf32> to vector<2x1xf32>
    %291 = vector.shape_cast %290 : vector<2x1xf32> to vector<2x1x1xf32>
    %292 = arith.mulf %285, %285 : vector<2x2x8xf32>
    %cst_230 = arith.constant dense<0.000000e+00> : vector<2x2xf32>
    %293 = vector.multi_reduction <add>, %292, %cst_230 [2] : vector<2x2x8xf32> to vector<2x2xf32>
    %294 = vector.shape_cast %293 : vector<2x2xf32> to vector<2x2x1xf32>
    %cst_231 = arith.constant dense<0.000000e+00> : vector<2x1xf32>
    %295 = vector.multi_reduction <add>, %294, %cst_231 [1] : vector<2x2x1xf32> to vector<2x1xf32>
    %296 = vector.shape_cast %295 : vector<2x1xf32> to vector<2x1x1xf32>
    %cst_232 = arith.constant 6.250000e-02 : f32
    %297 = vector.broadcast %cst_232 : f32 to vector<2x1x1xf32>
    %298 = arith.mulf %291, %297 : vector<2x1x1xf32>
    %cst_233 = arith.constant 6.250000e-02 : f32
    %299 = vector.broadcast %cst_233 : f32 to vector<2x1x1xf32>
    %300 = arith.mulf %296, %299 : vector<2x1x1xf32>
    %301 = arith.mulf %298, %298 : vector<2x1x1xf32>
    %302 = arith.subf %300, %301 : vector<2x1x1xf32>
    %303 = vector.broadcast %298 : vector<2x1x1xf32> to vector<2x2x8xf32>
    %304 = arith.subf %285, %303 : vector<2x2x8xf32>
    %cst_234 = arith.constant 9.99999974E-6 : f32
    %305 = vector.broadcast %cst_234 : f32 to vector<2x1x1xf32>
    %306 = arith.addf %302, %305 : vector<2x1x1xf32>
    %307 = math.rsqrt %306 : vector<2x1x1xf32>
    %308 = vector.broadcast %307 : vector<2x1x1xf32> to vector<2x2x8xf32>
    %309 = arith.mulf %304, %308 : vector<2x2x8xf32>
    %310 = vector.shape_cast %286 : vector<2x8xf32> to vector<1x2x8xf32>
    %311 = vector.broadcast %310 : vector<1x2x8xf32> to vector<2x2x8xf32>
    %312 = arith.mulf %309, %311 : vector<2x2x8xf32>
    %313 = vector.shape_cast %287 : vector<2x8xf32> to vector<1x2x8xf32>
    %314 = vector.broadcast %313 : vector<1x2x8xf32> to vector<2x2x8xf32>
    %315 = arith.addf %312, %314 : vector<2x2x8xf32>
    %cst_235 = arith.constant 0.000000e+00 : f32
    %316 = vector.broadcast %cst_235 : f32 to vector<2x2x8xf32>
    %317 = arith.cmpf oge, %315, %316 : vector<2x2x8xf32>
    %cst_236 = arith.constant 2.000000e-01 : f32
    %318 = vector.broadcast %cst_236 : f32 to vector<2x2x8xf32>
    %319 = arith.mulf %318, %315 : vector<2x2x8xf32>
    %320 = arith.select %317, %315, %319 : vector<2x2x8xi1>, vector<2x2x8xf32>
    %c0_237 = arith.constant 0 : index
    %c0_238 = arith.constant 0 : index
    %c0_239 = arith.constant 0 : index
    %321 = vector.load %arg18[%c0_237, %c0_238, %c0_239] : memref<2x2x8xf32, #tpu.memory_space<vmem>>, vector<2x2x8xf32>
    tpu.vector_store %arg18[%c0_237, %c0_238, %c0_239], %320 {strides = array<i32>} : memref<2x2x8xf32, #tpu.memory_space<vmem>>, vector<2x2x8xf32>,
    return
  }
  func.func @transform_0(%arg0: i32) -> (i32, i32, i32) {
    %c0_i32 = arith.constant 0 : i32
    %c0_i32_0 = arith.constant 0 : i32
    %c0_i32_1 = arith.constant 0 : i32
    return %arg0, %c0_i32, %c0_i32_0 : i32, i32, i32
  }
  func.func @transform_1(%arg0: i32) -> (i32, i32, i32) {
    %c0_i32 = arith.constant 0 : i32
    %c0_i32_0 = arith.constant 0 : i32
    %c0_i32_1 = arith.constant 0 : i32
    %c0_i32_2 = arith.constant 0 : i32
    return %c0_i32, %c0_i32_0, %c0_i32_1 : i32, i32, i32
  }
  func.func @transform_2(%arg0: i32) -> (i32, i32) {
    %c0_i32 = arith.constant 0 : i32
    %c0_i32_0 = arith.constant 0 : i32
    %c0_i32_1 = arith.constant 0 : i32
    return %c0_i32, %c0_i32_0 : i32, i32
  }
  func.func @transform_3(%arg0: i32) -> (i32, i32) {
    %c0_i32 = arith.constant 0 : i32
    %c0_i32_0 = arith.constant 0 : i32
    %c0_i32_1 = arith.constant 0 : i32
    return %c0_i32, %c0_i32_0 : i32, i32
  }
  func.func @transform_4(%arg0: i32) -> (i32, i32) {
    %c0_i32 = arith.constant 0 : i32
    %c0_i32_0 = arith.constant 0 : i32
    %c0_i32_1 = arith.constant 0 : i32
    return %c0_i32, %c0_i32_0 : i32, i32
  }
  func.func @transform_5(%arg0: i32) -> (i32, i32, i32) {
    %c0_i32 = arith.constant 0 : i32
    %c0_i32_0 = arith.constant 0 : i32
    %c0_i32_1 = arith.constant 0 : i32
    %c0_i32_2 = arith.constant 0 : i32
    return %c0_i32, %c0_i32_0, %c0_i32_1 : i32, i32, i32
  }
  func.func @transform_6(%arg0: i32) -> (i32, i32) {
    %c0_i32 = arith.constant 0 : i32
    %c0_i32_0 = arith.constant 0 : i32
    %c0_i32_1 = arith.constant 0 : i32
    return %c0_i32, %c0_i32_0 : i32, i32
  }
  func.func @transform_7(%arg0: i32) -> (i32, i32) {
    %c0_i32 = arith.constant 0 : i32
    %c0_i32_0 = arith.constant 0 : i32
    %c0_i32_1 = arith.constant 0 : i32
    return %c0_i32, %c0_i32_0 : i32, i32
  }
  func.func @transform_8(%arg0: i32) -> (i32, i32) {
    %c0_i32 = arith.constant 0 : i32
    %c0_i32_0 = arith.constant 0 : i32
    %c0_i32_1 = arith.constant 0 : i32
    return %c0_i32, %c0_i32_0 : i32, i32
  }
  func.func @transform_9(%arg0: i32) -> (i32, i32, i32) {
    %c0_i32 = arith.constant 0 : i32
    %c0_i32_0 = arith.constant 0 : i32
    %c0_i32_1 = arith.constant 0 : i32
    %c0_i32_2 = arith.constant 0 : i32
    return %c0_i32, %c0_i32_0, %c0_i32_1 : i32, i32, i32
  }
  func.func @transform_10(%arg0: i32) -> (i32, i32) {
    %c0_i32 = arith.constant 0 : i32
    %c0_i32_0 = arith.constant 0 : i32
    %c0_i32_1 = arith.constant 0 : i32
    return %c0_i32, %c0_i32_0 : i32, i32
  }
  func.func @transform_11(%arg0: i32) -> (i32, i32) {
    %c0_i32 = arith.constant 0 : i32
    %c0_i32_0 = arith.constant 0 : i32
    %c0_i32_1 = arith.constant 0 : i32
    return %c0_i32, %c0_i32_0 : i32, i32
  }
  func.func @transform_12(%arg0: i32) -> (i32, i32) {
    %c0_i32 = arith.constant 0 : i32
    %c0_i32_0 = arith.constant 0 : i32
    %c0_i32_1 = arith.constant 0 : i32
    return %c0_i32, %c0_i32_0 : i32, i32
  }
  func.func @transform_13(%arg0: i32) -> (i32, i32, i32) {
    %c0_i32 = arith.constant 0 : i32
    %c0_i32_0 = arith.constant 0 : i32
    %c0_i32_1 = arith.constant 0 : i32
    %c0_i32_2 = arith.constant 0 : i32
    return %c0_i32, %c0_i32_0, %c0_i32_1 : i32, i32, i32
  }
  func.func @transform_14(%arg0: i32) -> (i32, i32) {
    %c0_i32 = arith.constant 0 : i32
    %c0_i32_0 = arith.constant 0 : i32
    %c0_i32_1 = arith.constant 0 : i32
    return %c0_i32, %c0_i32_0 : i32, i32
  }
  func.func @transform_15(%arg0: i32) -> (i32, i32) {
    %c0_i32 = arith.constant 0 : i32
    %c0_i32_0 = arith.constant 0 : i32
    %c0_i32_1 = arith.constant 0 : i32
    return %c0_i32, %c0_i32_0 : i32, i32
  }
  func.func @transform_16(%arg0: i32) -> (i32, i32) {
    %c0_i32 = arith.constant 0 : i32
    %c0_i32_0 = arith.constant 0 : i32
    %c0_i32_1 = arith.constant 0 : i32
    return %c0_i32, %c0_i32_0 : i32, i32
  }
  func.func @transform_17(%arg0: i32) -> (i32, i32, i32) {
    %c0_i32 = arith.constant 0 : i32
    %c0_i32_0 = arith.constant 0 : i32
    %c0_i32_1 = arith.constant 0 : i32
    return %arg0, %c0_i32, %c0_i32_0 : i32, i32, i32
  }
}

module attributes {stable_mosaic.version = 11 : i64} {
  func.func @kernel(%arg0: i32, %arg1: memref<2x16xf32, #tpu.memory_space<vmem>>, %arg2: memref<2x6xf32, #tpu.memory_space<vmem>>, %arg3: memref<16x8xbf16, #tpu.memory_space<vmem>>, %arg4: memref<1x8xf32, #tpu.memory_space<vmem>>, %arg5: memref<1x8xf32, #tpu.memory_space<vmem>>, %arg6: memref<1x8xf32, #tpu.memory_space<vmem>>, %arg7: memref<8x4xbf16, #tpu.memory_space<vmem>>, %arg8: memref<1x4xf32, #tpu.memory_space<vmem>>, %arg9: memref<1x4xf32, #tpu.memory_space<vmem>>, %arg10: memref<1x4xf32, #tpu.memory_space<vmem>>, %arg11: memref<4x2xbf16, #tpu.memory_space<vmem>>, %arg12: memref<1x2xf32, #tpu.memory_space<vmem>>, %arg13: memref<2x16xbf16, #tpu.memory_space<vmem>>, %arg14: memref<6x16xbf16, #tpu.memory_space<vmem>>, %arg15: memref<1x16xf32, #tpu.memory_space<vmem>>, %arg16: memref<1x16xf32, #tpu.memory_space<vmem>>, %arg17: memref<1x16xf32, #tpu.memory_space<vmem>>, %arg18: memref<16x16xbf16, #tpu.memory_space<vmem>>, %arg19: memref<1x16xf32, #tpu.memory_space<vmem>>, %arg20: memref<1x16xf32, #tpu.memory_space<vmem>>, %arg21: memref<1x16xf32, #tpu.memory_space<vmem>>, %arg22: memref<16x10xbf16, #tpu.memory_space<vmem>>, %arg23: memref<1x10xf32, #tpu.memory_space<vmem>>, %arg24: memref<2x2xf32, #tpu.memory_space<vmem>>, %arg25: memref<2x10xf32, #tpu.memory_space<vmem>>) attributes {dimension_semantics = [#tpu.dimension_semantics<parallel>], iteration_bounds = array<i64: 1>, scalar_prefetch = 0 : i64, scratch_operands = 0 : i64, tpu.core_type = #tpu.core_type<tc>, window_params = [{transform_indices = @transform_0, window_bounds = array<i64: 2, 16>}, {transform_indices = @transform_1, window_bounds = array<i64: 2, 6>}, {pipeline_mode = #tpu.pipeline_mode<synchronous>, transform_indices = @transform_2, window_bounds = array<i64: 16, 8>}, {pipeline_mode = #tpu.pipeline_mode<synchronous>, transform_indices = @transform_3, window_bounds = array<i64: 1, 8>}, {pipeline_mode = #tpu.pipeline_mode<synchronous>, transform_indices = @transform_4, window_bounds = array<i64: 1, 8>}, {pipeline_mode = #tpu.pipeline_mode<synchronous>, transform_indices = @transform_5, window_bounds = array<i64: 1, 8>}, {pipeline_mode = #tpu.pipeline_mode<synchronous>, transform_indices = @transform_6, window_bounds = array<i64: 8, 4>}, {pipeline_mode = #tpu.pipeline_mode<synchronous>, transform_indices = @transform_7, window_bounds = array<i64: 1, 4>}, {pipeline_mode = #tpu.pipeline_mode<synchronous>, transform_indices = @transform_8, window_bounds = array<i64: 1, 4>}, {pipeline_mode = #tpu.pipeline_mode<synchronous>, transform_indices = @transform_9, window_bounds = array<i64: 1, 4>}, {pipeline_mode = #tpu.pipeline_mode<synchronous>, transform_indices = @transform_10, window_bounds = array<i64: 4, 2>}, {pipeline_mode = #tpu.pipeline_mode<synchronous>, transform_indices = @transform_11, window_bounds = array<i64: 1, 2>}, {pipeline_mode = #tpu.pipeline_mode<synchronous>, transform_indices = @transform_12, window_bounds = array<i64: 2, 16>}, {pipeline_mode = #tpu.pipeline_mode<synchronous>, transform_indices = @transform_13, window_bounds = array<i64: 6, 16>}, {pipeline_mode = #tpu.pipeline_mode<synchronous>, transform_indices = @transform_14, window_bounds = array<i64: 1, 16>}, {pipeline_mode = #tpu.pipeline_mode<synchronous>, transform_indices = @transform_15, window_bounds = array<i64: 1, 16>}, {pipeline_mode = #tpu.pipeline_mode<synchronous>, transform_indices = @transform_16, window_bounds = array<i64: 1, 16>}, {pipeline_mode = #tpu.pipeline_mode<synchronous>, transform_indices = @transform_17, window_bounds = array<i64: 16, 16>}, {pipeline_mode = #tpu.pipeline_mode<synchronous>, transform_indices = @transform_18, window_bounds = array<i64: 1, 16>}, {pipeline_mode = #tpu.pipeline_mode<synchronous>, transform_indices = @transform_19, window_bounds = array<i64: 1, 16>}, {pipeline_mode = #tpu.pipeline_mode<synchronous>, transform_indices = @transform_20, window_bounds = array<i64: 1, 16>}, {pipeline_mode = #tpu.pipeline_mode<synchronous>, transform_indices = @transform_21, window_bounds = array<i64: 16, 10>}, {pipeline_mode = #tpu.pipeline_mode<synchronous>, transform_indices = @transform_22, window_bounds = array<i64: 1, 10>}, {transform_indices = @transform_23, window_bounds = array<i64: 2, 2>}, {transform_indices = @transform_24, window_bounds = array<i64: 2, 10>}]} {
    %c0 = arith.constant 0 : index
    %c0_0 = arith.constant 0 : index
    %0 = vector.load %arg1[%c0, %c0_0] : memref<2x16xf32, #tpu.memory_space<vmem>>, vector<2x16xf32>
    %1 = arith.truncf %0 : vector<2x16xf32> to vector<2x16xbf16>
    %c0_1 = arith.constant 0 : index
    %c0_2 = arith.constant 0 : index
    %2 = vector.load %arg3[%c0_1, %c0_2] : memref<16x8xbf16, #tpu.memory_space<vmem>>, vector<16x8xbf16>
    %cst = arith.constant dense<0.000000e+00> : vector<2x8xf32>
    %3 = tpu.matmul %1, %2, %cst {dimension_numbers = #tpu.dot_dimension_numbers<[1], [0], [0], [1], [0, 0, 1, 1], [], []>} : vector<2x16xbf16>, vector<16x8xbf16>, vector<2x8xf32> -> vector<2x8xf32>
    %c0_3 = arith.constant 0 : index
    %c0_4 = arith.constant 0 : index
    %4 = vector.load %arg4[%c0_3, %c0_4] : memref<1x8xf32, #tpu.memory_space<vmem>>, vector<1x8xf32>
    %5 = vector.broadcast %4 : vector<1x8xf32> to vector<2x8xf32>
    %6 = arith.addf %3, %5 : vector<2x8xf32>
    %c0_5 = arith.constant 0 : index
    %c0_6 = arith.constant 0 : index
    %7 = vector.load %arg5[%c0_5, %c0_6] : memref<1x8xf32, #tpu.memory_space<vmem>>, vector<1x8xf32>
    %c0_7 = arith.constant 0 : index
    %c0_8 = arith.constant 0 : index
    %8 = vector.load %arg6[%c0_7, %c0_8] : memref<1x8xf32, #tpu.memory_space<vmem>>, vector<1x8xf32>
    %cst_9 = arith.constant dense<0.000000e+00> : vector<2xf32>
    %9 = vector.multi_reduction <add>, %6, %cst_9 [1] : vector<2x8xf32> to vector<2xf32>
    %10 = vector.shape_cast %9 : vector<2xf32> to vector<2x1xf32>
    %11 = arith.mulf %6, %6 : vector<2x8xf32>
    %cst_10 = arith.constant dense<0.000000e+00> : vector<2xf32>
    %12 = vector.multi_reduction <add>, %11, %cst_10 [1] : vector<2x8xf32> to vector<2xf32>
    %13 = vector.shape_cast %12 : vector<2xf32> to vector<2x1xf32>
    %cst_11 = arith.constant 1.250000e-01 : f32
    %14 = vector.broadcast %cst_11 : f32 to vector<2x1xf32>
    %15 = arith.mulf %10, %14 : vector<2x1xf32>
    %cst_12 = arith.constant 1.250000e-01 : f32
    %16 = vector.broadcast %cst_12 : f32 to vector<2x1xf32>
    %17 = arith.mulf %13, %16 : vector<2x1xf32>
    %18 = arith.mulf %15, %15 : vector<2x1xf32>
    %19 = arith.subf %17, %18 : vector<2x1xf32>
    %20 = vector.broadcast %15 : vector<2x1xf32> to vector<2x8xf32>
    %21 = arith.subf %6, %20 : vector<2x8xf32>
    %cst_13 = arith.constant 9.99999974E-6 : f32
    %22 = vector.broadcast %cst_13 : f32 to vector<2x1xf32>
    %23 = arith.addf %19, %22 : vector<2x1xf32>
    %24 = math.rsqrt %23 : vector<2x1xf32>
    %25 = vector.broadcast %24 : vector<2x1xf32> to vector<2x8xf32>
    %26 = arith.mulf %21, %25 : vector<2x8xf32>
    %27 = vector.broadcast %7 : vector<1x8xf32> to vector<2x8xf32>
    %28 = arith.mulf %26, %27 : vector<2x8xf32>
    %29 = vector.broadcast %8 : vector<1x8xf32> to vector<2x8xf32>
    %30 = arith.addf %28, %29 : vector<2x8xf32>
    %cst_14 = arith.constant 0.000000e+00 : f32
    %31 = vector.broadcast %cst_14 : f32 to vector<2x8xf32>
    %32 = arith.cmpf oge, %30, %31 : vector<2x8xf32>
    %cst_15 = arith.constant 2.000000e-01 : f32
    %33 = vector.broadcast %cst_15 : f32 to vector<2x8xf32>
    %34 = arith.mulf %33, %30 : vector<2x8xf32>
    %35 = arith.select %32, %30, %34 : vector<2x8xi1>, vector<2x8xf32>
    %36 = arith.truncf %35 : vector<2x8xf32> to vector<2x8xbf16>
    %c0_16 = arith.constant 0 : index
    %c0_17 = arith.constant 0 : index
    %37 = vector.load %arg7[%c0_16, %c0_17] : memref<8x4xbf16, #tpu.memory_space<vmem>>, vector<8x4xbf16>
    %cst_18 = arith.constant dense<0.000000e+00> : vector<2x4xf32>
    %38 = tpu.matmul %36, %37, %cst_18 {dimension_numbers = #tpu.dot_dimension_numbers<[1], [0], [0], [1], [0, 0, 1, 1], [], []>} : vector<2x8xbf16>, vector<8x4xbf16>, vector<2x4xf32> -> vector<2x4xf32>
    %c0_19 = arith.constant 0 : index
    %c0_20 = arith.constant 0 : index
    %39 = vector.load %arg8[%c0_19, %c0_20] : memref<1x4xf32, #tpu.memory_space<vmem>>, vector<1x4xf32>
    %40 = vector.broadcast %39 : vector<1x4xf32> to vector<2x4xf32>
    %41 = arith.addf %38, %40 : vector<2x4xf32>
    %c0_21 = arith.constant 0 : index
    %c0_22 = arith.constant 0 : index
    %42 = vector.load %arg9[%c0_21, %c0_22] : memref<1x4xf32, #tpu.memory_space<vmem>>, vector<1x4xf32>
    %c0_23 = arith.constant 0 : index
    %c0_24 = arith.constant 0 : index
    %43 = vector.load %arg10[%c0_23, %c0_24] : memref<1x4xf32, #tpu.memory_space<vmem>>, vector<1x4xf32>
    %cst_25 = arith.constant dense<0.000000e+00> : vector<2xf32>
    %44 = vector.multi_reduction <add>, %41, %cst_25 [1] : vector<2x4xf32> to vector<2xf32>
    %45 = vector.shape_cast %44 : vector<2xf32> to vector<2x1xf32>
    %46 = arith.mulf %41, %41 : vector<2x4xf32>
    %cst_26 = arith.constant dense<0.000000e+00> : vector<2xf32>
    %47 = vector.multi_reduction <add>, %46, %cst_26 [1] : vector<2x4xf32> to vector<2xf32>
    %48 = vector.shape_cast %47 : vector<2xf32> to vector<2x1xf32>
    %cst_27 = arith.constant 2.500000e-01 : f32
    %49 = vector.broadcast %cst_27 : f32 to vector<2x1xf32>
    %50 = arith.mulf %45, %49 : vector<2x1xf32>
    %cst_28 = arith.constant 2.500000e-01 : f32
    %51 = vector.broadcast %cst_28 : f32 to vector<2x1xf32>
    %52 = arith.mulf %48, %51 : vector<2x1xf32>
    %53 = arith.mulf %50, %50 : vector<2x1xf32>
    %54 = arith.subf %52, %53 : vector<2x1xf32>
    %55 = vector.broadcast %50 : vector<2x1xf32> to vector<2x4xf32>
    %56 = arith.subf %41, %55 : vector<2x4xf32>
    %cst_29 = arith.constant 9.99999974E-6 : f32
    %57 = vector.broadcast %cst_29 : f32 to vector<2x1xf32>
    %58 = arith.addf %54, %57 : vector<2x1xf32>
    %59 = math.rsqrt %58 : vector<2x1xf32>
    %60 = vector.broadcast %59 : vector<2x1xf32> to vector<2x4xf32>
    %61 = arith.mulf %56, %60 : vector<2x4xf32>
    %62 = vector.broadcast %42 : vector<1x4xf32> to vector<2x4xf32>
    %63 = arith.mulf %61, %62 : vector<2x4xf32>
    %64 = vector.broadcast %43 : vector<1x4xf32> to vector<2x4xf32>
    %65 = arith.addf %63, %64 : vector<2x4xf32>
    %cst_30 = arith.constant 0.000000e+00 : f32
    %66 = vector.broadcast %cst_30 : f32 to vector<2x4xf32>
    %67 = arith.cmpf oge, %65, %66 : vector<2x4xf32>
    %cst_31 = arith.constant 2.000000e-01 : f32
    %68 = vector.broadcast %cst_31 : f32 to vector<2x4xf32>
    %69 = arith.mulf %68, %65 : vector<2x4xf32>
    %70 = arith.select %67, %65, %69 : vector<2x4xi1>, vector<2x4xf32>
    %71 = arith.truncf %70 : vector<2x4xf32> to vector<2x4xbf16>
    %c0_32 = arith.constant 0 : index
    %c0_33 = arith.constant 0 : index
    %72 = vector.load %arg11[%c0_32, %c0_33] : memref<4x2xbf16, #tpu.memory_space<vmem>>, vector<4x2xbf16>
    %cst_34 = arith.constant dense<0.000000e+00> : vector<2x2xf32>
    %73 = tpu.matmul %71, %72, %cst_34 {dimension_numbers = #tpu.dot_dimension_numbers<[1], [0], [0], [1], [0, 0, 1, 1], [], []>} : vector<2x4xbf16>, vector<4x2xbf16>, vector<2x2xf32> -> vector<2x2xf32>
    %c0_35 = arith.constant 0 : index
    %c0_36 = arith.constant 0 : index
    %74 = vector.load %arg12[%c0_35, %c0_36] : memref<1x2xf32, #tpu.memory_space<vmem>>, vector<1x2xf32>
    %75 = vector.broadcast %74 : vector<1x2xf32> to vector<2x2xf32>
    %76 = arith.addf %73, %75 : vector<2x2xf32>
    %c0_37 = arith.constant 0 : index
    %c0_38 = arith.constant 0 : index
    %77 = vector.load %arg24[%c0_37, %c0_38] : memref<2x2xf32, #tpu.memory_space<vmem>>, vector<2x2xf32>
    tpu.vector_store %arg24[%c0_37, %c0_38], %76 {strides = array<i32>} : memref<2x2xf32, #tpu.memory_space<vmem>>, vector<2x2xf32>,
    %78 = arith.truncf %76 : vector<2x2xf32> to vector<2x2xbf16>
    %c0_39 = arith.constant 0 : index
    %c0_40 = arith.constant 0 : index
    %79 = vector.load %arg13[%c0_39, %c0_40] : memref<2x16xbf16, #tpu.memory_space<vmem>>, vector<2x16xbf16>
    %cst_41 = arith.constant dense<0.000000e+00> : vector<2x16xf32>
    %80 = tpu.matmul %78, %79, %cst_41 {dimension_numbers = #tpu.dot_dimension_numbers<[1], [0], [0], [1], [0, 0, 1, 1], [], []>} : vector<2x2xbf16>, vector<2x16xbf16>, vector<2x16xf32> -> vector<2x16xf32>
    %c0_42 = arith.constant 0 : index
    %c0_43 = arith.constant 0 : index
    %81 = vector.load %arg2[%c0_42, %c0_43] : memref<2x6xf32, #tpu.memory_space<vmem>>, vector<2x6xf32>
    %82 = arith.truncf %81 : vector<2x6xf32> to vector<2x6xbf16>
    %c0_44 = arith.constant 0 : index
    %c0_45 = arith.constant 0 : index
    %83 = vector.load %arg14[%c0_44, %c0_45] : memref<6x16xbf16, #tpu.memory_space<vmem>>, vector<6x16xbf16>
    %cst_46 = arith.constant dense<0.000000e+00> : vector<2x16xf32>
    %84 = tpu.matmul %82, %83, %cst_46 {dimension_numbers = #tpu.dot_dimension_numbers<[1], [0], [0], [1], [0, 0, 1, 1], [], []>} : vector<2x6xbf16>, vector<6x16xbf16>, vector<2x16xf32> -> vector<2x16xf32>
    %85 = arith.addf %80, %84 : vector<2x16xf32>
    %c0_47 = arith.constant 0 : index
    %c0_48 = arith.constant 0 : index
    %86 = vector.load %arg15[%c0_47, %c0_48] : memref<1x16xf32, #tpu.memory_space<vmem>>, vector<1x16xf32>
    %87 = vector.broadcast %86 : vector<1x16xf32> to vector<2x16xf32>
    %88 = arith.addf %85, %87 : vector<2x16xf32>
    %c0_49 = arith.constant 0 : index
    %c0_50 = arith.constant 0 : index
    %89 = vector.load %arg16[%c0_49, %c0_50] : memref<1x16xf32, #tpu.memory_space<vmem>>, vector<1x16xf32>
    %c0_51 = arith.constant 0 : index
    %c0_52 = arith.constant 0 : index
    %90 = vector.load %arg17[%c0_51, %c0_52] : memref<1x16xf32, #tpu.memory_space<vmem>>, vector<1x16xf32>
    %cst_53 = arith.constant dense<0.000000e+00> : vector<2xf32>
    %91 = vector.multi_reduction <add>, %88, %cst_53 [1] : vector<2x16xf32> to vector<2xf32>
    %92 = vector.shape_cast %91 : vector<2xf32> to vector<2x1xf32>
    %93 = arith.mulf %88, %88 : vector<2x16xf32>
    %cst_54 = arith.constant dense<0.000000e+00> : vector<2xf32>
    %94 = vector.multi_reduction <add>, %93, %cst_54 [1] : vector<2x16xf32> to vector<2xf32>
    %95 = vector.shape_cast %94 : vector<2xf32> to vector<2x1xf32>
    %cst_55 = arith.constant 6.250000e-02 : f32
    %96 = vector.broadcast %cst_55 : f32 to vector<2x1xf32>
    %97 = arith.mulf %92, %96 : vector<2x1xf32>
    %cst_56 = arith.constant 6.250000e-02 : f32
    %98 = vector.broadcast %cst_56 : f32 to vector<2x1xf32>
    %99 = arith.mulf %95, %98 : vector<2x1xf32>
    %100 = arith.mulf %97, %97 : vector<2x1xf32>
    %101 = arith.subf %99, %100 : vector<2x1xf32>
    %102 = vector.broadcast %97 : vector<2x1xf32> to vector<2x16xf32>
    %103 = arith.subf %88, %102 : vector<2x16xf32>
    %cst_57 = arith.constant 9.99999974E-6 : f32
    %104 = vector.broadcast %cst_57 : f32 to vector<2x1xf32>
    %105 = arith.addf %101, %104 : vector<2x1xf32>
    %106 = math.rsqrt %105 : vector<2x1xf32>
    %107 = vector.broadcast %106 : vector<2x1xf32> to vector<2x16xf32>
    %108 = arith.mulf %103, %107 : vector<2x16xf32>
    %109 = vector.broadcast %89 : vector<1x16xf32> to vector<2x16xf32>
    %110 = arith.mulf %108, %109 : vector<2x16xf32>
    %111 = vector.broadcast %90 : vector<1x16xf32> to vector<2x16xf32>
    %112 = arith.addf %110, %111 : vector<2x16xf32>
    %cst_58 = arith.constant 0.000000e+00 : f32
    %113 = vector.broadcast %cst_58 : f32 to vector<2x16xf32>
    %114 = arith.cmpf oge, %112, %113 : vector<2x16xf32>
    %cst_59 = arith.constant 2.000000e-01 : f32
    %115 = vector.broadcast %cst_59 : f32 to vector<2x16xf32>
    %116 = arith.mulf %115, %112 : vector<2x16xf32>
    %117 = arith.select %114, %112, %116 : vector<2x16xi1>, vector<2x16xf32>
    %118 = arith.truncf %117 : vector<2x16xf32> to vector<2x16xbf16>
    %c0_60 = arith.constant 0 : index
    %c0_61 = arith.constant 0 : index
    %119 = vector.load %arg18[%c0_60, %c0_61] : memref<16x16xbf16, #tpu.memory_space<vmem>>, vector<16x16xbf16>
    %cst_62 = arith.constant dense<0.000000e+00> : vector<2x16xf32>
    %120 = tpu.matmul %118, %119, %cst_62 {dimension_numbers = #tpu.dot_dimension_numbers<[1], [0], [0], [1], [0, 0, 1, 1], [], []>} : vector<2x16xbf16>, vector<16x16xbf16>, vector<2x16xf32> -> vector<2x16xf32>
    %c0_63 = arith.constant 0 : index
    %c0_64 = arith.constant 0 : index
    %121 = vector.load %arg19[%c0_63, %c0_64] : memref<1x16xf32, #tpu.memory_space<vmem>>, vector<1x16xf32>
    %122 = vector.broadcast %121 : vector<1x16xf32> to vector<2x16xf32>
    %123 = arith.addf %120, %122 : vector<2x16xf32>
    %c0_65 = arith.constant 0 : index
    %c0_66 = arith.constant 0 : index
    %124 = vector.load %arg20[%c0_65, %c0_66] : memref<1x16xf32, #tpu.memory_space<vmem>>, vector<1x16xf32>
    %c0_67 = arith.constant 0 : index
    %c0_68 = arith.constant 0 : index
    %125 = vector.load %arg21[%c0_67, %c0_68] : memref<1x16xf32, #tpu.memory_space<vmem>>, vector<1x16xf32>
    %cst_69 = arith.constant dense<0.000000e+00> : vector<2xf32>
    %126 = vector.multi_reduction <add>, %123, %cst_69 [1] : vector<2x16xf32> to vector<2xf32>
    %127 = vector.shape_cast %126 : vector<2xf32> to vector<2x1xf32>
    %128 = arith.mulf %123, %123 : vector<2x16xf32>
    %cst_70 = arith.constant dense<0.000000e+00> : vector<2xf32>
    %129 = vector.multi_reduction <add>, %128, %cst_70 [1] : vector<2x16xf32> to vector<2xf32>
    %130 = vector.shape_cast %129 : vector<2xf32> to vector<2x1xf32>
    %cst_71 = arith.constant 6.250000e-02 : f32
    %131 = vector.broadcast %cst_71 : f32 to vector<2x1xf32>
    %132 = arith.mulf %127, %131 : vector<2x1xf32>
    %cst_72 = arith.constant 6.250000e-02 : f32
    %133 = vector.broadcast %cst_72 : f32 to vector<2x1xf32>
    %134 = arith.mulf %130, %133 : vector<2x1xf32>
    %135 = arith.mulf %132, %132 : vector<2x1xf32>
    %136 = arith.subf %134, %135 : vector<2x1xf32>
    %137 = vector.broadcast %132 : vector<2x1xf32> to vector<2x16xf32>
    %138 = arith.subf %123, %137 : vector<2x16xf32>
    %cst_73 = arith.constant 9.99999974E-6 : f32
    %139 = vector.broadcast %cst_73 : f32 to vector<2x1xf32>
    %140 = arith.addf %136, %139 : vector<2x1xf32>
    %141 = math.rsqrt %140 : vector<2x1xf32>
    %142 = vector.broadcast %141 : vector<2x1xf32> to vector<2x16xf32>
    %143 = arith.mulf %138, %142 : vector<2x16xf32>
    %144 = vector.broadcast %124 : vector<1x16xf32> to vector<2x16xf32>
    %145 = arith.mulf %143, %144 : vector<2x16xf32>
    %146 = vector.broadcast %125 : vector<1x16xf32> to vector<2x16xf32>
    %147 = arith.addf %145, %146 : vector<2x16xf32>
    %cst_74 = arith.constant 0.000000e+00 : f32
    %148 = vector.broadcast %cst_74 : f32 to vector<2x16xf32>
    %149 = arith.cmpf oge, %147, %148 : vector<2x16xf32>
    %cst_75 = arith.constant 2.000000e-01 : f32
    %150 = vector.broadcast %cst_75 : f32 to vector<2x16xf32>
    %151 = arith.mulf %150, %147 : vector<2x16xf32>
    %152 = arith.select %149, %147, %151 : vector<2x16xi1>, vector<2x16xf32>
    %153 = arith.truncf %152 : vector<2x16xf32> to vector<2x16xbf16>
    %c0_76 = arith.constant 0 : index
    %c0_77 = arith.constant 0 : index
    %154 = vector.load %arg22[%c0_76, %c0_77] : memref<16x10xbf16, #tpu.memory_space<vmem>>, vector<16x10xbf16>
    %cst_78 = arith.constant dense<0.000000e+00> : vector<2x10xf32>
    %155 = tpu.matmul %153, %154, %cst_78 {dimension_numbers = #tpu.dot_dimension_numbers<[1], [0], [0], [1], [0, 0, 1, 1], [], []>} : vector<2x16xbf16>, vector<16x10xbf16>, vector<2x10xf32> -> vector<2x10xf32>
    %c0_79 = arith.constant 0 : index
    %c0_80 = arith.constant 0 : index
    %156 = vector.load %arg23[%c0_79, %c0_80] : memref<1x10xf32, #tpu.memory_space<vmem>>, vector<1x10xf32>
    %157 = vector.broadcast %156 : vector<1x10xf32> to vector<2x10xf32>
    %158 = arith.addf %155, %157 : vector<2x10xf32>
    %cst_81 = arith.constant dense<0xFF800000> : vector<2xf32>
    %159 = vector.multi_reduction <maximumf>, %158, %cst_81 [1] : vector<2x10xf32> to vector<2xf32>
    %160 = vector.shape_cast %159 : vector<2xf32> to vector<2x1xf32>
    %161 = vector.broadcast %160 : vector<2x1xf32> to vector<2x10xf32>
    %162 = arith.subf %158, %161 : vector<2x10xf32>
    %163 = math.exp %162 : vector<2x10xf32>
    %cst_82 = arith.constant dense<0.000000e+00> : vector<2xf32>
    %164 = vector.multi_reduction <add>, %163, %cst_82 [1] : vector<2x10xf32> to vector<2xf32>
    %165 = vector.shape_cast %164 : vector<2xf32> to vector<2x1xf32>
    %166 = vector.broadcast %165 : vector<2x1xf32> to vector<2x10xf32>
    %167 = arith.divf %163, %166 : vector<2x10xf32>
    %c0_83 = arith.constant 0 : index
    %c0_84 = arith.constant 0 : index
    %168 = vector.load %arg25[%c0_83, %c0_84] : memref<2x10xf32, #tpu.memory_space<vmem>>, vector<2x10xf32>
    tpu.vector_store %arg25[%c0_83, %c0_84], %167 {strides = array<i32>} : memref<2x10xf32, #tpu.memory_space<vmem>>, vector<2x10xf32>,
    return
  }
  func.func @transform_0(%arg0: i32) -> (i32, i32) {
    %c0_i32 = arith.constant 0 : i32
    %c0_i32_0 = arith.constant 0 : i32
    return %arg0, %c0_i32 : i32, i32
  }
  func.func @transform_1(%arg0: i32) -> (i32, i32) {
    %c0_i32 = arith.constant 0 : i32
    %c0_i32_0 = arith.constant 0 : i32
    return %arg0, %c0_i32 : i32, i32
  }
  func.func @transform_2(%arg0: i32) -> (i32, i32) {
    %c0_i32 = arith.constant 0 : i32
    %c0_i32_0 = arith.constant 0 : i32
    %c0_i32_1 = arith.constant 0 : i32
    return %c0_i32, %c0_i32_0 : i32, i32
  }
  func.func @transform_3(%arg0: i32) -> (i32, i32) {
    %c0_i32 = arith.constant 0 : i32
    %c0_i32_0 = arith.constant 0 : i32
    %c0_i32_1 = arith.constant 0 : i32
    return %c0_i32, %c0_i32_0 : i32, i32
  }
  func.func @transform_4(%arg0: i32) -> (i32, i32) {
    %c0_i32 = arith.constant 0 : i32
    %c0_i32_0 = arith.constant 0 : i32
    %c0_i32_1 = arith.constant 0 : i32
    return %c0_i32, %c0_i32_0 : i32, i32
  }
  func.func @transform_5(%arg0: i32) -> (i32, i32) {
    %c0_i32 = arith.constant 0 : i32
    %c0_i32_0 = arith.constant 0 : i32
    %c0_i32_1 = arith.constant 0 : i32
    return %c0_i32, %c0_i32_0 : i32, i32
  }
  func.func @transform_6(%arg0: i32) -> (i32, i32) {
    %c0_i32 = arith.constant 0 : i32
    %c0_i32_0 = arith.constant 0 : i32
    %c0_i32_1 = arith.constant 0 : i32
    return %c0_i32, %c0_i32_0 : i32, i32
  }
  func.func @transform_7(%arg0: i32) -> (i32, i32) {
    %c0_i32 = arith.constant 0 : i32
    %c0_i32_0 = arith.constant 0 : i32
    %c0_i32_1 = arith.constant 0 : i32
    return %c0_i32, %c0_i32_0 : i32, i32
  }
  func.func @transform_8(%arg0: i32) -> (i32, i32) {
    %c0_i32 = arith.constant 0 : i32
    %c0_i32_0 = arith.constant 0 : i32
    %c0_i32_1 = arith.constant 0 : i32
    return %c0_i32, %c0_i32_0 : i32, i32
  }
  func.func @transform_9(%arg0: i32) -> (i32, i32) {
    %c0_i32 = arith.constant 0 : i32
    %c0_i32_0 = arith.constant 0 : i32
    %c0_i32_1 = arith.constant 0 : i32
    return %c0_i32, %c0_i32_0 : i32, i32
  }
  func.func @transform_10(%arg0: i32) -> (i32, i32) {
    %c0_i32 = arith.constant 0 : i32
    %c0_i32_0 = arith.constant 0 : i32
    %c0_i32_1 = arith.constant 0 : i32
    return %c0_i32, %c0_i32_0 : i32, i32
  }
  func.func @transform_11(%arg0: i32) -> (i32, i32) {
    %c0_i32 = arith.constant 0 : i32
    %c0_i32_0 = arith.constant 0 : i32
    %c0_i32_1 = arith.constant 0 : i32
    return %c0_i32, %c0_i32_0 : i32, i32
  }
  func.func @transform_12(%arg0: i32) -> (i32, i32) {
    %c0_i32 = arith.constant 0 : i32
    %c0_i32_0 = arith.constant 0 : i32
    %c0_i32_1 = arith.constant 0 : i32
    return %c0_i32, %c0_i32_0 : i32, i32
  }
  func.func @transform_13(%arg0: i32) -> (i32, i32) {
    %c0_i32 = arith.constant 0 : i32
    %c0_i32_0 = arith.constant 0 : i32
    %c0_i32_1 = arith.constant 0 : i32
    return %c0_i32, %c0_i32_0 : i32, i32
  }
  func.func @transform_14(%arg0: i32) -> (i32, i32) {
    %c0_i32 = arith.constant 0 : i32
    %c0_i32_0 = arith.constant 0 : i32
    %c0_i32_1 = arith.constant 0 : i32
    return %c0_i32, %c0_i32_0 : i32, i32
  }
  func.func @transform_15(%arg0: i32) -> (i32, i32) {
    %c0_i32 = arith.constant 0 : i32
    %c0_i32_0 = arith.constant 0 : i32
    %c0_i32_1 = arith.constant 0 : i32
    return %c0_i32, %c0_i32_0 : i32, i32
  }
  func.func @transform_16(%arg0: i32) -> (i32, i32) {
    %c0_i32 = arith.constant 0 : i32
    %c0_i32_0 = arith.constant 0 : i32
    %c0_i32_1 = arith.constant 0 : i32
    return %c0_i32, %c0_i32_0 : i32, i32
  }
  func.func @transform_17(%arg0: i32) -> (i32, i32) {
    %c0_i32 = arith.constant 0 : i32
    %c0_i32_0 = arith.constant 0 : i32
    %c0_i32_1 = arith.constant 0 : i32
    return %c0_i32, %c0_i32_0 : i32, i32
  }
  func.func @transform_18(%arg0: i32) -> (i32, i32) {
    %c0_i32 = arith.constant 0 : i32
    %c0_i32_0 = arith.constant 0 : i32
    %c0_i32_1 = arith.constant 0 : i32
    return %c0_i32, %c0_i32_0 : i32, i32
  }
  func.func @transform_19(%arg0: i32) -> (i32, i32) {
    %c0_i32 = arith.constant 0 : i32
    %c0_i32_0 = arith.constant 0 : i32
    %c0_i32_1 = arith.constant 0 : i32
    return %c0_i32, %c0_i32_0 : i32, i32
  }
  func.func @transform_20(%arg0: i32) -> (i32, i32) {
    %c0_i32 = arith.constant 0 : i32
    %c0_i32_0 = arith.constant 0 : i32
    %c0_i32_1 = arith.constant 0 : i32
    return %c0_i32, %c0_i32_0 : i32, i32
  }
  func.func @transform_21(%arg0: i32) -> (i32, i32) {
    %c0_i32 = arith.constant 0 : i32
    %c0_i32_0 = arith.constant 0 : i32
    %c0_i32_1 = arith.constant 0 : i32
    return %c0_i32, %c0_i32_0 : i32, i32
  }
  func.func @transform_22(%arg0: i32) -> (i32, i32) {
    %c0_i32 = arith.constant 0 : i32
    %c0_i32_0 = arith.constant 0 : i32
    %c0_i32_1 = arith.constant 0 : i32
    return %c0_i32, %c0_i32_0 : i32, i32
  }
  func.func @transform_23(%arg0: i32) -> (i32, i32) {
    %c0_i32 = arith.constant 0 : i32
    %c0_i32_0 = arith.constant 0 : i32
    return %arg0, %c0_i32 : i32, i32
  }
  func.func @transform_24(%arg0: i32) -> (i32, i32) {
    %c0_i32 = arith.constant 0 : i32
    %c0_i32_0 = arith.constant 0 : i32
    return %arg0, %c0_i32 : i32, i32
  }
}

</mosaic_0001>

<bundles_post_ra>
// kernel: a_call__.3
= control target key start
LH: loop header
LB: loop body
LE: loop exit
PB: predicated region body
PF: predicated region fallthrough
CT: control target
= control target key end

     0   :  { %s1063_s0 = inlined_call_operand.vmem [shape: f32[2,16], index: 0, kind: input, shape index: {}]   ;;  %s1064_s1 = inlined_call_operand.vmem [shape: f32[2,6], index: 1, kind: input, shape index: {}]   ;;  %s1065_s2 = inlined_call_operand.vmem [shape: bf16[16,8], index: 2, kind: input, shape index: {}]   ;;  %s1066_s3 = inlined_call_operand.vmem [shape: f32[1,8], index: 3, kind: input, shape index: {}, may-alias: {3,5}]   ;;  %s1067_s4 = inlined_call_operand.vmem [shape: f32[1,8], index: 4, kind: input, shape index: {}]   ;;  %s1068_s5 = inlined_call_operand.vmem [shape: f32[1,8], index: 5, kind: input, shape index: {}, may-alias: {3,5}]   ;;  %s1069_s6 = inlined_call_operand.vmem [shape: bf16[8,4], index: 6, kind: input, shape index: {}]   ;;  %s1070_s7 = inlined_call_operand.vmem [shape: f32[1,4], index: 7, kind: input, shape index: {}, may-alias: {7,9}]   ;;  %s1071_s8 = inlined_call_operand.vmem [shape: f32[1,4], index: 8, kind: input, shape index: {}]   ;;  %s1072_s9 = inlined_call_operand.vmem [shape: f32[1,4], index: 9, kind: input, shape index: {}, may-alias: {7,9}]   ;;  %s1073_s10 = inlined_call_operand.vmem [shape: bf16[4,2], index: 10, kind: input, shape index: {}]   ;;  %s1074_s11 = inlined_call_operand.vmem [shape: f32[1,2], index: 11, kind: input, shape index: {}]   ;;  %s1075_s12 = inlined_call_operand.vmem [shape: bf16[2,16], index: 12, kind: input, shape index: {}]   ;;  %s1076_s13 = inlined_call_operand.vmem [shape: bf16[6,16], index: 13, kind: input, shape index: {}]   ;;  %s1077_s14 = inlined_call_operand.vmem [shape: f32[1,16], index: 14, kind: input, shape index: {}, may-alias: {14,16,18,20}]   ;;  %s1078_s15 = inlined_call_operand.vmem [shape: f32[1,16], index: 15, kind: input, shape index: {}, may-alias: {15,19}]   ;;  %s1079_s16 = inlined_call_operand.vmem [shape: f32[1,16], index: 16, kind: input, shape index: {}, may-alias: {14,16,18,20}]   ;;  %s1080_s17 = inlined_call_operand.vmem [shape: bf16[16,16], index: 17, kind: input, shape index: {}]   ;;  %s1081_s18 = inlined_call_operand.vmem [shape: f32[1,16], index: 18, kind: input, shape index: {}, may-alias: {14,16,18,20}]   ;;  %s1082_s19 = inlined_call_operand.vmem [shape: f32[1,16], index: 19, kind: input, shape index: {}, may-alias: {15,19}]   ;;  %s1083_s20 = inlined_call_operand.vmem [shape: f32[1,16], index: 20, kind: input, shape index: {}, may-alias: {14,16,18,20}]   ;;  %s1084_s21 = inlined_call_operand.vmem [shape: bf16[16,10], index: 21, kind: input, shape index: {}]   ;;  %s1085_s22 = inlined_call_operand.vmem [shape: f32[1,10], index: 22, kind: input, shape index: {}]   ;;  %s1086_s23 = inlined_call_operand.hbm [shape: f32[2,2], index: 23, kind: output, shape index: {0}]   ;;  %s1087_s24 = inlined_call_operand.hbm [shape: f32[2,10], index: 24, kind: output, shape index: {1}]  }
   0x1   :  { %1088 = sst [smem:[#allocation8_spill]] %s1063_s0 }
   0x2   :  { %1089 = sst [smem:[#allocation9_spill]] %s1064_s1 }
   0x3   :  { %1090 = sst [smem:[#allocation10_spill]] %s1065_s2 }
   0x4   :  { %1091 = sst [smem:[#allocation11_spill]] %s1066_s3 }
   0x5   :  { %1092 = sst [smem:[#allocation12_spill]] %s1067_s4 }
   0x6   :  { %1093 = sst [smem:[#allocation13_spill]] %s1068_s5 }
   0x7   :  { %1094 = sst [smem:[#allocation14_spill]] %s1069_s6 }
   0x8   :  { %1095 = sst [smem:[#allocation15_spill]] %s1070_s7 }
   0x9   :  { %1096 = sst [smem:[#allocation16_spill]] %s1071_s8 }
   0xa   :  { %30 = vsyncpa [#allocation3], 0  ;;  %s1097_s27 = sld [smem:[#allocation10_spill]]  ;;  %v810_v1 = vmov 0.0   ;;  %s1098_s2 = sld [smem:[#allocation8_spill]]  ;;  %vm96_vm0 = vcmask 130048  }
   0xb   :  { %701 = vmatprep.subr.bf16.mxu0 %v810_v1  ;;  %707 = vmatprep.subr.bf16.mxu1 %v810_v1  ;;  %vm811_vm1 = vmmov 0  }
   0xc   :  { %703 = vmatprep.mubr.msk.bf16.mxu0 %vm811_vm1, %v810_v1  ;;  %709 = vmatprep.mubr.msk.bf16.mxu1 %vm811_vm1, %v810_v1 }
  0x10   :  { %v747_v0 = vld [vmem:[%s1097_s27] sm:$0xff]  }
  0x11   :  { %v79_v2 = vld [vmem:[%s1098_s2] sm:$0x3]  ;;  %702 = vmatpush3.bf16.msra.mxu0 %v747_v0 }
  0x12   :  { %v80_v3 = vpack.c.bf16 %v79_v2, %v79_v2  ;;  %713 = vmatprep.subr.bf16.mxu0 %v810_v1 }
  0x13   :  { %31 = vsyncpa [#allocation5], 0  ;;  %s1099_s7 = sld [smem:[#allocation11_spill]]  ;;  %vm142_vm2 = vcmask 58368   ;;  %s1100_s25 = sld [smem:[#allocation14_spill]]  ;;  %vm188_vm3 = vcmask 1043456  }
  0x14   :  { %704 = vmatmul.mubr.msk.bf16.vlgmr.msra.gmra.mrb[0].mxu0 %vm96_vm0, %v80_v3  ;;  %s1101_s1 = sld [smem:[#allocation12_spill]]  ;;  %s1102_s27 = sld [smem:[#allocation13_spill]]  ;;  %vm184_vm5 = vcmask 64512   ;;  %vm234_vm6 = vcmask 25600   ;;  %v268_v41 = vld [vmem:[%s1073_s10] sm:$0x3] }
  0x15   :  { %715 = vmatprep.mubr.msk.bf16.mxu0 %vm811_vm1, %v810_v1  ;;  %s1103_s2 = sld [smem:[#allocation15_spill]]  ;;  %vm280_vm7 = vcmask 1041408   ;;  %v330_v43 = vld [vmem:[%s1076_s13] sm:$0x7]  ;;  %vm335_vm8 = vcmask 1042432   ;;  %vm383_vm10 = vcmask 1040384  }
  0x16   :  { %v282_v42 = vsel %vm280_vm7, %v268_v41, 0  ;;  %v337_v44 = vsel %vm335_vm8, %v330_v43, 0  ;;  %v671_v56 = vld [vmem:[%s1072_s9] ss:$0 sm:$0xff]  ;;  %vm276_vm11 = vcmask 31744   ;;  %s1105_s26 = sld [smem:[#allocation9_spill]] }
  0x17   :  { %714 = vmatpush3.bf16.msra.mxu0 %v282_v42  ;;  %v327_v60 = vld [vmem:[%s1075_s12] sm:$0x1]  ;;  %vm331_vm12 = vcmask 48128   ;;  %vm324_vm13 = vcmask 9216   ;;  %vm379_vm14 = vcmask 15360   ;;  %vm437_vm15 = vcmask 123904  }
  0x18   :  { %725 = vmatprep.subr.bf16.mxu0 %v810_v1  ;;  %v385_v63 = vsel %vm383_vm10, %v327_v60, 0  ;;  %v672_v3 = vld [vmem:[%s1074_s11] ss:$0 sm:$0xff] }
  0x19   :  { %v663_v4 = vld [vmem:[%s1099_s7] ss:$0 sm:$0xff] }
  0x1a   :  { %v176_v13 = vld [vmem:[%s1100_s25] sm:$0xf]  ;;  %s1104_s25 = sld [smem:[#allocation16_spill]] }
  0x1b   :  { %v190_v14 = vsel %vm188_vm3, %v176_v13, 0  ;;  %v666_v24 = vld [vmem:[%s1101_s1] ss:$0 sm:$0xff]  ;;  %vm622_vm3 = vcmask 74752  }
  0x1c   :  { %708 = vmatpush3.bf16.msra.mxu1 %v190_v14  ;;  %v667_v26 = vld [vmem:[%s1102_s27] ss:$0 sm:$0xff] }
  0x1d   :  { %719 = vmatprep.subr.bf16.mxu1 %v810_v1  ;;  %v668_v32 = vld [vmem:[%s1103_s2] ss:$0 sm:$0xff] }
  0x1e   :  { %v328_v0 = vld [vmem:[%s1105_s26] sm:$0x3] }
  0x1f   :  { %v329_v2 = vpack.c.bf16 %v328_v0, %v328_v0  ;;  %v679_v41 = vld [vmem:[%s1081_s18] ss:$0 sm:$0xff] }
  0x20   :  { %v670_v54 = vld [vmem:[%s1104_s25] ss:$0 sm:$0xff] }
  0x21   :  { %v682_v60 = vld [vmem:[%s1082_s19] ss:$0 sm:$0xff]  ;;  %s812_s19 = smov [#allocation2]  }
  0xe7   :  { %v134_v5 = vpop.f32.mrb[0].mxu0 }
  0xe8   :  { %v135_v6 = vadd.f32 %v663_v4, %v134_v5  ;;  %v705_v7 = vpop.f32.mrb[1].mxu0 }
  0xe9   :  { %v137_v8 = vpop.f32.mrb[2].mxu0 }
  0xea   :  { %v706_v9 = vpop.f32.mrb[3].mxu0  ;;  %v143_v10 = vsel %vm142_vm2, %v135_v6, 0.0  ;;  %v146_v11 = vmul.f32 %v135_v6, %v135_v6 }
  0xeb   :  { %144 = vadd.xlane.f32.xlu0 %v143_v10 }
  0xec   :  { %v147_v12 = vsel %vm142_vm2, %v146_v11, 0.0 }
  0xef   :  { %148 = vadd.xlane.f32.xlu0 %v147_v12 }
 0x178   :  { %v145_v15 = vpop.xlane.xlu0 %144 }
 0x179   :  { %v150_v16 = vmul.f32 0.125, %v145_v15  ;;  %v676_v15 = vld [vmem:[%s1077_s14] ss:$0 sm:$0xff] }
 0x17b   :  { %v152_v18 = vmul.f32 %v150_v16, %v150_v16  ;;  %v154_v22 = vsub.f32 %v135_v6, %v150_v16 }
 0x17c   :  { %v149_v17 = vpop.xlane.xlu0 %148 }
 0x17d   :  { %v151_v19 = vmul.f32 0.125, %v149_v17 }
 0x17f   :  { %v153_v20 = vsub.f32 %v151_v19, %v152_v18 }
 0x181   :  { %v155_v21 = vadd.f32 1e-05, %v153_v20 }
 0x183   :  { %750 = vrsqrt.f32 %v155_v21 }
 0x18d   :  { %v751_v23 = vpop.eup %750 }
 0x18e   :  { %v157_v25 = vmul.f32 %v751_v23, %v154_v22  ;;  %v748_v23 = vld [vmem:[%s1080_s17] sm:$0xff]  }
 0x190   :  { %v164_v27 = vmul.f32 %v666_v24, %v157_v25 }
 0x192   :  { %v171_v28 = vadd.f32 %v667_v26, %v164_v27 }
 0x194   :  { %vm172_vm4 = vcmp.ge.f32.partialorder %v171_v28, 0.0  ;;  %v173_v29 = vmul.f32 0.2, %v171_v28 }
 0x196   :  { %v174_v30 = vsel %vm172_vm4, %v171_v28, %v173_v29 }
 0x197   :  { %v175_v31 = vpack.c.bf16 %v174_v30, %v174_v30 }
 0x199   :  { %710 = vmatmul.mubr.msk.bf16.vlgmr.msra.gmra.mrb[0].mxu1 %vm184_vm5, %v175_v31 }
 0x19a   :  { %721 = vmatprep.mubr.msk.bf16.mxu1 %vm811_vm1, %v810_v1  ;;  %720 = vmatpush3.bf16.msra.mxu1 %v337_v44 }
 0x19b   :  { %731 = vmatprep.subr.bf16.mxu1 %v810_v1 }
 0x1a1   :  { %722 = vmatmul.mubr.msk.bf16.vlgmr.msra.gmra.mrb[4].mxu1 %vm331_vm12, %v329_v2 }
 0x1a2   :  { %733 = vmatprep.mubr.msk.bf16.mxu1 %vm811_vm1, %v810_v1  ;;  %732 = vmatpush3.bf16.msra.mxu1 %v748_v23 }
 0x26c   :  { %v226_v33 = vpop.f32.mrb[0].mxu1 }
 0x26d   :  { %v227_v34 = vadd.f32 %v668_v32, %v226_v33  ;;  %v711_v35 = vpop.f32.mrb[1].mxu1  ;;  %v677_v33 = vld [vmem:[%s1078_s15] ss:$0 sm:$0xff] }
 0x26e   :  { %v229_v36 = vpop.f32.mrb[2].mxu1  ;;  %v678_v35 = vld [vmem:[%s1079_s16] ss:$0 sm:$0xff] }
 0x26f   :  { %v712_v37 = vpop.f32.mrb[3].mxu1  ;;  %v235_v38 = vsel %vm234_vm6, %v227_v34, 0.0  ;;  %v238_v39 = vmul.f32 %v227_v34, %v227_v34 }
 0x270   :  { %236 = vadd.xlane.f32.xlu1 %v235_v38 }
 0x271   :  { %v239_v40 = vsel %vm234_vm6, %v238_v39, 0.0 }
 0x274   :  { %240 = vadd.xlane.f32.xlu1 %v239_v40  ;;  %v373_v10 = vpop.f32.mrb[4].mxu1 }
 0x275   :  { %v723_v11 = vpop.f32.mrb[5].mxu1 }
 0x276   :  { %v376_v12 = vpop.f32.mrb[6].mxu1 }
 0x277   :  { %v724_v13 = vpop.f32.mrb[7].mxu1 }
 0x2fd   :  { %v237_v45 = vpop.xlane.xlu1 %236 }
 0x2fe   :  { %v242_v46 = vmul.f32 0.25, %v237_v45 }
 0x300   :  { %v244_v48 = vmul.f32 %v242_v46, %v242_v46  ;;  %v246_v52 = vsub.f32 %v227_v34, %v242_v46 }
 0x301   :  { %v241_v47 = vpop.xlane.xlu1 %240 }
 0x302   :  { %v243_v49 = vmul.f32 0.25, %v241_v47 }
 0x304   :  { %v245_v50 = vsub.f32 %v243_v49, %v244_v48 }
 0x306   :  { %v247_v51 = vadd.f32 1e-05, %v245_v50  ;;  %v749_v50 = vld [vmem:[%s1084_s21] sm:$0xff]  }
 0x308   :  { %752 = vrsqrt.f32 %v247_v51 }
 0x312   :  { %v753_v53 = vpop.eup %752 }
 0x313   :  { %v249_v55 = vmul.f32 %v753_v53, %v246_v52 }
 0x315   :  { %v256_v57 = vmul.f32 %v670_v54, %v249_v55 }
 0x317   :  { %v263_v58 = vadd.f32 %v671_v56, %v256_v57 }
 0x319   :  { %vm264_vm9 = vcmp.ge.f32.partialorder %v263_v58, 0.0  ;;  %v265_v59 = vmul.f32 0.2, %v263_v58 }
 0x31b   :  { %v266_v61 = vsel %vm264_vm9, %v263_v58, %v265_v59 }
 0x31c   :  { %v267_v62 = vpack.c.bf16 %v266_v61, %v266_v61 }
 0x31e   :  { %716 = vmatmul.mubr.msk.bf16.vlgmr.msra.gmra.mrb[4].mxu0 %vm276_vm11, %v267_v62  ;;  %v683_v62 = vld [vmem:[%s1083_s20] ss:$0 sm:$0xff]  ;;  %s641_s20 = sshll.u32 %s812_s19, 4  ;;  %s642_s20 = int_to_ptr.vmem [resolvable:$true] %s641_s20 }
 0x31f   :  { %726 = vmatpush3.bf16.msra.mxu0 %v385_v63  ;;  %727 = vmatprep.mubr.msk.bf16.mxu0 %vm811_vm1, %v810_v1  ;;  %p767_p1 = scmp.lt.s32.totalorder %s642_s20, %s642_s20 }
 0x320   :  { %737 = vmatprep.subr.bf16.mxu0 %v810_v1 }
 0x3f1   :  { %v318_v4 = vpop.f32.mrb[4].mxu0 }
 0x3f2   :  { %v319_v5 = vadd.f32 %v672_v3, %v318_v4  ;;  %v717_v6 = vpop.f32.mrb[5].mxu0 }
 0x3f3   :  { %v321_v7 = vpop.f32.mrb[6].mxu0 }
 0x3f4   :  { %v326_v8 = vpack.c.bf16 %v319_v5, %v319_v5  ;;  %v718_v9 = vpop.f32.mrb[7].mxu0  ;;  %325 = vst.msk [vmem:[#allocation2] sm:$0x3] %vm324_vm13, %v319_v5  ;;  %v684_v5 = vld [vmem:[%s1085_s22] ss:$0 sm:$0xff]  ;;  %s762_s22 = scalar_lea.vmem %s642_s20, 32 }
 0x3f5   :  { %p763_p0 = scmp.ne.s32.totalorder %s642_s20, %s762_s22  ;;  %p768_p2 = scmp.lt.s32.totalorder %s762_s22, %s762_s22 }
 0x3f6   :  { %728 = vmatmul.mubr.msk.bf16.vlgmr.msra.gmra.mrb[8].mxu0 %vm379_vm14, %v326_v8 }
 0x3f7   :  { %739 = vmatprep.mubr.msk.bf16.mxu0 %vm811_vm1, %v810_v1  ;;  %738 = vmatpush3.bf16.msra.mxu0 %v749_v50  ;;  %p769_p3 = por %p768_p2, %p767_p1 }
 0x3f9   :  { %p770_p4 = pnand %p769_p3, %p763_p0 }
 0x4c9   :  { %v421_v14 = vpop.f32.mrb[8].mxu0 }
 0x4ca   :  { %v422_v16 = vadd.f32 %v421_v14, %v373_v10  ;;  %v729_v17 = vpop.f32.mrb[9].mxu0 }
 0x4cb   :  { %v424_v18 = vpop.f32.mrb[10].mxu0 }
 0x4cc   :  { %v434_v19 = vadd.f32 %v676_v15, %v422_v16  ;;  %v730_v20 = vpop.f32.mrb[11].mxu0 }
 0x4ce   :  { %v438_v21 = vsel %vm437_vm15, %v434_v19, 0.0  ;;  %v441_v22 = vmul.f32 %v434_v19, %v434_v19 }
 0x4cf   :  { %439 = vadd.xlane.f32.xlu0 %v438_v21 }
 0x4d0   :  { %v442_v1 = vsel %vm437_vm15, %v441_v22, 0.0 }
 0x4d1   :  { %443 = vadd.xlane.f32.xlu1 %v442_v1 }
 0x55c   :  { %v440_v24 = vpop.xlane.xlu0 %439 }
 0x55d   :  { %v445_v25 = vmul.f32 0.0625, %v440_v24 }
 0x55e   :  { %v444_v26 = vpop.xlane.xlu1 %443 }
 0x55f   :  { %v447_v27 = vmul.f32 %v445_v25, %v445_v25  ;;  %v446_v28 = vmul.f32 0.0625, %v444_v26  ;;  %v449_v31 = vsub.f32 %v434_v19, %v445_v25 }
 0x561   :  { %v448_v29 = vsub.f32 %v446_v28, %v447_v27 }
 0x563   :  { %v450_v30 = vadd.f32 1e-05, %v448_v29 }
 0x565   :  { %754 = vrsqrt.f32 %v450_v30 }
 0x56f   :  { %v755_v32 = vpop.eup %754 }
 0x570   :  { %v452_v34 = vmul.f32 %v755_v32, %v449_v31 }
 0x572   :  { %v459_v36 = vmul.f32 %v677_v33, %v452_v34 }
 0x574   :  { %v466_v37 = vadd.f32 %v678_v35, %v459_v36 }
 0x576   :  { %vm467_vm1 = vcmp.ge.f32.partialorder %v466_v37, 0.0  ;;  %v468_v38 = vmul.f32 0.2, %v466_v37 }
 0x578   :  { %v469_v39 = vsel %vm467_vm1, %v466_v37, %v468_v38 }
 0x579   :  { %v470_v40 = vpack.c.bf16 %v469_v39, %v469_v39 }
 0x57b   :  { %734 = vmatmul.mubr.msk.bf16.vlgmr.msra.gmra.mrb[8].mxu1 %vm96_vm0, %v470_v40 }
 0x64e   :  { %v523_v42 = vpop.f32.mrb[8].mxu1 }
 0x64f   :  { %v524_v43 = vadd.f32 %v679_v41, %v523_v42  ;;  %v735_v44 = vpop.f32.mrb[9].mxu1 }
 0x650   :  { %v526_v45 = vpop.f32.mrb[10].mxu1 }
 0x651   :  { %v736_v46 = vpop.f32.mrb[11].mxu1  ;;  %v531_v47 = vsel %vm437_vm15, %v524_v43, 0.0  ;;  %v534_v48 = vmul.f32 %v524_v43, %v524_v43 }
 0x652   :  { %532 = vadd.xlane.f32.xlu0 %v531_v47 }
 0x653   :  { %v535_v49 = vsel %vm437_vm15, %v534_v48, 0.0 }
 0x654   :  { %536 = vadd.xlane.f32.xlu1 %v535_v49 }
 0x6df   :  { %v533_v51 = vpop.xlane.xlu0 %532 }
 0x6e0   :  { %v538_v52 = vmul.f32 0.0625, %v533_v51 }
 0x6e1   :  { %v537_v53 = vpop.xlane.xlu1 %536 }
 0x6e2   :  { %v540_v54 = vmul.f32 %v538_v52, %v538_v52  ;;  %v539_v55 = vmul.f32 0.0625, %v537_v53  ;;  %v542_v58 = vsub.f32 %v524_v43, %v538_v52 }
 0x6e4   :  { %v541_v56 = vsub.f32 %v539_v55, %v540_v54 }
 0x6e6   :  { %v543_v57 = vadd.f32 1e-05, %v541_v56 }
 0x6e8   :  { %756 = vrsqrt.f32 %v543_v57 }
 0x6f2   :  { %v757_v59 = vpop.eup %756 }
 0x6f3   :  { %v545_v61 = vmul.f32 %v757_v59, %v542_v58 }
 0x6f5   :  { %v552_v63 = vmul.f32 %v682_v60, %v545_v61 }
 0x6f7   :  { %v559_v0 = vadd.f32 %v683_v62, %v552_v63 }
 0x6f9   :  { %vm560_vm2 = vcmp.ge.f32.partialorder %v559_v0, 0.0  ;;  %v561_v2 = vmul.f32 0.2, %v559_v0 }
 0x6fb   :  { %v562_v3 = vsel %vm560_vm2, %v559_v0, %v561_v2 }
 0x6fc   :  { %v563_v4 = vpack.c.bf16 %v562_v3, %v562_v3 }
 0x6fe   :  { %740 = vmatmul.mubr.msk.bf16.vlgmr.msra.gmra.mrb[12].mxu0 %vm96_vm0, %v563_v4 }
 0x7d1   :  { %v616_v6 = vpop.f32.mrb[12].mxu0 }
 0x7d2   :  { %v617_v7 = vadd.f32 %v684_v5, %v616_v6  ;;  %v741_v8 = vpop.f32.mrb[13].mxu0 }
 0x7d3   :  { %v619_v9 = vpop.f32.mrb[14].mxu0 }
 0x7d4   :  { %v742_v10 = vpop.f32.mrb[15].mxu0  ;;  %v623_v11 = vsel %vm622_vm3, %v617_v7, -inf }
 0x7d5   :  { %624 = vmax.xlane.f32.xlu0 %v623_v11 }
 0x862   :  { %v625_v12 = vpop.xlane.xlu0 %624 }
 0x863   :  { %v626_v13 = vsub.f32 %v617_v7, %v625_v12 }
 0x865   :  { %v627_v14 = vmul.f32 1.442695, %v626_v13 }
 0x867   :  { %758 = vpow2.f32 %v627_v14 }
 0x871   :  { %v759_v15 = vpop.eup %758 }
 0x872   :  { %v629_v16 = vsel %vm622_vm3, %v759_v15, 0.0 }
 0x873   :  { %630 = vadd.xlane.f32.xlu1 %v629_v16 }
 0x874   :  { %773 = shalt.err (!%p770_p4)
}
 0x875   :  { %s774_s1 = scalar_lea.hbm %s1086_s23, 32 }
 0x876   :  { %p775_p5 = scmp.ne.s32.totalorder %s1086_s23, %s774_s1  ;;  %p778_p6 = scmp.lt.u32.totalorder %s774_s1, %s1086_s23 }
 0x878   :  { %p780_p7 = pnand %p778_p6, %p775_p5 }
 0x87a   :  { %783 = shalt.err (!%p780_p7)
}
 0x87b   :  { %644 = dma.vmem_to_hbm [thread:$0]  %s642_s20, 32, %s1086_s23, [#allocation3]  }
 0x87c   :  { %s813_s11 = smov [#allocation4]  }
 0x87d   :  { %s651_s6 = sshll.u32 %s813_s11, 4  ;;  %s652_s6 = int_to_ptr.vmem [resolvable:$true] %s651_s6 }
 0x87e   :  { %s784_s2 = scalar_lea.vmem %s652_s6, 32  ;;  %p789_p9 = scmp.lt.s32.totalorder %s652_s6, %s652_s6 }
 0x87f   :  { %p785_p8 = scmp.ne.s32.totalorder %s652_s6, %s784_s2  ;;  %p790_p10 = scmp.lt.s32.totalorder %s784_s2, %s784_s2 }
 0x881   :  { %p791_p11 = por %p790_p10, %p789_p9 }
 0x883   :  { %p792_p12 = pnand %p791_p11, %p785_p8 }
 0x900   :  { %v631_v17 = vpop.xlane.xlu1 %630 }
 0x901   :  { %760 = vrcp.f32 %v631_v17 }
 0x90b   :  { %v761_v18 = vpop.eup %760 }
 0x90c   :  { %v633_v19 = vmul.f32 %v761_v18, %v759_v15 }
 0x90e   :  { %634 = vst.msk [vmem:[#allocation4] sm:$0x3] %vm622_vm3, %v633_v19 }
 0x90f   :  { %795 = shalt.err (!%p792_p12)
}
 0x910   :  { %s796_s23 = scalar_lea.hbm %s1087_s24, 32 }
 0x911   :  { %p797_p13 = scmp.ne.s32.totalorder %s1087_s24, %s796_s23  ;;  %p800_p0 = scmp.lt.u32.totalorder %s796_s23, %s1087_s24 }
 0x913   :  { %p802_p1 = pnand %p800_p0, %p797_p13 }
 0x915   :  { %805 = shalt.err (!%p802_p1)
}
 0x916   :  { %654 = dma.vmem_to_hbm [thread:$0]  %s652_s6, 32, %s1087_s24, [#allocation5]  }
 0x917   :  { %806 = dma.done.wait [#allocation3], 32  }
 0x918   :  { %807 = vsyncadd [#allocation3], 4294967264 }
 0x919   :  { %808 = dma.done.wait [#allocation5], 32  }
 0x91a   :  { %809 = vsyncadd [#allocation5], 4294967264 }
 0x91b   :  { %661 = vsyncpa [#allocation3], 1 }
 0x91c   :  { %662 = vsyncpa [#allocation5], 1 }

// kernel: a_call__.2
= control target key start
LH: loop header
LB: loop body
LE: loop exit
PB: predicated region body
PF: predicated region fallthrough
CT: control target
= control target key end

     0   :  { %vm107_vm0 = vcmask 1041408   ;;  %vm65_vm1 = vcmask 25600   ;;  %vm70_vm2 = vcmask 31744   ;;  %v1991_v3 = vmov 0.0   ;;  %s2445_s1 = inlined_call_operand.vmem [shape: bf16[5,4,8], index: 1, kind: input, shape index: {}]   ;;  %s2446_s0 = inlined_call_operand.vmem [shape: f32[2,32,4], index: 0, kind: input, shape index: {}]   ;;  %s2447_s2 = inlined_call_operand.vmem [shape: f32[1,8], index: 2, kind: input, shape index: {}, may-alias: {2,6,10,14}]   ;;  %s2448_s5 = inlined_call_operand.vmem [shape: bf16[5,8,8], index: 5, kind: input, shape index: {}]   ;;  %s2449_s3 = inlined_call_operand.vmem [shape: f32[16,8], index: 3, kind: input, shape index: {}]   ;;  %s2450_s4 = inlined_call_operand.vmem [shape: f32[16,8], index: 4, kind: input, shape index: {}]   ;;  %s2451_s6 = inlined_call_operand.vmem [shape: f32[1,8], index: 6, kind: input, shape index: {}, may-alias: {2,6,10,14}]   ;;  %s2452_s9 = inlined_call_operand.vmem [shape: bf16[5,8,8], index: 9, kind: input, shape index: {}]   ;;  %s2453_s7 = inlined_call_operand.vmem [shape: f32[8,8], index: 7, kind: input, shape index: {}]   ;;  %s2454_s8 = inlined_call_operand.vmem [shape: f32[8,8], index: 8, kind: input, shape index: {}]   ;;  %s2455_s10 = inlined_call_operand.vmem [shape: f32[1,8], index: 10, kind: input, shape index: {}, may-alias: {2,6,10,14}]   ;;  %s2456_s13 = inlined_call_operand.vmem [shape: bf16[5,8,8], index: 13, kind: input, shape index: {}]   ;;  %s2457_s11 = inlined_call_operand.vmem [shape: f32[4,8], index: 11, kind: input, shape index: {}]   ;;  %s2458_s12 = inlined_call_operand.vmem [shape: f32[4,8], index: 12, kind: input, shape index: {}]   ;;  %s2459_s14 = inlined_call_operand.vmem [shape: f32[1,8], index: 14, kind: input, shape index: {}, may-alias: {2,6,10,14}]   ;;  %s2460_s15 = inlined_call_operand.vmem [shape: f32[2,8], index: 15, kind: input, shape index: {}]   ;;  %s2461_s16 = inlined_call_operand.vmem [shape: f32[2,8], index: 16, kind: input, shape index: {}]   ;;  %s2462_s17 = inlined_call_operand.vmem [shape: f32[2,2,8], index: 17, kind: output, shape index: {}]  }
   0x1   :  { %2465 = sst [smem:[#allocation6_spill]] %s2445_s1  ;;  %66 = vst.msk [vmem:[#allocation2] sm:$0x3] %vm65_vm1, %v1991_v3  ;;  %69 = vst.msk [vmem:[#allocation2 + $0x4a] sm:$0x3] %vm65_vm1, %v1991_v3  ;;  %1829 = vmatprep.subr.bf16.mxu1 %v1991_v3  ;;  %vm455_vm3 = vcmask 64512  }
   0x2   :  { %2466 = sst [smem:[#allocation7_spill]] %s2446_s0  ;;  %s2467_s26 = sld [smem:[#allocation6_spill]]  ;;  %67 = vst.msk [vmem:[#allocation2 + $0x28] sm:$0x3] %vm65_vm1, %v1991_v3  ;;  %68 = vst.msk [vmem:[#allocation2 + $0x22] sm:$0x3] %vm65_vm1, %v1991_v3 }
   0x3   :  { %s2468_s29 = sld [smem:[#allocation7_spill]]  ;;  %v1723_v49 = vld [vmem:[%s2447_s2] ss:$0 sm:$0xff]  ;;  %vm552_vm4 = vcmask 58368   ;;  %vm576_vm5 = vcmask 1043456   ;;  %vm1992_vm6 = vmmov 0  }
   0x4   :  { %553 = vst.msk [vmem:[#allocation3] sm:$0x3] %vm552_vm4, %v1991_v3  ;;  %554 = vst.msk [vmem:[#allocation3 + $0x18] sm:$0x3] %vm552_vm4, %v1991_v3  ;;  %1831 = vmatprep.mubr.msk.bf16.mxu1 %vm1992_vm6, %v1991_v3  ;;  %vm1217_vm13 = vcmask 60416  }
   0x5   :  { %555 = vst.msk [vmem:[#allocation3 + $0x12] sm:$0x3] %vm552_vm4, %v1991_v3  ;;  %556 = vst.msk [vmem:[#allocation3 + $0x2a] sm:$0x3] %vm552_vm4, %v1991_v3 }
   0x6   :  { %911 = vst.msk [vmem:[#allocation4] sm:$0x3] %vm552_vm4, %v1991_v3  ;;  %912 = vst.msk [vmem:[#allocation4 + $0x10] sm:$0x3] %vm552_vm4, %v1991_v3 }
   0x7   :  { %913 = vst.msk [vmem:[#allocation4 + $0xa] sm:$0x3] %vm552_vm4, %v1991_v3  ;;  %914 = vst.msk [vmem:[#allocation4 + $0x1a] sm:$0x3] %vm552_vm4, %v1991_v3 }
   0x8   :  { %v1709_v0 = vld [vmem:[%s2467_s26 + $0x2] sm:$0x3]  ;;  %v88_v7 = vld [vmem:[%s2467_s26] sm:$0x3]  ;;  %v1714_v22 = vld [vmem:[%s2467_s26 + $0x4] sm:$0x3] }
   0x9   :  { %v57_v1 = vld [vmem:[%s2468_s29] sm:$0xff]  ;;  %v58_v2 = vld [vmem:[%s2468_s29 + $0x8] sm:$0xff]  ;;  %1967 = vmatprep.subr.msk.bf16.mxu0 %vm107_vm0, %v1709_v0  ;;  %v109_v4 = vsel %vm107_vm0, %v1709_v0, 0  ;;  %v59_v5 = vld [vmem:[%s2468_s29 + $0x10] sm:$0xff]  ;;  %v167_v21 = vsel %vm107_vm0, %v88_v7, 0  ;;  %v237_v29 = vsel %vm107_vm0, %v1714_v22, 0 }
   0xa   :  { %v60_v6 = vld [vmem:[%s2468_s29 + $0x18] sm:$0xff]  ;;  %71 = vst.msk [vmem:[#allocation2 + $0x2] sm:$0xff] %vm70_vm2, %v57_v1  ;;  %72 = vst.msk [vmem:[#allocation2 + $0xa] sm:$0xff] %vm70_vm2, %v58_v2  ;;  %1800 = vmatpush3.bf16.msra.mxu0 %v109_v4  ;;  %v61_v8 = vld [vmem:[%s2468_s29 + $0x20] sm:$0xff] }
   0xb   :  { %73 = vst.msk [vmem:[#allocation2 + $0x12] sm:$0xff] %vm70_vm2, %v59_v5  ;;  %74 = vst.msk [vmem:[#allocation2 + $0x1a] sm:$0xff] %vm70_vm2, %v60_v6  ;;  %v62_v9 = vld [vmem:[%s2468_s29 + $0x28] sm:$0xff]  ;;  %v63_v10 = vld [vmem:[%s2468_s29 + $0x30] sm:$0xff]  ;;  %1968 = vmatprep.subr.msk.bf16.mxu0 %vm107_vm0, %v88_v7 }
   0xc   :  { %v64_v11 = vld [vmem:[%s2468_s29 + $0x38] sm:$0xff]  ;;  %75 = vst.msk [vmem:[#allocation2 + $0x2a] sm:$0xff] %vm70_vm2, %v61_v8  ;;  %76 = vst.msk [vmem:[#allocation2 + $0x32] sm:$0xff] %vm70_vm2, %v62_v9  ;;  %v1717_v30 = vld [vmem:[%s2467_s26 + $0x6] sm:$0x3] }
   0xd   :  { %77 = vst.msk [vmem:[#allocation2 + $0x3a] sm:$0xff] %vm70_vm2, %v63_v10  ;;  %78 = vst.msk [vmem:[#allocation2 + $0x42] sm:$0xff] %vm70_vm2, %v64_v11  ;;  %v311_v37 = vsel %vm107_vm0, %v1717_v30, 0  ;;  %v1720_v38 = vld [vmem:[%s2467_s26 + $0x8] sm:$0x3] }
   0xe   :  { %v385_v45 = vsel %vm107_vm0, %v1720_v38, 0  ;;  %1286 = vst.msk [vmem:[#allocation5] sm:$0x3] %vm552_vm4, %v1991_v3  ;;  %1287 = vst.msk [vmem:[#allocation5 + $0x8] sm:$0x3] %vm552_vm4, %v1991_v3 }
   0xf   :  { %1288 = vst.msk [vmem:[#allocation5 + $0x6] sm:$0x3] %vm552_vm4, %v1991_v3  ;;  %1289 = vst.msk [vmem:[#allocation5 + $0xe] sm:$0x3] %vm552_vm4, %v1991_v3  ;;  %v1724_v7 = vld [vmem:[%s2448_s5 + $0x4] sm:$0xf] }
  0x10   :  { %v578_v8 = vsel %vm576_vm5, %v1724_v7, 0 }
  0x11   :  { %v90_v12 = vld [vmem:[#allocation2 + $0x1] ss:$2 sm:$0xff]  ;;  %v79_v13 = vld [vmem:[#allocation2] ss:$2 sm:$0xff]  ;;  %1830 = vmatpush3.bf16.msra.mxu1 %v578_v8 }
  0x12   :  { %v92_v14 = vld [vmem:[#allocation2 + $0x11] ss:$2 sm:$0xff]  ;;  %v81_v15 = vld [vmem:[#allocation2 + $0x10] ss:$2 sm:$0xff]  ;;  %1835 = vmatprep.subr.bf16.mxu1 %v1991_v3 }
  0x13   :  { %v97_v16 = vpack.c.bf16 %v92_v14, %v90_v12  ;;  %v94_v17 = vld [vmem:[#allocation2 + $0x29] ss:$2 sm:$0xff]  ;;  %v86_v19 = vpack.c.bf16 %v81_v15, %v79_v13  ;;  %v83_v23 = vld [vmem:[#allocation2 + $0x28] ss:$2 sm:$0xff] }
  0x14   :  { %v96_v18 = vld [vmem:[#allocation2 + $0x39] ss:$2 sm:$0xff]  ;;  %v85_v24 = vld [vmem:[#allocation2 + $0x38] ss:$2 sm:$0xff] }
  0x15   :  { %1801 = vmatprep.mubr.msk.bf16.mxu0 %vm70_vm2, %v97_v16  ;;  %v98_v20 = vpack.c.bf16 %v96_v18, %v94_v17  ;;  %v219_v25 = vld [vmem:[#allocation2 + $0x2] ss:$2 sm:$0xff]  ;;  %v221_v26 = vld [vmem:[#allocation2 + $0x12] ss:$2 sm:$0xff]  ;;  %v87_v27 = vpack.c.bf16 %v85_v24, %v83_v23  ;;  %v293_v33 = vld [vmem:[#allocation2 + $0x3] ss:$2 sm:$0xff] }
  0x16   :  { %v226_v28 = vpack.c.bf16 %v221_v26, %v219_v25  ;;  %v223_v31 = vld [vmem:[#allocation2 + $0x2a] ss:$2 sm:$0xff]  ;;  %v225_v32 = vld [vmem:[#allocation2 + $0x3a] ss:$2 sm:$0xff]  ;;  %v295_v34 = vld [vmem:[#allocation2 + $0x13] ss:$2 sm:$0xff] }
  0x17   :  { %1802 = vmatmul.mubr.msk.bf16.vlgmr.msra.gmra.mrb[0].mxu0 %vm70_vm2, %v98_v20  ;;  %v227_v35 = vpack.c.bf16 %v225_v32, %v223_v31  ;;  %v300_v36 = vpack.c.bf16 %v295_v34, %v293_v33  ;;  %v297_v39 = vld [vmem:[#allocation2 + $0x2b] ss:$2 sm:$0xff]  ;;  %v299_v40 = vld [vmem:[#allocation2 + $0x3b] ss:$2 sm:$0xff]  ;;  %v367_v41 = vld [vmem:[#allocation2 + $0x4] ss:$2 sm:$0xff] }
  0x18   :  { %1806 = vmatpush3.bf16.msra.mxu0 %v167_v21  ;;  %1807 = vmatprep.mubr.msk.bf16.mxu0 %vm70_vm2, %v86_v19  ;;  %v369_v42 = vld [vmem:[#allocation2 + $0x14] ss:$2 sm:$0xff]  ;;  %v301_v43 = vpack.c.bf16 %v299_v40, %v297_v39 }
  0x19   :  { %1969 = vmatprep.subr.msk.bf16.mxu0 %vm107_vm0, %v1714_v22  ;;  %v374_v44 = vpack.c.bf16 %v369_v42, %v367_v41  ;;  %v371_v46 = vld [vmem:[#allocation2 + $0x2c] ss:$2 sm:$0xff]  ;;  %v373_v47 = vld [vmem:[#allocation2 + $0x3c] ss:$2 sm:$0xff] }
  0x1a   :  { %v375_v48 = vpack.c.bf16 %v373_v47, %v371_v46 }
  0x23   :  { %1808 = vmatmul.mubr.msk.bf16.vlgmr.msra.gmra.mrb[0].mxu0 %vm70_vm2, %v87_v27 }
  0x24   :  { %1812 = vmatpush3.bf16.msra.mxu0 %v237_v29  ;;  %1813 = vmatprep.mubr.msk.bf16.mxu0 %vm70_vm2, %v226_v28 }
  0x25   :  { %1970 = vmatprep.subr.msk.bf16.mxu0 %vm107_vm0, %v1717_v30 }
  0x2f   :  { %1814 = vmatmul.mubr.msk.bf16.vlgmr.msra.gmra.mrb[0].mxu0 %vm70_vm2, %v227_v35 }
  0x30   :  { %1818 = vmatpush3.bf16.msra.mxu0 %v311_v37  ;;  %1819 = vmatprep.mubr.msk.bf16.mxu0 %vm70_vm2, %v300_v36 }
  0x31   :  { %1971 = vmatprep.subr.msk.bf16.mxu0 %vm107_vm0, %v1720_v38 }
  0x3b   :  { %1820 = vmatmul.mubr.msk.bf16.vlgmr.msra.gmra.mrb[0].mxu0 %vm70_vm2, %v301_v43 }
  0x3c   :  { %1824 = vmatpush3.bf16.msra.mxu0 %v385_v45  ;;  %1825 = vmatprep.mubr.msk.bf16.mxu0 %vm70_vm2, %v374_v44 }
  0x3d   :  { %1859 = vmatprep.subr.bf16.mxu0 %v1991_v3 }
  0x47   :  { %1826 = vmatmul.mubr.msk.bf16.vlgmr.msra.gmra.mrb[0].mxu0 %vm70_vm2, %v375_v48 }
  0x48   :  { %1861 = vmatprep.mubr.msk.bf16.mxu0 %vm1992_vm6, %v1991_v3 }
 0x11a   :  { %v1827_v50 = vpop.f32.mrb[0].mxu0 }
 0x11b   :  { %v2160_v51 = vadd.f32 %v1827_v50, %v1723_v49  ;;  %v421_v52 = vpop.f32.mrb[1].mxu0 }
 0x11c   :  { %v2162_v53 = vadd.f32 %v1723_v49, %v421_v52  ;;  %v1828_v54 = vpop.f32.mrb[2].mxu0 }
 0x11d   :  { %v2164_v55 = vadd.f32 %v1828_v54, %v1723_v49  ;;  %v424_v56 = vpop.f32.mrb[3].mxu0  ;;  %v462_v57 = vsel %vm455_vm3, %v2160_v51, 0.0  ;;  %v484_v4 = vmul.f32 %v2160_v51, %v2160_v51 }
 0x11e   :  { %v2168_v58 = vadd.f32 %v1723_v49, %v424_v56  ;;  %463 = vadd.xlane.f32.xlu1 %v462_v57  ;;  %v456_v59 = vsel %vm455_vm3, %v2162_v53, 0.0  ;;  %v482_v63 = vmul.f32 %v2162_v53, %v2162_v53 }
 0x11f   :  { %457 = vadd.xlane.f32.xlu0 %v456_v59  ;;  %v465_v60 = vsel %vm455_vm3, %v2164_v55, 0.0  ;;  %v485_v1 = vmul.f32 %v2164_v55, %v2164_v55  ;;  %v492_v6 = vsel %vm455_vm3, %v484_v4, 0.0 }
 0x120   :  { %v483_v61 = vmul.f32 %v2168_v58, %v2168_v58  ;;  %v459_v62 = vsel %vm455_vm3, %v2168_v58, 0.0  ;;  %v486_v2 = vsel %vm455_vm3, %v482_v63, 0.0  ;;  %v452_v63 = vld [vmem:[%s2449_s3 + $0x8] sm:$0xff] }
 0x121   :  { %v495_v5 = vsel %vm455_vm3, %v485_v1, 0.0 }
 0x122   :  { %466 = vadd.xlane.f32.xlu1 %v465_v60  ;;  %v489_v0 = vsel %vm455_vm3, %v483_v61, 0.0 }
 0x123   :  { %460 = vadd.xlane.f32.xlu0 %v459_v62  ;;  %v451_v62 = vld [vmem:[%s2449_s3] sm:$0xff] }
 0x126   :  { %490 = vadd.xlane.f32.xlu1 %v489_v0 }
 0x127   :  { %487 = vadd.xlane.f32.xlu0 %v486_v2  ;;  %v453_v2 = vld [vmem:[%s2450_s4] sm:$0xff] }
 0x12a   :  { %496 = vadd.xlane.f32.xlu1 %v495_v5 }
 0x12b   :  { %493 = vadd.xlane.f32.xlu0 %v492_v6 }
 0x1ab   :  { %v464_v9 = vpop.xlane.xlu1 %463 }
 0x1ac   :  { %v458_v10 = vpop.xlane.xlu0 %457 }
 0x1af   :  { %v467_v11 = vpop.xlane.xlu1 %466 }
 0x1b0   :  { %v475_v12 = vadd.f32 %v467_v11, %v464_v9  ;;  %v461_v13 = vpop.xlane.xlu0 %460 }
 0x1b1   :  { %v468_v14 = vadd.f32 %v461_v13, %v458_v10 }
 0x1b2   :  { %v476_v15 = vrot.slane %v475_v12, 4 }
 0x1b3   :  { %v469_v16 = vrot.slane %v468_v14, 4  ;;  %v491_v17 = vpop.xlane.xlu1 %490 }
 0x1b4   :  { %v477_v18 = vadd.f32 %v476_v15, %v475_v12  ;;  %v488_v19 = vpop.xlane.xlu0 %487 }
 0x1b5   :  { %v470_v20 = vadd.f32 %v469_v16, %v468_v14  ;;  %v498_v21 = vadd.f32 %v491_v17, %v488_v19 }
 0x1b6   :  { %v478_v22 = vrot.slane %v477_v18, 2 }
 0x1b7   :  { %v471_v23 = vrot.slane %v470_v20, 2  ;;  %v499_v24 = vrot.slane %v498_v21, 4  ;;  %v497_v25 = vpop.xlane.xlu1 %496 }
 0x1b8   :  { %v479_v26 = vadd.f32 %v478_v22, %v477_v18  ;;  %v494_v27 = vpop.xlane.xlu0 %493  ;;  %v565_v22 = vld [vmem:[%s2448_s5] sm:$0xf] }
 0x1b9   :  { %v472_v28 = vadd.f32 %v471_v23, %v470_v20  ;;  %v500_v29 = vadd.f32 %v499_v24, %v498_v21  ;;  %v505_v30 = vadd.f32 %v497_v25, %v494_v27 }
 0x1ba   :  { %v480_v34 = vrot.slane %v479_v26, 1 }
 0x1bb   :  { %v473_v31 = vrot.slane %v472_v28, 1  ;;  %v501_v32 = vrot.slane %v500_v29, 2  ;;  %v506_v33 = vrot.slane %v505_v30, 4 }
 0x1bc   :  { %v481_v41 = vadd.f32 %v480_v34, %v479_v26  ;;  %v625_v26 = vsel %vm576_vm5, %v565_v22, 0 }
 0x1bd   :  { %v474_v35 = vadd.f32 %v473_v31, %v472_v28  ;;  %v502_v36 = vadd.f32 %v501_v32, %v500_v29  ;;  %v507_v37 = vadd.f32 %v506_v33, %v505_v30  ;;  %v1727_v28 = vld [vmem:[%s2448_s5 + $0x8] sm:$0xf]  ;;  %v1729_v33 = vld [vmem:[%s2448_s5 + $0xc] sm:$0xf] }
 0x1be   :  { %v513_v46 = vmul.f32 0.0078125, %v481_v41  ;;  %v679_v31 = vsel %vm576_vm5, %v1727_v28, 0 }
 0x1bf   :  { %v512_v38 = vmul.f32 0.0078125, %v474_v35  ;;  %v503_v39 = vrot.slane %v502_v36, 1  ;;  %v508_v40 = vrot.slane %v507_v37, 2 }
 0x1c0   :  { %v517_v52 = vmul.f32 %v513_v46, %v513_v46  ;;  %v522_v5 = vsub.f32 %v2160_v51, %v513_v46  ;;  %v523_v6 = vsub.f32 %v2164_v55, %v513_v46 }
 0x1c1   :  { %v504_v42 = vadd.f32 %v503_v39, %v502_v36  ;;  %v509_v43 = vadd.f32 %v508_v40, %v507_v37  ;;  %v516_v44 = vmul.f32 %v512_v38, %v512_v38  ;;  %v520_v59 = vsub.f32 %v2162_v53, %v512_v38  ;;  %v454_v53 = vld [vmem:[%s2450_s4 + $0x8] sm:$0xff] }
 0x1c2   :  { %v521_v60 = vsub.f32 %v2168_v58, %v512_v38  ;;  %v735_v36 = vsel %vm576_vm5, %v1729_v33, 0  ;;  %v1731_v38 = vld [vmem:[%s2448_s5 + $0x10] sm:$0xf] }
 0x1c3   :  { %v514_v45 = vmul.f32 0.0078125, %v504_v42  ;;  %v510_v47 = vrot.slane %v509_v43, 1  ;;  %v791_v41 = vsel %vm576_vm5, %v1731_v38, 0 }
 0x1c5   :  { %v518_v48 = vsub.f32 %v514_v45, %v516_v44  ;;  %v511_v49 = vadd.f32 %v510_v47, %v509_v43 }
 0x1c7   :  { %v524_v50 = vadd.f32 1e-05, %v518_v48  ;;  %v515_v54 = vmul.f32 0.0078125, %v511_v49 }
 0x1c9   :  { %1975 = vrsqrt.f32 %v524_v50  ;;  %v519_v56 = vsub.f32 %v515_v54, %v517_v52 }
 0x1cb   :  { %v525_v57 = vadd.f32 1e-05, %v519_v56 }
 0x1cd   :  { %1977 = vrsqrt.f32 %v525_v57 }
 0x1d3   :  { %v1976_v61 = vpop.eup %1975 }
 0x1d4   :  { %v528_v0 = vmul.f32 %v1976_v61, %v520_v59  ;;  %v529_v1 = vmul.f32 %v1976_v61, %v521_v60 }
 0x1d6   :  { %v532_v58 = vmul.f32 %v528_v0, %v451_v62  ;;  %v533_v4 = vmul.f32 %v529_v1, %v452_v63 }
 0x1d7   :  { %v1978_v7 = vpop.eup %1977 }
 0x1d8   :  { %v536_v8 = vadd.f32 %v532_v58, %v453_v2  ;;  %v537_v9 = vadd.f32 %v533_v4, %v454_v53  ;;  %v530_v10 = vmul.f32 %v1978_v7, %v522_v5  ;;  %v531_v11 = vmul.f32 %v1978_v7, %v523_v6  ;;  %v1733_v7 = vld [vmem:[%s2451_s6] ss:$0 sm:$0xff] }
 0x1da   :  { %vm540_vm7 = vcmp.ge.f32.partialorder %v536_v8, 0.0  ;;  %vm541_vm8 = vcmp.ge.f32.partialorder %v537_v9, 0.0  ;;  %v544_v12 = vmul.f32 0.2, %v536_v8  ;;  %v545_v13 = vmul.f32 0.2, %v537_v9 }
 0x1db   :  { %v534_v14 = vmul.f32 %v530_v10, %v451_v62  ;;  %v535_v15 = vmul.f32 %v531_v11, %v452_v63 }
 0x1dc   :  { %v548_v16 = vsel %vm540_vm7, %v536_v8, %v544_v12  ;;  %v549_v17 = vsel %vm541_vm8, %v537_v9, %v545_v13 }
 0x1dd   :  { %557 = vst.msk [vmem:[#allocation3 + $0x2] sm:$0xff] %vm455_vm3, %v548_v16  ;;  %558 = vst.msk [vmem:[#allocation3 + $0xa] sm:$0xff] %vm455_vm3, %v549_v17  ;;  %v538_v51 = vadd.f32 %v534_v14, %v453_v2  ;;  %v539_v18 = vadd.f32 %v535_v15, %v454_v53 }
 0x1df   :  { %vm542_vm9 = vcmp.ge.f32.partialorder %v538_v51, 0.0  ;;  %vm543_vm10 = vcmp.ge.f32.partialorder %v539_v18, 0.0  ;;  %v546_v55 = vmul.f32 0.2, %v538_v51  ;;  %v547_v19 = vmul.f32 0.2, %v539_v18 }
 0x1e1   :  { %v550_v20 = vsel %vm542_vm9, %v538_v51, %v546_v55  ;;  %v551_v21 = vsel %vm543_vm10, %v539_v18, %v547_v19  ;;  %v1734_v19 = vld [vmem:[%s2452_s9 + $0x4] sm:$0xf] }
 0x1e2   :  { %559 = vst.msk [vmem:[#allocation3 + $0x1a] sm:$0xff] %vm455_vm3, %v550_v20  ;;  %560 = vst.msk [vmem:[#allocation3 + $0x22] sm:$0xff] %vm455_vm3, %v551_v21  ;;  %v941_v20 = vsel %vm576_vm5, %v1734_v19, 0 }
 0x1e3   :  { %1860 = vmatpush3.bf16.msra.mxu0 %v941_v20 }
 0x1e4   :  { %v567_v23 = vld [vmem:[#allocation3 + $0x1] ss:$2 sm:$0xff]  ;;  %v561_v29 = vld [vmem:[#allocation3] ss:$2 sm:$0xff]  ;;  %1865 = vmatprep.subr.bf16.mxu0 %v1991_v3 }
 0x1e5   :  { %v669_v34 = vld [vmem:[#allocation3 + $0x2] ss:$2 sm:$0xff]  ;;  %v725_v39 = vld [vmem:[#allocation3 + $0x3] ss:$2 sm:$0xff] }
 0x1e6   :  { %v781_v43 = vld [vmem:[#allocation3 + $0x4] ss:$2 sm:$0xff] }
 0x1e9   :  { %v569_v24 = vld [vmem:[#allocation3 + $0x19] ss:$2 sm:$0xff]  ;;  %v563_v27 = vld [vmem:[#allocation3 + $0x18] ss:$2 sm:$0xff] }
 0x1ea   :  { %v570_v25 = vpack.c.bf16 %v569_v24, %v567_v23  ;;  %v564_v30 = vpack.c.bf16 %v563_v27, %v561_v29  ;;  %v671_v32 = vld [vmem:[#allocation3 + $0x1a] ss:$2 sm:$0xff]  ;;  %v727_v37 = vld [vmem:[#allocation3 + $0x1b] ss:$2 sm:$0xff] }
 0x1eb   :  { %v672_v35 = vpack.c.bf16 %v671_v32, %v669_v34  ;;  %v728_v40 = vpack.c.bf16 %v727_v37, %v725_v39  ;;  %v783_v42 = vld [vmem:[#allocation3 + $0x1c] ss:$2 sm:$0xff] }
 0x1ec   :  { %1832 = vmatmul.mubr.msk.bf16.vlgmr.msra.gmra.mrb[0].mxu1 %vm455_vm3, %v570_v25  ;;  %v784_v44 = vpack.c.bf16 %v783_v42, %v781_v43 }
 0x1ed   :  { %1836 = vmatpush3.bf16.msra.mxu1 %v625_v26  ;;  %1837 = vmatprep.mubr.msk.bf16.mxu1 %vm1992_vm6, %v1991_v3 }
 0x1ee   :  { %1841 = vmatprep.subr.bf16.mxu1 %v1991_v3 }
 0x1f4   :  { %1838 = vmatmul.mubr.msk.bf16.vlgmr.msra.gmra.mrb[4].mxu1 %vm455_vm3, %v564_v30 }
 0x1f5   :  { %1842 = vmatpush3.bf16.msra.mxu1 %v679_v31  ;;  %1843 = vmatprep.mubr.msk.bf16.mxu1 %vm1992_vm6, %v1991_v3 }
 0x1f6   :  { %1847 = vmatprep.subr.bf16.mxu1 %v1991_v3 }
 0x1fc   :  { %1844 = vmatmul.mubr.msk.bf16.vlgmr.msra.gmra.mrb[8].mxu1 %vm455_vm3, %v672_v35 }
 0x1fd   :  { %1848 = vmatpush3.bf16.msra.mxu1 %v735_v36  ;;  %1849 = vmatprep.mubr.msk.bf16.mxu1 %vm1992_vm6, %v1991_v3 }
 0x1fe   :  { %1853 = vmatprep.subr.bf16.mxu1 %v1991_v3 }
 0x204   :  { %1850 = vmatmul.mubr.msk.bf16.vlgmr.msra.gmra.mrb[12].mxu1 %vm455_vm3, %v728_v40 }
 0x205   :  { %1854 = vmatpush3.bf16.msra.mxu1 %v791_v41  ;;  %1855 = vmatprep.mubr.msk.bf16.mxu1 %vm1992_vm6, %v1991_v3 }
 0x206   :  { %1889 = vmatprep.subr.bf16.mxu1 %v1991_v3 }
 0x20c   :  { %1856 = vmatmul.mubr.msk.bf16.vlgmr.msra.gmra.mrb[16].mxu1 %vm455_vm3, %v784_v44 }
 0x20d   :  { %1891 = vmatprep.mubr.msk.bf16.mxu1 %vm1992_vm6, %v1991_v3 }
 0x2bf   :  { %v614_v45 = vpop.f32.mrb[0].mxu1 }
 0x2c0   :  { %v1833_v46 = vpop.f32.mrb[1].mxu1 }
 0x2c1   :  { %v617_v47 = vpop.f32.mrb[2].mxu1 }
 0x2c2   :  { %v1834_v48 = vpop.f32.mrb[3].mxu1 }
 0x2c7   :  { %v661_v49 = vpop.f32.mrb[4].mxu1 }
 0x2c8   :  { %v662_v50 = vadd.f32 %v661_v49, %v614_v45  ;;  %v1839_v52 = vpop.f32.mrb[5].mxu1 }
 0x2c9   :  { %v664_v54 = vpop.f32.mrb[6].mxu1 }
 0x2ca   :  { %v665_v56 = vadd.f32 %v664_v54, %v617_v47  ;;  %v1840_v57 = vpop.f32.mrb[7].mxu1 }
 0x2cf   :  { %v715_v59 = vpop.f32.mrb[8].mxu1 }
 0x2d0   :  { %v722_v60 = vadd.f32 %v715_v59, %v662_v50  ;;  %v1845_v61 = vpop.f32.mrb[9].mxu1 }
 0x2d1   :  { %v718_v62 = vpop.f32.mrb[10].mxu1 }
 0x2d2   :  { %v723_v63 = vadd.f32 %v718_v62, %v665_v56  ;;  %v1846_v0 = vpop.f32.mrb[11].mxu1 }
 0x2d7   :  { %v771_v1 = vpop.f32.mrb[12].mxu1 }
 0x2d8   :  { %v778_v2 = vadd.f32 %v771_v1, %v722_v60  ;;  %v1851_v53 = vpop.f32.mrb[13].mxu1  ;;  %v845_v1 = vld [vmem:[%s2453_s7] sm:$0xff] }
 0x2d9   :  { %v774_v58 = vpop.f32.mrb[14].mxu1 }
 0x2da   :  { %v779_v4 = vadd.f32 %v774_v58, %v723_v63  ;;  %v1852_v5 = vpop.f32.mrb[15].mxu1  ;;  %v846_v58 = vld [vmem:[%s2454_s8] sm:$0xff] }
 0x2df   :  { %v827_v6 = vpop.f32.mrb[16].mxu1 }
 0x2e0   :  { %v834_v8 = vadd.f32 %v827_v6, %v778_v2  ;;  %v1857_v9 = vpop.f32.mrb[17].mxu1 }
 0x2e1   :  { %v830_v10 = vpop.f32.mrb[18].mxu1 }
 0x2e2   :  { %v2279_v11 = vadd.f32 %v1733_v7, %v834_v8  ;;  %v835_v12 = vadd.f32 %v830_v10, %v779_v4  ;;  %v1858_v13 = vpop.f32.mrb[19].mxu1 }
 0x2e4   :  { %v2281_v14 = vadd.f32 %v1733_v7, %v835_v12  ;;  %v847_v15 = vsel %vm455_vm3, %v2279_v11, 0.0  ;;  %v865_v16 = vmul.f32 %v2279_v11, %v2279_v11 }
 0x2e5   :  { %848 = vadd.xlane.f32.xlu0 %v847_v15 }
 0x2e6   :  { %v850_v17 = vsel %vm455_vm3, %v2281_v14, 0.0  ;;  %v866_v51 = vmul.f32 %v2281_v14, %v2281_v14  ;;  %v867_v18 = vsel %vm455_vm3, %v865_v16, 0.0 }
 0x2e7   :  { %851 = vadd.xlane.f32.xlu1 %v850_v17 }
 0x2e8   :  { %v870_v55 = vsel %vm455_vm3, %v866_v51, 0.0 }
 0x2e9   :  { %868 = vadd.xlane.f32.xlu0 %v867_v18 }
 0x2eb   :  { %871 = vadd.xlane.f32.xlu1 %v870_v55 }
 0x372   :  { %v849_v21 = vpop.xlane.xlu0 %848 }
 0x373   :  { %v853_v22 = vrot.slane %v849_v21, 4 }
 0x374   :  { %v852_v23 = vpop.xlane.xlu1 %851 }
 0x375   :  { %v854_v24 = vadd.f32 %v853_v22, %v849_v21  ;;  %v859_v25 = vrot.slane %v852_v23, 4  ;;  %v1737_v21 = vld [vmem:[%s2452_s9 + $0x8] sm:$0xf] }
 0x376   :  { %v869_v26 = vpop.xlane.xlu0 %868 }
 0x377   :  { %v855_v27 = vrot.slane %v854_v24, 2  ;;  %v860_v28 = vadd.f32 %v859_v25, %v852_v23  ;;  %v873_v29 = vrot.slane %v869_v26, 4  ;;  %v1044_v23 = vsel %vm576_vm5, %v1737_v21, 0 }
 0x378   :  { %v872_v30 = vpop.xlane.xlu1 %871 }
 0x379   :  { %v856_v31 = vadd.f32 %v855_v27, %v854_v24  ;;  %v861_v32 = vrot.slane %v860_v28, 2  ;;  %v874_v33 = vadd.f32 %v873_v29, %v869_v26  ;;  %v879_v34 = vrot.slane %v872_v30, 4  ;;  %v1739_v27 = vld [vmem:[%s2452_s9 + $0xc] sm:$0xf] }
 0x37a   :  { %v1102_v29 = vsel %vm576_vm5, %v1739_v27, 0 }
 0x37b   :  { %v857_v35 = vrot.slane %v856_v31, 1  ;;  %v862_v36 = vadd.f32 %v861_v32, %v860_v28  ;;  %v875_v37 = vrot.slane %v874_v33, 2  ;;  %v880_v38 = vadd.f32 %v879_v34, %v872_v30 }
 0x37d   :  { %v858_v39 = vadd.f32 %v857_v35, %v856_v31  ;;  %v863_v40 = vrot.slane %v862_v36, 1  ;;  %v876_v41 = vadd.f32 %v875_v37, %v874_v33  ;;  %v881_v42 = vrot.slane %v880_v38, 2  ;;  %v1741_v33 = vld [vmem:[%s2452_s9 + $0x10] sm:$0xf] }
 0x37e   :  { %v1160_v35 = vsel %vm576_vm5, %v1741_v33, 0 }
 0x37f   :  { %v885_v43 = vmul.f32 0.015625, %v858_v39  ;;  %v864_v44 = vadd.f32 %v863_v40, %v862_v36  ;;  %v877_v45 = vrot.slane %v876_v41, 1  ;;  %v882_v46 = vadd.f32 %v881_v42, %v880_v38  ;;  %v1743_v40 = vld [vmem:[%s2455_s10] ss:$0 sm:$0xff] }
 0x381   :  { %v878_v47 = vadd.f32 %v877_v45, %v876_v41  ;;  %v886_v48 = vmul.f32 0.015625, %v864_v44  ;;  %v883_v49 = vrot.slane %v882_v46, 1  ;;  %v889_v50 = vmul.f32 %v885_v43, %v885_v43 }
 0x382   :  { %v893_v63 = vsub.f32 %v2279_v11, %v885_v43 }
 0x383   :  { %v887_v52 = vmul.f32 0.015625, %v878_v47  ;;  %v884_v54 = vadd.f32 %v883_v49, %v882_v46  ;;  %v890_v57 = vmul.f32 %v886_v48, %v886_v48  ;;  %v894_v53 = vsub.f32 %v2281_v14, %v886_v48  ;;  %v925_v14 = vld [vmem:[%s2452_s9] sm:$0xf] }
 0x384   :  { %v987_v18 = vsel %vm576_vm5, %v925_v14, 0 }
 0x385   :  { %v891_v56 = vsub.f32 %v887_v52, %v889_v50  ;;  %v888_v59 = vmul.f32 0.015625, %v884_v54 }
 0x387   :  { %v895_v60 = vadd.f32 1e-05, %v891_v56  ;;  %v892_v61 = vsub.f32 %v888_v59, %v890_v57  ;;  %v1744_v57 = vld [vmem:[%s2456_s13 + $0x4] sm:$0xf] }
 0x388   :  { %v1330_v59 = vsel %vm576_vm5, %v1744_v57, 0 }
 0x389   :  { %1979 = vrsqrt.f32 %v895_v60  ;;  %v896_v62 = vadd.f32 1e-05, %v892_v61  ;;  %1890 = vmatpush3.bf16.msra.mxu1 %v1330_v59 }
 0x38a   :  { %1895 = vmatprep.subr.bf16.mxu1 %v1991_v3 }
 0x38b   :  { %1981 = vrsqrt.f32 %v896_v62 }
 0x393   :  { %v1980_v0 = vpop.eup %1979 }
 0x394   :  { %v899_v2 = vmul.f32 %v1980_v0, %v893_v63 }
 0x395   :  { %v1982_v4 = vpop.eup %1981 }
 0x396   :  { %v901_v5 = vmul.f32 %v899_v2, %v845_v1  ;;  %v900_v6 = vmul.f32 %v1982_v4, %v894_v53 }
 0x398   :  { %v903_v7 = vadd.f32 %v901_v5, %v846_v58  ;;  %v902_v8 = vmul.f32 %v900_v6, %v845_v1 }
 0x39a   :  { %vm905_vm11 = vcmp.ge.f32.partialorder %v903_v7, 0.0  ;;  %v907_v9 = vmul.f32 0.2, %v903_v7  ;;  %v904_v10 = vadd.f32 %v902_v8, %v846_v58 }
 0x39c   :  { %v909_v11 = vsel %vm905_vm11, %v903_v7, %v907_v9  ;;  %vm906_vm12 = vcmp.ge.f32.partialorder %v904_v10, 0.0  ;;  %v908_v12 = vmul.f32 0.2, %v904_v10 }
 0x39d   :  { %915 = vst.msk [vmem:[#allocation4 + $0x2] sm:$0xff] %vm455_vm3, %v909_v11 }
 0x39e   :  { %v910_v13 = vsel %vm906_vm12, %v904_v10, %v908_v12 }
 0x39f   :  { %916 = vst.msk [vmem:[#allocation4 + $0x12] sm:$0xff] %vm455_vm3, %v910_v13 }
 0x3a4   :  { %v927_v15 = vld [vmem:[#allocation4 + $0x1] ss:$2 sm:$0xf]  ;;  %v917_v19 = vld [vmem:[#allocation4] ss:$2 sm:$0xf] }
 0x3a5   :  { %v1030_v25 = vld [vmem:[#allocation4 + $0x2] ss:$2 sm:$0xf]  ;;  %v1088_v31 = vld [vmem:[#allocation4 + $0x3] ss:$2 sm:$0xf] }
 0x3a6   :  { %v929_v16 = vld [vmem:[#allocation4 + $0x11] ss:$2 sm:$0xf]  ;;  %v919_v55 = vld [vmem:[#allocation4 + $0x10] ss:$2 sm:$0xf] }
 0x3a7   :  { %v932_v17 = vcombine.low %v927_v15, %v929_v16  ;;  %v922_v20 = vcombine.low %v917_v19, %v919_v55  ;;  %v1032_v24 = vld [vmem:[#allocation4 + $0x12] ss:$2 sm:$0xf]  ;;  %v1090_v30 = vld [vmem:[#allocation4 + $0x13] ss:$2 sm:$0xf] }
 0x3a8   :  { %v1035_v26 = vcombine.low %v1030_v25, %v1032_v24  ;;  %v1093_v32 = vcombine.low %v1088_v31, %v1090_v30  ;;  %v1148_v36 = vld [vmem:[#allocation4 + $0x14] ss:$2 sm:$0xf]  ;;  %v1146_v37 = vld [vmem:[#allocation4 + $0x4] ss:$2 sm:$0xf] }
 0x3a9   :  { %v934_v51 = vpack.c.bf16 %v932_v17, %v932_v17  ;;  %v924_v22 = vpack.c.bf16 %v922_v20, %v922_v20  ;;  %v1151_v38 = vcombine.low %v1146_v37, %v1148_v36  ;;  %v1215_v37 = vld [vmem:[%s2457_s11] sm:$0xf] }
 0x3aa   :  { %v1037_v28 = vpack.c.bf16 %v1035_v26, %v1035_v26  ;;  %v1095_v34 = vpack.c.bf16 %v1093_v32, %v1093_v32 }
 0x3ab   :  { %1862 = vmatmul.mubr.msk.bf16.vlgmr.msra.gmra.mrb[4].mxu0 %vm455_vm3, %v934_v51  ;;  %v1153_v39 = vpack.c.bf16 %v1151_v38, %v1151_v38 }
 0x3ac   :  { %1866 = vmatpush3.bf16.msra.mxu0 %v987_v18  ;;  %1867 = vmatprep.mubr.msk.bf16.mxu0 %vm1992_vm6, %v1991_v3 }
 0x3ad   :  { %1871 = vmatprep.subr.bf16.mxu0 %v1991_v3 }
 0x3b7   :  { %1868 = vmatmul.mubr.msk.bf16.vlgmr.msra.gmra.mrb[4].mxu0 %vm455_vm3, %v924_v22 }
 0x3b8   :  { %1872 = vmatpush3.bf16.msra.mxu0 %v1044_v23  ;;  %1873 = vmatprep.mubr.msk.bf16.mxu0 %vm1992_vm6, %v1991_v3 }
 0x3b9   :  { %1877 = vmatprep.subr.bf16.mxu0 %v1991_v3 }
 0x3c3   :  { %1874 = vmatmul.mubr.msk.bf16.vlgmr.msra.gmra.mrb[4].mxu0 %vm455_vm3, %v1037_v28 }
 0x3c4   :  { %1878 = vmatpush3.bf16.msra.mxu0 %v1102_v29  ;;  %1879 = vmatprep.mubr.msk.bf16.mxu0 %vm1992_vm6, %v1991_v3 }
 0x3c5   :  { %1883 = vmatprep.subr.bf16.mxu0 %v1991_v3 }
 0x3cf   :  { %1880 = vmatmul.mubr.msk.bf16.vlgmr.msra.gmra.mrb[4].mxu0 %vm455_vm3, %v1095_v34 }
 0x3d0   :  { %1884 = vmatpush3.bf16.msra.mxu0 %v1160_v35  ;;  %1885 = vmatprep.mubr.msk.bf16.mxu0 %vm1992_vm6, %v1991_v3 }
 0x3db   :  { %1886 = vmatmul.mubr.msk.bf16.vlgmr.msra.gmra.mrb[4].mxu0 %vm455_vm3, %v1153_v39 }
 0x4ae   :  { %v1196_v41 = vpop.f32.mrb[4].mxu0 }
 0x4af   :  { %v1204_v42 = vcombine.high %v1196_v41, %v1196_v41  ;;  %v2343_v43 = vadd.f32 %v1743_v40, %v1196_v41  ;;  %v1887_v44 = vpop.f32.mrb[5].mxu0 }
 0x4b0   :  { %v1199_v45 = vpop.f32.mrb[6].mxu0 }
 0x4b1   :  { %v2345_v46 = vadd.f32 %v1743_v40, %v1204_v42  ;;  %v1888_v47 = vpop.f32.mrb[7].mxu0  ;;  %v1218_v48 = vsel %vm1217_vm13, %v2343_v43, 0.0  ;;  %v1238_v49 = vmul.f32 %v2343_v43, %v2343_v43  ;;  %v1216_v40 = vld [vmem:[%s2458_s12] sm:$0xf] }
 0x4b2   :  { %1219 = vadd.xlane.f32.xlu0 %v1218_v48 }
 0x4b3   :  { %v1221_v50 = vsel %vm1217_vm13, %v2345_v46, 0.0  ;;  %v1239_v52 = vmul.f32 %v2345_v46, %v2345_v46  ;;  %v1240_v54 = vsel %vm1217_vm13, %v1238_v49, 0.0 }
 0x4b4   :  { %1222 = vadd.xlane.f32.xlu1 %v1221_v50 }
 0x4b5   :  { %v1243_v56 = vsel %vm1217_vm13, %v1239_v52, 0.0  ;;  %v1993_v52 = vmov 1983009808  }
 0x4b6   :  { %1241 = vadd.xlane.f32.xlu0 %v1240_v54  ;;  %v1299_v54 = vunpack.c.l.s4 %v1993_v52 }
 0x4b8   :  { %1244 = vadd.xlane.f32.xlu1 %v1243_v56  ;;  %v1300_v57 = vunpack.c.0.s8 %v1299_v54 }
 0x53f   :  { %v1220_v60 = vpop.xlane.xlu0 %1219 }
 0x540   :  { %v1224_v61 = vsel %vm576_vm5, %v1220_v60, 0.0 }
 0x541   :  { %v1225_v62 = vrot.slane %v1224_v61, 4  ;;  %v1223_v63 = vpop.xlane.xlu1 %1222 }
 0x542   :  { %v1231_v0 = vsel %vm576_vm5, %v1223_v63, 0.0 }
 0x543   :  { %v1226_v1 = vadd.f32 %v1225_v62, %v1224_v61  ;;  %v1232_v2 = vrot.slane %v1231_v0, 4  ;;  %v1242_v53 = vpop.xlane.xlu0 %1241 }
 0x544   :  { %v1246_v58 = vsel %vm576_vm5, %v1242_v53, 0.0 }
 0x545   :  { %v1227_v4 = vrot.slane %v1226_v1, 2  ;;  %v1233_v5 = vadd.f32 %v1232_v2, %v1231_v0  ;;  %v1247_v6 = vrot.slane %v1246_v58, 4  ;;  %v1245_v7 = vpop.xlane.xlu1 %1244  ;;  %v1307_v0 = vld [vmem:[%s2456_s13] sm:$0xf] }
 0x546   :  { %v1253_v8 = vsel %vm576_vm5, %v1245_v7, 0.0  ;;  %v1376_v53 = vsel %vm576_vm5, %v1307_v0, 0  ;;  %v1747_v7 = vld [vmem:[%s2456_s13 + $0x8] sm:$0xf] }
 0x547   :  { %v1228_v9 = vadd.f32 %v1227_v4, %v1226_v1  ;;  %v1234_v10 = vrot.slane %v1233_v5, 2  ;;  %v1248_v11 = vadd.f32 %v1247_v6, %v1246_v58  ;;  %v1254_v12 = vrot.slane %v1253_v8, 4 }
 0x549   :  { %v1229_v13 = vrot.slane %v1228_v9, 1  ;;  %v1235_v14 = vadd.f32 %v1234_v10, %v1233_v5  ;;  %v1249_v15 = vrot.slane %v1248_v11, 2  ;;  %v1255_v16 = vadd.f32 %v1254_v12, %v1253_v8 }
 0x54b   :  { %v1230_v17 = vadd.f32 %v1229_v13, %v1228_v9  ;;  %v1236_v51 = vrot.slane %v1235_v14, 1  ;;  %v1250_v18 = vadd.f32 %v1249_v15, %v1248_v11  ;;  %v1256_v55 = vrot.slane %v1255_v16, 2 }
 0x54c   :  { %v1440_v9 = vsel %vm576_vm5, %v1747_v7, 0 }
 0x54d   :  { %v1260_v19 = vmul.f32 0.03125, %v1230_v17  ;;  %v1237_v20 = vadd.f32 %v1236_v51, %v1235_v14  ;;  %v1251_v21 = vrot.slane %v1250_v18, 1  ;;  %v1257_v22 = vadd.f32 %v1256_v55, %v1255_v16  ;;  %v1749_v14 = vld [vmem:[%s2456_s13 + $0xc] sm:$0xf] }
 0x54e   :  { %v1505_v16 = vsel %vm576_vm5, %v1749_v14, 0 }
 0x54f   :  { %v1252_v23 = vadd.f32 %v1251_v21, %v1250_v18  ;;  %v1261_v24 = vmul.f32 0.03125, %v1237_v20  ;;  %v1258_v25 = vrot.slane %v1257_v22, 1  ;;  %v1264_v26 = vmul.f32 %v1260_v19, %v1260_v19 }
 0x550   :  { %v1268_v35 = vsub.f32 %v2343_v43, %v1260_v19  ;;  %v1751_v19 = vld [vmem:[%s2456_s13 + $0x10] sm:$0xf] }
 0x551   :  { %v1262_v27 = vmul.f32 0.03125, %v1252_v23  ;;  %v1259_v28 = vadd.f32 %v1258_v25, %v1257_v22  ;;  %v1265_v30 = vmul.f32 %v1261_v24, %v1261_v24  ;;  %v1269_v39 = vsub.f32 %v2345_v46, %v1261_v24 }
 0x552   :  { %v1301_v46 = vlaneseq  ;;  %v1570_v21 = vsel %vm576_vm5, %v1751_v19, 0 }
 0x553   :  { %v1266_v29 = vsub.f32 %v1262_v27, %v1264_v26  ;;  %v1263_v31 = vmul.f32 0.03125, %v1259_v28  ;;  %v1753_v28 = vld [vmem:[%s2459_s14] ss:$0 sm:$0xff] }
 0x554   :  { %v1302_v59 = vshrl.u32 %v1301_v46, 7 }
 0x555   :  { %v1270_v32 = vadd.f32 1e-05, %v1266_v29  ;;  %v1267_v33 = vsub.f32 %v1263_v31, %v1265_v30 }
 0x556   :  { %v1303_v60 = vsub.s32 %v1300_v57, %v1302_v59 }
 0x557   :  { %1983 = vrsqrt.f32 %v1270_v32  ;;  %v1271_v34 = vadd.f32 1e-05, %v1267_v33 }
 0x559   :  { %1985 = vrsqrt.f32 %v1271_v34 }
 0x561   :  { %v1984_v36 = vpop.eup %1983 }
 0x562   :  { %v1274_v38 = vmul.f32 %v1984_v36, %v1268_v35 }
 0x563   :  { %v1986_v41 = vpop.eup %1985 }
 0x564   :  { %v1276_v42 = vmul.f32 %v1274_v38, %v1215_v37  ;;  %v1275_v44 = vmul.f32 %v1986_v41, %v1269_v39 }
 0x566   :  { %v1278_v45 = vadd.f32 %v1276_v42, %v1216_v40  ;;  %v1277_v47 = vmul.f32 %v1275_v44, %v1215_v37 }
 0x568   :  { %vm1280_vm14 = vcmp.ge.f32.partialorder %v1278_v45, 0.0  ;;  %v1282_v48 = vmul.f32 0.2, %v1278_v45  ;;  %v1279_v43 = vadd.f32 %v1277_v47, %v1216_v40 }
 0x56a   :  { %v1284_v49 = vsel %vm1280_vm14, %v1278_v45, %v1282_v48  ;;  %vm1281_vm15 = vcmp.ge.f32.partialorder %v1279_v43, 0.0  ;;  %v1283_v50 = vmul.f32 0.2, %v1279_v43 }
 0x56b   :  { %1290 = vst.msk [vmem:[#allocation5 + $0x2] sm:$0xf] %vm1217_vm13, %v1284_v49 }
 0x56c   :  { %v1285_v56 = vsel %vm1281_vm15, %v1279_v43, %v1283_v50 }
 0x56d   :  { %1291 = vst.msk [vmem:[#allocation5 + $0xa] sm:$0xf] %vm1217_vm13, %v1285_v56 }
 0x572   :  { %v1309_v61 = vld [vmem:[#allocation5 + $0x1] ss:$2 sm:$0x3]  ;;  %v1292_v4 = vld [vmem:[#allocation5] ss:$2 sm:$0x3] }
 0x573   :  { %v1419_v11 = vld [vmem:[#allocation5 + $0x2] ss:$2 sm:$0x3]  ;;  %v1484_v51 = vld [vmem:[#allocation5 + $0x3] ss:$2 sm:$0x3] }
 0x574   :  { %v1311_v62 = vld [vmem:[#allocation5 + $0x9] ss:$2 sm:$0x3]  ;;  %v1294_v58 = vld [vmem:[#allocation5 + $0x8] ss:$2 sm:$0x3] }
 0x575   :  { %v1314_v63 = vcombine.low %v1309_v61, %v1311_v62  ;;  %v1297_v5 = vcombine.low %v1292_v4, %v1294_v58  ;;  %v1421_v10 = vld [vmem:[#allocation5 + $0xa] ss:$2 sm:$0x3]  ;;  %v1486_v17 = vld [vmem:[#allocation5 + $0xb] ss:$2 sm:$0x3] }
 0x576   :  { %v1424_v12 = vcombine.low %v1419_v11, %v1421_v10  ;;  %v1489_v18 = vcombine.low %v1484_v51, %v1486_v17  ;;  %v1551_v22 = vld [vmem:[#allocation5 + $0xc] ss:$2 sm:$0x3]  ;;  %v1549_v23 = vld [vmem:[#allocation5 + $0x4] ss:$2 sm:$0x3] }
 0x577   :  { %v1321_v1 = vrot.slane %v1314_v63, %v1303_v60  ;;  %v1304_v6 = vrot.slane %v1297_v5, %v1303_v60  ;;  %v1554_v24 = vcombine.low %v1549_v23, %v1551_v22  ;;  %v1633_v22 = vld [vmem:[%s2460_s15] sm:$0x3] }
 0x578   :  { %v1431_v13 = vrot.slane %v1424_v12, %v1303_v60  ;;  %v1496_v55 = vrot.slane %v1489_v18, %v1303_v60 }
 0x579   :  { %v1323_v2 = vpack.c.bf16 %v1321_v1, %v1321_v1  ;;  %v1306_v8 = vpack.c.bf16 %v1304_v6, %v1304_v6  ;;  %v1561_v25 = vrot.slane %v1554_v24, %v1303_v60 }
 0x57a   :  { %v1433_v15 = vpack.c.bf16 %v1431_v13, %v1431_v13  ;;  %v1498_v20 = vpack.c.bf16 %v1496_v55, %v1496_v55 }
 0x57b   :  { %1892 = vmatmul.mubr.msk.bf16.vlgmr.msra.gmra.mrb[20].mxu1 %vm455_vm3, %v1323_v2  ;;  %v1563_v26 = vpack.c.bf16 %v1561_v25, %v1561_v25  ;;  %v1634_v25 = vld [vmem:[%s2461_s16] sm:$0x3] }
 0x57c   :  { %1896 = vmatpush3.bf16.msra.mxu1 %v1376_v53  ;;  %1897 = vmatprep.mubr.msk.bf16.mxu1 %vm1992_vm6, %v1991_v3 }
 0x57d   :  { %1901 = vmatprep.subr.bf16.mxu1 %v1991_v3 }
 0x587   :  { %1898 = vmatmul.mubr.msk.bf16.vlgmr.msra.gmra.mrb[20].mxu1 %vm455_vm3, %v1306_v8 }
 0x588   :  { %1902 = vmatpush3.bf16.msra.mxu1 %v1440_v9  ;;  %1903 = vmatprep.mubr.msk.bf16.mxu1 %vm1992_vm6, %v1991_v3 }
 0x589   :  { %1907 = vmatprep.subr.bf16.mxu1 %v1991_v3 }
 0x593   :  { %1904 = vmatmul.mubr.msk.bf16.vlgmr.msra.gmra.mrb[20].mxu1 %vm455_vm3, %v1433_v15 }
 0x594   :  { %1908 = vmatpush3.bf16.msra.mxu1 %v1505_v16  ;;  %1909 = vmatprep.mubr.msk.bf16.mxu1 %vm1992_vm6, %v1991_v3 }
 0x595   :  { %1913 = vmatprep.subr.bf16.mxu1 %v1991_v3 }
 0x59f   :  { %1910 = vmatmul.mubr.msk.bf16.vlgmr.msra.gmra.mrb[20].mxu1 %vm455_vm3, %v1498_v20 }
 0x5a0   :  { %1914 = vmatpush3.bf16.msra.mxu1 %v1570_v21  ;;  %1915 = vmatprep.mubr.msk.bf16.mxu1 %vm1992_vm6, %v1991_v3 }
 0x5ab   :  { %1916 = vmatmul.mubr.msk.bf16.vlgmr.msra.gmra.mrb[20].mxu1 %vm455_vm3, %v1563_v26 }
 0x67e   :  { %v1606_v27 = vpop.f32.mrb[20].mxu1 }
 0x67f   :  { %v1620_v29 = vrot.slane %v1606_v27, %v1303_v60  ;;  %v1917_v30 = vpop.f32.mrb[21].mxu1 }
 0x680   :  { %v1609_v31 = vpop.f32.mrb[22].mxu1 }
 0x681   :  { %v1621_v32 = vcombine.high %v1620_v29, %v1620_v29  ;;  %v2411_v33 = vadd.f32 %v1753_v28, %v1620_v29  ;;  %v1918_v34 = vpop.f32.mrb[23].mxu1 }
 0x683   :  { %v2413_v35 = vadd.f32 %v1753_v28, %v1621_v32  ;;  %v1635_v3 = vsel %vm552_vm4, %v2411_v33, 0.0  ;;  %v1655_v36 = vmul.f32 %v2411_v33, %v2411_v33 }
 0x684   :  { %1636 = vadd.xlane.f32.xlu0 %v1635_v3 }
 0x685   :  { %v1638_v37 = vsel %vm552_vm4, %v2413_v35, 0.0  ;;  %v1656_v38 = vmul.f32 %v2413_v35, %v2413_v35  ;;  %v1657_v39 = vsel %vm552_vm4, %v1655_v36, 0.0 }
 0x686   :  { %1639 = vadd.xlane.f32.xlu1 %v1638_v37 }
 0x687   :  { %v1660_v40 = vsel %vm552_vm4, %v1656_v38, 0.0 }
 0x688   :  { %1658 = vadd.xlane.f32.xlu0 %v1657_v39 }
 0x68a   :  { %1661 = vadd.xlane.f32.xlu1 %v1660_v40 }
 0x711   :  { %v1637_v41 = vpop.xlane.xlu0 %1636 }
 0x712   :  { %v1641_v42 = vsel %vm107_vm0, %v1637_v41, 0.0 }
 0x713   :  { %v1642_v44 = vrot.slane %v1641_v42, 4  ;;  %v1640_v45 = vpop.xlane.xlu1 %1639 }
 0x714   :  { %v1648_v47 = vsel %vm107_vm0, %v1640_v45, 0.0 }
 0x715   :  { %v1643_v48 = vadd.f32 %v1642_v44, %v1641_v42  ;;  %v1649_v43 = vrot.slane %v1648_v47, 4  ;;  %v1659_v49 = vpop.xlane.xlu0 %1658 }
 0x716   :  { %v1663_v50 = vsel %vm107_vm0, %v1659_v49, 0.0 }
 0x717   :  { %v1644_v52 = vrot.slane %v1643_v48, 2  ;;  %v1650_v54 = vadd.f32 %v1649_v43, %v1648_v47  ;;  %v1664_v46 = vrot.slane %v1663_v50, 4  ;;  %v1662_v56 = vpop.xlane.xlu1 %1661 }
 0x718   :  { %v1670_v57 = vsel %vm107_vm0, %v1662_v56, 0.0 }
 0x719   :  { %v1645_v59 = vadd.f32 %v1644_v52, %v1643_v48  ;;  %v1651_v60 = vrot.slane %v1650_v54, 2  ;;  %v1665_v61 = vadd.f32 %v1664_v46, %v1663_v50  ;;  %v1671_v62 = vrot.slane %v1670_v57, 4 }
 0x71b   :  { %v1646_v63 = vrot.slane %v1645_v59, 1  ;;  %v1652_v0 = vadd.f32 %v1651_v60, %v1650_v54  ;;  %v1666_v1 = vrot.slane %v1665_v61, 2  ;;  %v1672_v2 = vadd.f32 %v1671_v62, %v1670_v57 }
 0x71d   :  { %v1647_v53 = vadd.f32 %v1646_v63, %v1645_v59  ;;  %v1653_v58 = vrot.slane %v1652_v0, 1  ;;  %v1667_v4 = vadd.f32 %v1666_v1, %v1665_v61  ;;  %v1673_v5 = vrot.slane %v1672_v2, 2 }
 0x71f   :  { %v1677_v6 = vmul.f32 0.0625, %v1647_v53  ;;  %v1654_v7 = vadd.f32 %v1653_v58, %v1652_v0  ;;  %v1668_v8 = vrot.slane %v1667_v4, 1  ;;  %v1674_v9 = vadd.f32 %v1673_v5, %v1672_v2 }
 0x721   :  { %v1669_v10 = vadd.f32 %v1668_v8, %v1667_v4  ;;  %v1678_v11 = vmul.f32 0.0625, %v1654_v7  ;;  %v1675_v12 = vrot.slane %v1674_v9, 1  ;;  %v1681_v13 = vmul.f32 %v1677_v6, %v1677_v6 }
 0x722   :  { %v1685_v20 = vsub.f32 %v2411_v33, %v1677_v6 }
 0x723   :  { %v1679_v14 = vmul.f32 0.0625, %v1669_v10  ;;  %v1676_v15 = vadd.f32 %v1675_v12, %v1674_v9  ;;  %v1682_v17 = vmul.f32 %v1678_v11, %v1678_v11  ;;  %v1686_v24 = vsub.f32 %v2413_v35, %v1678_v11 }
 0x725   :  { %v1683_v16 = vsub.f32 %v1679_v14, %v1681_v13  ;;  %v1680_v51 = vmul.f32 0.0625, %v1676_v15 }
 0x727   :  { %v1687_v18 = vadd.f32 1e-05, %v1683_v16  ;;  %v1684_v55 = vsub.f32 %v1680_v51, %v1682_v17 }
 0x729   :  { %1987 = vrsqrt.f32 %v1687_v18  ;;  %v1688_v19 = vadd.f32 1e-05, %v1684_v55 }
 0x72b   :  { %1989 = vrsqrt.f32 %v1688_v19 }
 0x733   :  { %v1988_v21 = vpop.eup %1987 }
 0x734   :  { %v1691_v23 = vmul.f32 %v1988_v21, %v1685_v20 }
 0x735   :  { %v1990_v26 = vpop.eup %1989 }
 0x736   :  { %v1693_v27 = vmul.f32 %v1691_v23, %v1633_v22  ;;  %v1692_v28 = vmul.f32 %v1990_v26, %v1686_v24 }
 0x738   :  { %v1695_v29 = vadd.f32 %v1693_v27, %v1634_v25  ;;  %v1694_v30 = vmul.f32 %v1692_v28, %v1633_v22 }
 0x73a   :  { %vm1697_vm0 = vcmp.ge.f32.partialorder %v1695_v29, 0.0  ;;  %v1699_v31 = vmul.f32 0.2, %v1695_v29  ;;  %v1696_v32 = vadd.f32 %v1694_v30, %v1634_v25 }
 0x73c   :  { %v1701_v33 = vsel %vm1697_vm0, %v1695_v29, %v1699_v31  ;;  %vm1698_vm1 = vcmp.ge.f32.partialorder %v1696_v32, 0.0  ;;  %v1700_v34 = vmul.f32 0.2, %v1696_v32 }
 0x73d   :  { %1703 = vst.msk [vmem:[%s2462_s17] sm:$0x3] %vm552_vm4, %v1701_v33 }
 0x73e   :  { %v1702_v35 = vsel %vm1698_vm1, %v1696_v32, %v1700_v34 }
 0x73f   :  { %1704 = vst.msk [vmem:[%s2462_s17 + $0x2] sm:$0x3] %vm552_vm4, %v1702_v35 }

</bundles_post_ra>
